<compile_context>
chip_gen: v7x
topology: tpu7x:2x2x1
jax: 0.10.0
libtpu: 0.0.40
codegen_flags: <defaults>
</compile_context>

<pallas_src>
import functools
import math

import jax
import jax.numpy as jnp
from jax.experimental import pallas as pl
from jax.experimental.pallas import tpu as pltpu

LN_EPS = 1e-5
NEG_FILL = -1.0e9


# ----------------------------------------------------------------------------
# In-kernel building blocks (operate on loaded jnp values, one batch element)
# ----------------------------------------------------------------------------
def _layer_norm(y, g, b):
    mu = jnp.mean(y, axis=-1, keepdims=True)
    var = jnp.mean((y - mu) * (y - mu), axis=-1, keepdims=True)
    return (y - mu) * jax.lax.rsqrt(var + LN_EPS) * g + b


def _attention(x_q, x_kv, wqkv, bqkv, wo3, bo, *, scale, causal_fill):
    """Multi-head attention for one batch element, heads batched via einsum.

    x_q: (Sq, D), x_kv: (Sk, D)
    wqkv: (3, H, D, dk)   bqkv: (3, H, 1, dk)   wo3: (H, dk, D)   bo: (1, D)
    """
    num_heads = wqkv.shape[1]
    sq, d_model = x_q.shape
    sk = x_kv.shape[0]

    # Broadcast activations over a leading head axis so every matmul is a clean
    # batched (H, m, k) @ (H, k, n) einsum — no lane slicing / reshapes.
    xq_b = jnp.broadcast_to(x_q[None], (num_heads, sq, d_model))
    xkv_b = jnp.broadcast_to(x_kv[None], (num_heads, sk, d_model))

    q3 = jnp.einsum('hsd,hdk->hsk', xq_b, wqkv[0],
                    preferred_element_type=jnp.float32) + bqkv[0]
    k3 = jnp.einsum('hsd,hdk->hsk', xkv_b, wqkv[1],
                    preferred_element_type=jnp.float32) + bqkv[1]
    v3 = jnp.einsum('hsd,hdk->hsk', xkv_b, wqkv[2],
                    preferred_element_type=jnp.float32) + bqkv[2]

    s = jnp.einsum('hqd,hkd->hqk', q3, k3,
                   preferred_element_type=jnp.float32) * scale
    if causal_fill:
        # Reference: masked_fill(mask == 0, -1e9) with mask == 0 ON/BELOW diag.
        row = jax.lax.broadcasted_iota(jnp.int32, s.shape, 1)
        col = jax.lax.broadcasted_iota(jnp.int32, s.shape, 2)
        s = jnp.where(row >= col, jnp.float32(NEG_FILL), s)

    s = s - jnp.max(s, axis=-1, keepdims=True)
    p = jnp.exp(s)
    p = p / jnp.sum(p, axis=-1, keepdims=True)          # exact division
    ctx = jnp.einsum('hqk,hkd->hqd', p, v3, preferred_element_type=jnp.float32)

    # sum_h ctx_h @ Wo[h*dk:(h+1)*dk, :] == concat(ctx_heads) @ Wo
    out_h = jnp.einsum('hqd,hde->hqe', ctx, wo3, preferred_element_type=jnp.float32)
    return jnp.sum(out_h, axis=0) + bo                  # (Sq, D)


def _ffn(x, w1, b1, w2, b2):
    h = jnp.dot(x, w1, preferred_element_type=jnp.float32) + b1
    h = jnp.maximum(h, 0.0)
    return jnp.dot(h, w2, preferred_element_type=jnp.float32) + b2


# ----------------------------------------------------------------------------
# The single whole-model kernel (one grid step == one batch element)
# ----------------------------------------------------------------------------
def _transformer_kernel(src_ref, tgt_ref,
                        e_wqkv, e_bqkv, e_wo, e_w1, e_w2, e_dvec, e_fvec,
                        ds_wqkv, ds_bqkv, ds_wo,
                        dc_wqkv, dc_bqkv, dc_wo,
                        d_w1, d_w2, d_dvec, d_fvec,
                        ow_ref, ob_ref,
                        o_ref, *, num_layers, scale):
    # ---------------- encoder stack ----------------
    x = src_ref[0]                                        # (Ssrc, D)
    for l in range(num_layers):
        dv = e_dvec[l]                                    # (6, D)
        a = _attention(x, x, e_wqkv[l], e_bqkv[l], e_wo[l], dv[0:1],
                       scale=scale, causal_fill=False)
        x = _layer_norm(x + a, dv[1:2], dv[2:3])
        f = _ffn(x, e_w1[l], e_fvec[l], e_w2[l], dv[3:4])
        x = _layer_norm(x + f, dv[4:5], dv[5:6])
    enc_out = x

    # ---------------- decoder stack ----------------
    y = tgt_ref[0]                                        # (Stgt, D)
    for l in range(num_layers):
        dv = d_dvec[l]                                    # (9, D)
        a = _attention(y, y, ds_wqkv[l], ds_bqkv[l], ds_wo[l], dv[0:1],
                       scale=scale, causal_fill=True)
        y = _layer_norm(y + a, dv[1:2], dv[2:3])
        a = _attention(y, enc_out, dc_wqkv[l], dc_bqkv[l], dc_wo[l], dv[3:4],
                       scale=scale, causal_fill=False)
        y = _layer_norm(y + a, dv[4:5], dv[5:6])
        f = _ffn(y, d_w1[l], d_fvec[l], d_w2[l], dv[6:7])
        y = _layer_norm(y + f, dv[7:8], dv[8:9])

    # ---------------- output projection (vocab padded to 128 lanes) ----------
    o_ref[0] = jnp.dot(y, ow_ref[...], preferred_element_type=jnp.float32) + ob_ref[...]


# ----------------------------------------------------------------------------
# Wrapper
# ----------------------------------------------------------------------------
_WEIGHT_NAMES = ("e_wqkv", "e_bqkv", "e_wo", "e_w1", "e_w2", "e_dvec", "e_fvec",
                 "ds_wqkv", "ds_bqkv", "ds_wo",
                 "dc_wqkv", "dc_bqkv", "dc_wo",
                 "d_w1", "d_w2", "d_dvec", "d_fvec",
                 "out_w", "out_b")


def transformer_forward(p, src, tgt, *, num_heads, tgt_vocab):
    B, Ssrc = src.shape
    _, Stgt = tgt.shape
    D = p["src_emb"].shape[1]
    L = p["e_wqkv"].shape[0]
    F = p["e_w1"].shape[2]
    dk = D // num_heads
    vpad = p["out_w"].shape[1]

    pe = p["pe"]
    src_x = jnp.take(p["src_emb"], src, axis=0) + pe[:Ssrc][None, :, :]
    tgt_x = jnp.take(p["tgt_emb"], tgt, axis=0) + pe[:Stgt][None, :, :]

    weights = [p[n] for n in _WEIGHT_NAMES]

    def batch_spec(shape):
        nd = len(shape)
        return pl.BlockSpec((1,) + tuple(shape[1:]),
                            lambda b, _nd=nd: (b,) + (0,) * (_nd - 1))

    def full_spec(arr):
        nd = arr.ndim
        return pl.BlockSpec(tuple(arr.shape), lambda b, _nd=nd: (0,) * _nd)

    in_specs = ([batch_spec(src_x.shape), batch_spec(tgt_x.shape)]
                + [full_spec(w) for w in weights])
    out_spec = pl.BlockSpec((1, Stgt, vpad), lambda b: (b, 0, 0))

    # Advisory cost estimate so XLA can schedule the embedding glue around us.
    def attn_flops(sq, sk):
        return 2 * sq * D * D * 3 + 2 * sq * sk * D * 2 + 2 * sq * D * D
    flops = B * (L * (attn_flops(Ssrc, Ssrc) + 4 * Ssrc * D * F)
                 + L * (attn_flops(Stgt, Stgt) + attn_flops(Stgt, Ssrc)
                        + 4 * Stgt * D * F)
                 + 2 * Stgt * D * vpad)
    transc = B * L * num_heads * (Ssrc * Ssrc + Stgt * Stgt + Stgt * Ssrc)
    bytes_accessed = (sum(int(w.size) * 4 for w in weights)
                      + int(src_x.size + tgt_x.size) * 4 + B * Stgt * vpad * 4)

    kern = functools.partial(_transformer_kernel, num_layers=L,
                             scale=1.0 / math.sqrt(dk))
    logits_pad = pl.pallas_call(
        kern,
        out_shape=jax.ShapeDtypeStruct((B, Stgt, vpad), jnp.float32),
        grid=(B,),
        in_specs=in_specs,
        out_specs=out_spec,
        compiler_params=pltpu.CompilerParams(dimension_semantics=("parallel",)),
        cost_estimate=pl.CostEstimate(flops=int(flops),
                                      transcendentals=int(transc),
                                      bytes_accessed=int(bytes_accessed)),
    )(src_x, tgt_x, *weights)
    return logits_pad[..., :tgt_vocab]


# ----------------------------------------------------------------------------
# Deterministic parameter construction (matches the PyTorch _init_weights:
# Xavier-uniform Linear weights, zero biases, N(0, 0.02) embeddings, LN gamma=1).
# ----------------------------------------------------------------------------
def positional_encoding(max_len, d_model):
    pos = jnp.arange(max_len, dtype=jnp.float32)[:, None]
    div = jnp.exp(jnp.arange(0, d_model, 2, dtype=jnp.float32)
                  * (-math.log(10000.0) / d_model))
    pe = jnp.zeros((max_len, d_model), jnp.float32)
    pe = pe.at[:, 0::2].set(jnp.sin(pos * div))
    pe = pe.at[:, 1::2].set(jnp.cos(pos * div))
    return pe


def _xavier(key, fan_in, fan_out):
    a = math.sqrt(6.0 / (fan_in + fan_out))
    return jax.random.uniform(key, (fan_in, fan_out), dtype=jnp.float32,
                              minval=-a, maxval=a)


def _attn_params(key, d_model, num_heads):
    dk = d_model // num_heads
    kq, kk, kv, ko = jax.random.split(key, 4)

    def head_w(k):  # (H, D, dk): head h uses output columns [h*dk:(h+1)*dk]
        w_t = _xavier(k, d_model, d_model)
        return w_t.reshape(d_model, num_heads, dk).transpose(1, 0, 2)

    wqkv = jnp.stack([head_w(kq), head_w(kk), head_w(kv)])          # (3,H,D,dk)
    bqkv = jnp.zeros((3, num_heads, 1, dk), jnp.float32)
    wo3 = _xavier(ko, d_model, d_model).reshape(num_heads, dk, d_model)
    bo = jnp.zeros((d_model,), jnp.float32)
    return wqkv, bqkv, wo3, bo


def _ffn_params(key, d_model, d_ff):
    k1, k2 = jax.random.split(key)
    return (_xavier(k1, d_model, d_ff), jnp.zeros((d_ff,), jnp.float32),
            _xavier(k2, d_ff, d_model), jnp.zeros((d_model,), jnp.float32))


def make_params(key, src_vocab, tgt_vocab, d_model, num_heads, d_ff,
                num_layers, max_len):
    assert d_model % num_heads == 0
    keys = jax.random.split(key, 3 + 2 * num_layers)
    vpad = max(128, ((tgt_vocab + 127) // 128) * 128)

    p = {
        "src_emb": 0.02 * jax.random.normal(keys[0], (src_vocab, d_model), jnp.float32),
        "tgt_emb": 0.02 * jax.random.normal(keys[1], (tgt_vocab, d_model), jnp.float32),
        "pe": positional_encoding(max_len, d_model),
        "out_w": jnp.pad(_xavier(keys[2], d_model, tgt_vocab),
                         ((0, 0), (0, vpad - tgt_vocab))),
        "out_b": jnp.zeros((1, vpad), jnp.float32),
    }

    ones = jnp.ones((d_model,), jnp.float32)
    zeros = jnp.zeros((d_model,), jnp.float32)

    # ----- encoder stack (stacked over layers) -----
    e_wqkv, e_bqkv, e_wo, e_w1, e_w2, e_dvec, e_fvec = ([] for _ in range(7))
    for i in range(num_layers):
        k_sa, k_ff = jax.random.split(keys[3 + i])
        wqkv, bqkv, wo3, bo = _attn_params(k_sa, d_model, num_heads)
        w1, b1, w2, b2 = _ffn_params(k_ff, d_model, d_ff)
        e_wqkv.append(wqkv); e_bqkv.append(bqkv); e_wo.append(wo3)
        e_w1.append(w1); e_w2.append(w2)
        e_dvec.append(jnp.stack([bo, ones, zeros, b2, ones, zeros]))   # (6, D)
        e_fvec.append(b1[None, :])                                     # (1, F)
    p["e_wqkv"] = jnp.stack(e_wqkv); p["e_bqkv"] = jnp.stack(e_bqkv)
    p["e_wo"] = jnp.stack(e_wo); p["e_w1"] = jnp.stack(e_w1)
    p["e_w2"] = jnp.stack(e_w2); p["e_dvec"] = jnp.stack(e_dvec)
    p["e_fvec"] = jnp.stack(e_fvec)

    # ----- decoder stack (stacked over layers) -----
    (ds_wqkv, ds_bqkv, ds_wo, dc_wqkv, dc_bqkv, dc_wo,
     d_w1, d_w2, d_dvec, d_fvec) = ([] for _ in range(10))
    for i in range(num_layers):
        k_sa, k_ca, k_ff = jax.random.split(keys[3 + num_layers + i], 3)
        s_wqkv, s_bqkv, s_wo, s_bo = _attn_params(k_sa, d_model, num_heads)
        c_wqkv, c_bqkv, c_wo, c_bo = _attn_params(k_ca, d_model, num_heads)
        w1, b1, w2, b2 = _ffn_params(k_ff, d_model, d_ff)
        ds_wqkv.append(s_wqkv); ds_bqkv.append(s_bqkv); ds_wo.append(s_wo)
        dc_wqkv.append(c_wqkv); dc_bqkv.append(c_bqkv); dc_wo.append(c_wo)
        d_w1.append(w1); d_w2.append(w2)
        d_dvec.append(jnp.stack([s_bo, ones, zeros,
                                 c_bo, ones, zeros,
                                 b2, ones, zeros]))                    # (9, D)
        d_fvec.append(b1[None, :])                                     # (1, F)
    p["ds_wqkv"] = jnp.stack(ds_wqkv); p["ds_bqkv"] = jnp.stack(ds_bqkv)
    p["ds_wo"] = jnp.stack(ds_wo)
    p["dc_wqkv"] = jnp.stack(dc_wqkv); p["dc_bqkv"] = jnp.stack(dc_bqkv)
    p["dc_wo"] = jnp.stack(dc_wo)
    p["d_w1"] = jnp.stack(d_w1); p["d_w2"] = jnp.stack(d_w2)
    p["d_dvec"] = jnp.stack(d_dvec); p["d_fvec"] = jnp.stack(d_fvec)
    return p


# ----------------------------------------------------------------------------
if __name__ == "__main__":
    SRC_VOCAB, TGT_VOCAB = 48, 64
    D_MODEL, NUM_HEADS, D_FF, NUM_LAYERS = 32, 4, 64, 2
    BATCH, SEQ, MAX_LEN = 2, 8, 64

    root = jax.random.PRNGKey(0)
    k_params, k_src, k_tgt = jax.random.split(root, 3)

    params = make_params(k_params, SRC_VOCAB, TGT_VOCAB, D_MODEL, NUM_HEADS,
                         D_FF, NUM_LAYERS, MAX_LEN)
    src = jax.random.randint(k_src, (BATCH, SEQ), 0, SRC_VOCAB, dtype=jnp.int32)
    tgt = jax.random.randint(k_tgt, (BATCH, SEQ), 0, TGT_VOCAB, dtype=jnp.int32)

    fwd = jax.jit(functools.partial(transformer_forward,
                                    num_heads=NUM_HEADS, tgt_vocab=TGT_VOCAB))
    logits = jax.block_until_ready(fwd(params, src, tgt))

    assert logits.shape == (BATCH, SEQ, TGT_VOCAB)
    assert bool(jnp.all(jnp.isfinite(logits)))
    print("KERNEL_OK")
</pallas_src>

<mosaic_0001>
module attributes {stable_mosaic.version = 11 : i64} {
  func.func @_transformer_kernel(%arg0: i32, %arg1: memref<1x8x32xf32, #tpu.memory_space<vmem>>, %arg2: memref<1x8x32xf32, #tpu.memory_space<vmem>>, %arg3: memref<2x3x4x32x8xf32, #tpu.memory_space<vmem>>, %arg4: memref<2x3x4x1x8xf32, #tpu.memory_space<vmem>>, %arg5: memref<2x4x8x32xf32, #tpu.memory_space<vmem>>, %arg6: memref<2x32x64xf32, #tpu.memory_space<vmem>>, %arg7: memref<2x64x32xf32, #tpu.memory_space<vmem>>, %arg8: memref<2x6x32xf32, #tpu.memory_space<vmem>>, %arg9: memref<2x1x64xf32, #tpu.memory_space<vmem>>, %arg10: memref<2x3x4x32x8xf32, #tpu.memory_space<vmem>>, %arg11: memref<2x3x4x1x8xf32, #tpu.memory_space<vmem>>, %arg12: memref<2x4x8x32xf32, #tpu.memory_space<vmem>>, %arg13: memref<2x3x4x32x8xf32, #tpu.memory_space<vmem>>, %arg14: memref<2x3x4x1x8xf32, #tpu.memory_space<vmem>>, %arg15: memref<2x4x8x32xf32, #tpu.memory_space<vmem>>, %arg16: memref<2x32x64xf32, #tpu.memory_space<vmem>>, %arg17: memref<2x64x32xf32, #tpu.memory_space<vmem>>, %arg18: memref<2x9x32xf32, #tpu.memory_space<vmem>>, %arg19: memref<2x1x64xf32, #tpu.memory_space<vmem>>, %arg20: memref<32x128xf32, #tpu.memory_space<vmem>>, %arg21: memref<1x128xf32, #tpu.memory_space<vmem>>, %arg22: memref<1x8x128xf32, #tpu.memory_space<vmem>>) attributes {dimension_semantics = [#tpu.dimension_semantics<parallel>], iteration_bounds = array<i64: 2>, scalar_prefetch = 0 : i64, scratch_operands = 0 : i64, tpu.core_type = #tpu.core_type<tc>, window_params = [{transform_indices = @transform_0, window_bounds = array<i64: 1, 8, 32>}, {transform_indices = @transform_1, window_bounds = array<i64: 1, 8, 32>}, {pipeline_mode = #tpu.pipeline_mode<synchronous>, transform_indices = @transform_2, window_bounds = array<i64: 2, 3, 4, 32, 8>}, {pipeline_mode = #tpu.pipeline_mode<synchronous>, transform_indices = @transform_3, window_bounds = array<i64: 2, 3, 4, 1, 8>}, {pipeline_mode = #tpu.pipeline_mode<synchronous>, transform_indices = @transform_4, window_bounds = array<i64: 2, 4, 8, 32>}, {pipeline_mode = #tpu.pipeline_mode<synchronous>, transform_indices = @transform_5, window_bounds = array<i64: 2, 32, 64>}, {pipeline_mode = #tpu.pipeline_mode<synchronous>, transform_indices = @transform_6, window_bounds = array<i64: 2, 64, 32>}, {pipeline_mode = #tpu.pipeline_mode<synchronous>, transform_indices = @transform_7, window_bounds = array<i64: 2, 6, 32>}, {pipeline_mode = #tpu.pipeline_mode<synchronous>, transform_indices = @transform_8, window_bounds = array<i64: 2, 1, 64>}, {pipeline_mode = #tpu.pipeline_mode<synchronous>, transform_indices = @transform_9, window_bounds = array<i64: 2, 3, 4, 32, 8>}, {pipeline_mode = #tpu.pipeline_mode<synchronous>, transform_indices = @transform_10, window_bounds = array<i64: 2, 3, 4, 1, 8>}, {pipeline_mode = #tpu.pipeline_mode<synchronous>, transform_indices = @transform_11, window_bounds = array<i64: 2, 4, 8, 32>}, {pipeline_mode = #tpu.pipeline_mode<synchronous>, transform_indices = @transform_12, window_bounds = array<i64: 2, 3, 4, 32, 8>}, {pipeline_mode = #tpu.pipeline_mode<synchronous>, transform_indices = @transform_13, window_bounds = array<i64: 2, 3, 4, 1, 8>}, {pipeline_mode = #tpu.pipeline_mode<synchronous>, transform_indices = @transform_14, window_bounds = array<i64: 2, 4, 8, 32>}, {pipeline_mode = #tpu.pipeline_mode<synchronous>, transform_indices = @transform_15, window_bounds = array<i64: 2, 32, 64>}, {pipeline_mode = #tpu.pipeline_mode<synchronous>, transform_indices = @transform_16, window_bounds = array<i64: 2, 64, 32>}, {pipeline_mode = #tpu.pipeline_mode<synchronous>, transform_indices = @transform_17, window_bounds = array<i64: 2, 9, 32>}, {pipeline_mode = #tpu.pipeline_mode<synchronous>, transform_indices = @transform_18, window_bounds = array<i64: 2, 1, 64>}, {pipeline_mode = #tpu.pipeline_mode<synchronous>, transform_indices = @transform_19, window_bounds = array<i64: 32, 128>}, {pipeline_mode = #tpu.pipeline_mode<synchronous>, transform_indices = @transform_20, window_bounds = array<i64: 1, 128>}, {transform_indices = @transform_21, window_bounds = array<i64: 1, 8, 128>}]} {
    %c0 = arith.constant 0 : index
    %c0_0 = arith.constant 0 : index
    %c0_1 = arith.constant 0 : index
    %0 = vector.load %arg1[%c0, %c0_0, %c0_1] : memref<1x8x32xf32, #tpu.memory_space<vmem>>, vector<1x8x32xf32>
    %1 = vector.shape_cast %0 : vector<1x8x32xf32> to vector<8x32xf32>
    %c0_2 = arith.constant 0 : index
    %c0_3 = arith.constant 0 : index
    %c0_4 = arith.constant 0 : index
    %2 = vector.load %arg8[%c0_2, %c0_3, %c0_4] : memref<2x6x32xf32, #tpu.memory_space<vmem>>, vector<1x6x32xf32>
    %3 = vector.shape_cast %2 : vector<1x6x32xf32> to vector<6x32xf32>
    %c0_5 = arith.constant 0 : index
    %c0_6 = arith.constant 0 : index
    %c0_7 = arith.constant 0 : index
    %c0_8 = arith.constant 0 : index
    %c0_9 = arith.constant 0 : index
    %4 = vector.load %arg3[%c0_5, %c0_6, %c0_7, %c0_8, %c0_9] : memref<2x3x4x32x8xf32, #tpu.memory_space<vmem>>, vector<1x3x4x32x8xf32>
    %5 = vector.shape_cast %4 : vector<1x3x4x32x8xf32> to vector<3x4x32x8xf32>
    %c0_10 = arith.constant 0 : index
    %c0_11 = arith.constant 0 : index
    %c0_12 = arith.constant 0 : index
    %c0_13 = arith.constant 0 : index
    %c0_14 = arith.constant 0 : index
    %6 = vector.load %arg4[%c0_10, %c0_11, %c0_12, %c0_13, %c0_14] : memref<2x3x4x1x8xf32, #tpu.memory_space<vmem>>, vector<1x3x4x1x8xf32>
    %7 = vector.shape_cast %6 : vector<1x3x4x1x8xf32> to vector<3x4x1x8xf32>
    %c0_15 = arith.constant 0 : index
    %c0_16 = arith.constant 0 : index
    %c0_17 = arith.constant 0 : index
    %c0_18 = arith.constant 0 : index
    %8 = vector.load %arg5[%c0_15, %c0_16, %c0_17, %c0_18] : memref<2x4x8x32xf32, #tpu.memory_space<vmem>>, vector<1x4x8x32xf32>
    %9 = vector.shape_cast %8 : vector<1x4x8x32xf32> to vector<4x8x32xf32>
    %10 = vector.extract_strided_slice %3 {offsets = [0, 0], sizes = [1, 32], strides = [1, 1]} : vector<6x32xf32> to vector<1x32xf32>
    %11 = vector.shape_cast %1 : vector<8x32xf32> to vector<1x8x32xf32>
    %12 = vector.shape_cast %11 : vector<1x8x32xf32> to vector<1x8x32xf32>
    %13 = vector.broadcast %12 : vector<1x8x32xf32> to vector<4x8x32xf32>
    %14 = vector.shape_cast %1 : vector<8x32xf32> to vector<1x8x32xf32>
    %15 = vector.shape_cast %14 : vector<1x8x32xf32> to vector<1x8x32xf32>
    %16 = vector.broadcast %15 : vector<1x8x32xf32> to vector<4x8x32xf32>
    %17 = vector.extract_strided_slice %5 {offsets = [0, 0, 0, 0], sizes = [1, 4, 32, 8], strides = [1, 1, 1, 1]} : vector<3x4x32x8xf32> to vector<1x4x32x8xf32>
    %18 = vector.shape_cast %17 : vector<1x4x32x8xf32> to vector<4x32x8xf32>
    "tpu.trace_start"() <{level = 10 : i32, message = "hsd,hdk->hsk"}> : () -> ()
    %cst = arith.constant dense<0.000000e+00> : vector<4x8x8xf32>
    %19 = tpu.matmul %13, %18, %cst {dimension_numbers = #tpu.dot_dimension_numbers<[2], [1], [1], [2], [0, 0, 0, 1, 1, 2], [0], [0]>} : vector<4x8x32xf32>, vector<4x32x8xf32>, vector<4x8x8xf32> -> vector<4x8x8xf32>
    "tpu.trace_stop"() : () -> ()
    %20 = vector.extract_strided_slice %7 {offsets = [0, 0, 0, 0], sizes = [1, 4, 1, 8], strides = [1, 1, 1, 1]} : vector<3x4x1x8xf32> to vector<1x4x1x8xf32>
    %21 = vector.shape_cast %20 : vector<1x4x1x8xf32> to vector<4x1x8xf32>
    %22 = vector.broadcast %21 : vector<4x1x8xf32> to vector<4x8x8xf32>
    %23 = arith.addf %19, %22 : vector<4x8x8xf32>
    %24 = vector.extract_strided_slice %5 {offsets = [1, 0, 0, 0], sizes = [1, 4, 32, 8], strides = [1, 1, 1, 1]} : vector<3x4x32x8xf32> to vector<1x4x32x8xf32>
    %25 = vector.shape_cast %24 : vector<1x4x32x8xf32> to vector<4x32x8xf32>
    "tpu.trace_start"() <{level = 10 : i32, message = "hsd,hdk->hsk"}> : () -> ()
    %cst_19 = arith.constant dense<0.000000e+00> : vector<4x8x8xf32>
    %26 = tpu.matmul %16, %25, %cst_19 {dimension_numbers = #tpu.dot_dimension_numbers<[2], [1], [1], [2], [0, 0, 0, 1, 1, 2], [0], [0]>} : vector<4x8x32xf32>, vector<4x32x8xf32>, vector<4x8x8xf32> -> vector<4x8x8xf32>
    "tpu.trace_stop"() : () -> ()
    %27 = vector.extract_strided_slice %7 {offsets = [1, 0, 0, 0], sizes = [1, 4, 1, 8], strides = [1, 1, 1, 1]} : vector<3x4x1x8xf32> to vector<1x4x1x8xf32>
    %28 = vector.shape_cast %27 : vector<1x4x1x8xf32> to vector<4x1x8xf32>
    %29 = vector.broadcast %28 : vector<4x1x8xf32> to vector<4x8x8xf32>
    %30 = arith.addf %26, %29 : vector<4x8x8xf32>
    %31 = vector.extract_strided_slice %5 {offsets = [2, 0, 0, 0], sizes = [1, 4, 32, 8], strides = [1, 1, 1, 1]} : vector<3x4x32x8xf32> to vector<1x4x32x8xf32>
    %32 = vector.shape_cast %31 : vector<1x4x32x8xf32> to vector<4x32x8xf32>
    "tpu.trace_start"() <{level = 10 : i32, message = "hsd,hdk->hsk"}> : () -> ()
    %cst_20 = arith.constant dense<0.000000e+00> : vector<4x8x8xf32>
    %33 = tpu.matmul %16, %32, %cst_20 {dimension_numbers = #tpu.dot_dimension_numbers<[2], [1], [1], [2], [0, 0, 0, 1, 1, 2], [0], [0]>} : vector<4x8x32xf32>, vector<4x32x8xf32>, vector<4x8x8xf32> -> vector<4x8x8xf32>
    "tpu.trace_stop"() : () -> ()
    %34 = vector.extract_strided_slice %7 {offsets = [2, 0, 0, 0], sizes = [1, 4, 1, 8], strides = [1, 1, 1, 1]} : vector<3x4x1x8xf32> to vector<1x4x1x8xf32>
    %35 = vector.shape_cast %34 : vector<1x4x1x8xf32> to vector<4x1x8xf32>
    %36 = vector.broadcast %35 : vector<4x1x8xf32> to vector<4x8x8xf32>
    %37 = arith.addf %33, %36 : vector<4x8x8xf32>
    "tpu.trace_start"() <{level = 10 : i32, message = "hqd,hkd->hqk"}> : () -> ()
    %cst_21 = arith.constant dense<0.000000e+00> : vector<4x8x8xf32>
    %38 = tpu.matmul %23, %30, %cst_21 {dimension_numbers = #tpu.dot_dimension_numbers<[2], [2], [1], [1], [0, 0, 0, 1, 1, 1], [0], [0]>} : vector<4x8x8xf32>, vector<4x8x8xf32>, vector<4x8x8xf32> -> vector<4x8x8xf32>
    "tpu.trace_stop"() : () -> ()
    %cst_22 = arith.constant 0.353553385 : f32
    %39 = vector.broadcast %cst_22 : f32 to vector<4x8x8xf32>
    %40 = arith.mulf %38, %39 : vector<4x8x8xf32>
    %cst_23 = arith.constant dense<0xFF800000> : vector<4x8xf32>
    %41 = vector.multi_reduction <maximumf>, %40, %cst_23 [2] : vector<4x8x8xf32> to vector<4x8xf32>
    %42 = vector.shape_cast %41 : vector<4x8xf32> to vector<4x8x1xf32>
    %43 = vector.broadcast %42 : vector<4x8x1xf32> to vector<4x8x8xf32>
    %44 = arith.subf %40, %43 : vector<4x8x8xf32>
    %45 = math.exp %44 : vector<4x8x8xf32>
    %cst_24 = arith.constant dense<0.000000e+00> : vector<4x8xf32>
    %46 = vector.multi_reduction <add>, %45, %cst_24 [2] : vector<4x8x8xf32> to vector<4x8xf32>
    %47 = vector.shape_cast %46 : vector<4x8xf32> to vector<4x8x1xf32>
    %48 = vector.broadcast %47 : vector<4x8x1xf32> to vector<4x8x8xf32>
    %49 = arith.divf %45, %48 : vector<4x8x8xf32>
    "tpu.trace_start"() <{level = 10 : i32, message = "hqk,hkd->hqd"}> : () -> ()
    %cst_25 = arith.constant dense<0.000000e+00> : vector<4x8x8xf32>
    %50 = tpu.matmul %49, %37, %cst_25 {dimension_numbers = #tpu.dot_dimension_numbers<[2], [1], [1], [2], [0, 0, 0, 1, 1, 2], [0], [0]>} : vector<4x8x8xf32>, vector<4x8x8xf32>, vector<4x8x8xf32> -> vector<4x8x8xf32>
    "tpu.trace_stop"() : () -> ()
    "tpu.trace_start"() <{level = 10 : i32, message = "hqd,hde->hqe"}> : () -> ()
    %cst_26 = arith.constant dense<0.000000e+00> : vector<4x8x32xf32>
    %51 = tpu.matmul %50, %9, %cst_26 {dimension_numbers = #tpu.dot_dimension_numbers<[2], [1], [1], [2], [0, 0, 0, 1, 1, 2], [0], [0]>} : vector<4x8x8xf32>, vector<4x8x32xf32>, vector<4x8x32xf32> -> vector<4x8x32xf32>
    "tpu.trace_stop"() : () -> ()
    %cst_27 = arith.constant dense<0.000000e+00> : vector<8x32xf32>
    %52 = vector.multi_reduction <add>, %51, %cst_27 [0] : vector<4x8x32xf32> to vector<8x32xf32>
    %53 = vector.broadcast %10 : vector<1x32xf32> to vector<8x32xf32>
    %54 = arith.addf %52, %53 : vector<8x32xf32>
    %55 = arith.addf %1, %54 : vector<8x32xf32>
    %56 = vector.extract_strided_slice %3 {offsets = [1, 0], sizes = [1, 32], strides = [1, 1]} : vector<6x32xf32> to vector<1x32xf32>
    %57 = vector.extract_strided_slice %3 {offsets = [2, 0], sizes = [1, 32], strides = [1, 1]} : vector<6x32xf32> to vector<1x32xf32>
    %cst_28 = arith.constant dense<0.000000e+00> : vector<8xf32>
    %58 = vector.multi_reduction <add>, %55, %cst_28 [1] : vector<8x32xf32> to vector<8xf32>
    %59 = vector.shape_cast %58 : vector<8xf32> to vector<8x1xf32>
    %cst_29 = arith.constant 3.200000e+01 : f32
    %60 = vector.broadcast %cst_29 : f32 to vector<8x1xf32>
    %61 = arith.divf %59, %60 : vector<8x1xf32>
    %62 = vector.broadcast %61 : vector<8x1xf32> to vector<8x32xf32>
    %63 = arith.subf %55, %62 : vector<8x32xf32>
    %64 = vector.broadcast %61 : vector<8x1xf32> to vector<8x32xf32>
    %65 = arith.subf %55, %64 : vector<8x32xf32>
    %66 = arith.mulf %63, %65 : vector<8x32xf32>
    %cst_30 = arith.constant dense<0.000000e+00> : vector<8xf32>
    %67 = vector.multi_reduction <add>, %66, %cst_30 [1] : vector<8x32xf32> to vector<8xf32>
    %68 = vector.shape_cast %67 : vector<8xf32> to vector<8x1xf32>
    %cst_31 = arith.constant 3.200000e+01 : f32
    %69 = vector.broadcast %cst_31 : f32 to vector<8x1xf32>
    %70 = arith.divf %68, %69 : vector<8x1xf32>
    %71 = vector.broadcast %61 : vector<8x1xf32> to vector<8x32xf32>
    %72 = arith.subf %55, %71 : vector<8x32xf32>
    %cst_32 = arith.constant 9.99999974E-6 : f32
    %73 = vector.broadcast %cst_32 : f32 to vector<8x1xf32>
    %74 = arith.addf %70, %73 : vector<8x1xf32>
    %75 = math.rsqrt %74 : vector<8x1xf32>
    %76 = vector.broadcast %75 : vector<8x1xf32> to vector<8x32xf32>
    %77 = arith.mulf %72, %76 : vector<8x32xf32>
    %78 = vector.broadcast %56 : vector<1x32xf32> to vector<8x32xf32>
    %79 = arith.mulf %77, %78 : vector<8x32xf32>
    %80 = vector.broadcast %57 : vector<1x32xf32> to vector<8x32xf32>
    %81 = arith.addf %79, %80 : vector<8x32xf32>
    %c0_33 = arith.constant 0 : index
    %c0_34 = arith.constant 0 : index
    %c0_35 = arith.constant 0 : index
    %82 = vector.load %arg6[%c0_33, %c0_34, %c0_35] : memref<2x32x64xf32, #tpu.memory_space<vmem>>, vector<1x32x64xf32>
    %83 = vector.shape_cast %82 : vector<1x32x64xf32> to vector<32x64xf32>
    %c0_36 = arith.constant 0 : index
    %c0_37 = arith.constant 0 : index
    %c0_38 = arith.constant 0 : index
    %84 = vector.load %arg9[%c0_36, %c0_37, %c0_38] : memref<2x1x64xf32, #tpu.memory_space<vmem>>, vector<1x1x64xf32>
    %85 = vector.shape_cast %84 : vector<1x1x64xf32> to vector<1x64xf32>
    %c0_39 = arith.constant 0 : index
    %c0_40 = arith.constant 0 : index
    %c0_41 = arith.constant 0 : index
    %86 = vector.load %arg7[%c0_39, %c0_40, %c0_41] : memref<2x64x32xf32, #tpu.memory_space<vmem>>, vector<1x64x32xf32>
    %87 = vector.shape_cast %86 : vector<1x64x32xf32> to vector<64x32xf32>
    %88 = vector.extract_strided_slice %3 {offsets = [3, 0], sizes = [1, 32], strides = [1, 1]} : vector<6x32xf32> to vector<1x32xf32>
    %cst_42 = arith.constant dense<0.000000e+00> : vector<8x64xf32>
    %89 = tpu.matmul %81, %83, %cst_42 {dimension_numbers = #tpu.dot_dimension_numbers<[1], [0], [0], [1], [0, 0, 1, 1], [], []>} : vector<8x32xf32>, vector<32x64xf32>, vector<8x64xf32> -> vector<8x64xf32>
    %90 = vector.broadcast %85 : vector<1x64xf32> to vector<8x64xf32>
    %91 = arith.addf %89, %90 : vector<8x64xf32>
    %cst_43 = arith.constant 0.000000e+00 : f32
    %92 = vector.broadcast %cst_43 : f32 to vector<8x64xf32>
    %93 = arith.maximumf %91, %92 : vector<8x64xf32>
    %cst_44 = arith.constant dense<0.000000e+00> : vector<8x32xf32>
    %94 = tpu.matmul %93, %87, %cst_44 {dimension_numbers = #tpu.dot_dimension_numbers<[1], [0], [0], [1], [0, 0, 1, 1], [], []>} : vector<8x64xf32>, vector<64x32xf32>, vector<8x32xf32> -> vector<8x32xf32>
    %95 = vector.broadcast %88 : vector<1x32xf32> to vector<8x32xf32>
    %96 = arith.addf %94, %95 : vector<8x32xf32>
    %97 = arith.addf %81, %96 : vector<8x32xf32>
    %98 = vector.extract_strided_slice %3 {offsets = [4, 0], sizes = [1, 32], strides = [1, 1]} : vector<6x32xf32> to vector<1x32xf32>
    %99 = vector.extract_strided_slice %3 {offsets = [5, 0], sizes = [1, 32], strides = [1, 1]} : vector<6x32xf32> to vector<1x32xf32>
    %cst_45 = arith.constant dense<0.000000e+00> : vector<8xf32>
    %100 = vector.multi_reduction <add>, %97, %cst_45 [1] : vector<8x32xf32> to vector<8xf32>
    %101 = vector.shape_cast %100 : vector<8xf32> to vector<8x1xf32>
    %cst_46 = arith.constant 3.200000e+01 : f32
    %102 = vector.broadcast %cst_46 : f32 to vector<8x1xf32>
    %103 = arith.divf %101, %102 : vector<8x1xf32>
    %104 = vector.broadcast %103 : vector<8x1xf32> to vector<8x32xf32>
    %105 = arith.subf %97, %104 : vector<8x32xf32>
    %106 = vector.broadcast %103 : vector<8x1xf32> to vector<8x32xf32>
    %107 = arith.subf %97, %106 : vector<8x32xf32>
    %108 = arith.mulf %105, %107 : vector<8x32xf32>
    %cst_47 = arith.constant dense<0.000000e+00> : vector<8xf32>
    %109 = vector.multi_reduction <add>, %108, %cst_47 [1] : vector<8x32xf32> to vector<8xf32>
    %110 = vector.shape_cast %109 : vector<8xf32> to vector<8x1xf32>
    %cst_48 = arith.constant 3.200000e+01 : f32
    %111 = vector.broadcast %cst_48 : f32 to vector<8x1xf32>
    %112 = arith.divf %110, %111 : vector<8x1xf32>
    %113 = vector.broadcast %103 : vector<8x1xf32> to vector<8x32xf32>
    %114 = arith.subf %97, %113 : vector<8x32xf32>
    %cst_49 = arith.constant 9.99999974E-6 : f32
    %115 = vector.broadcast %cst_49 : f32 to vector<8x1xf32>
    %116 = arith.addf %112, %115 : vector<8x1xf32>
    %117 = math.rsqrt %116 : vector<8x1xf32>
    %118 = vector.broadcast %117 : vector<8x1xf32> to vector<8x32xf32>
    %119 = arith.mulf %114, %118 : vector<8x32xf32>
    %120 = vector.broadcast %98 : vector<1x32xf32> to vector<8x32xf32>
    %121 = arith.mulf %119, %120 : vector<8x32xf32>
    %122 = vector.broadcast %99 : vector<1x32xf32> to vector<8x32xf32>
    %123 = arith.addf %121, %122 : vector<8x32xf32>
    %c1 = arith.constant 1 : index
    %c0_50 = arith.constant 0 : index
    %c0_51 = arith.constant 0 : index
    %124 = vector.load %arg8[%c1, %c0_50, %c0_51] : memref<2x6x32xf32, #tpu.memory_space<vmem>>, vector<1x6x32xf32>
    %125 = vector.shape_cast %124 : vector<1x6x32xf32> to vector<6x32xf32>
    %c1_52 = arith.constant 1 : index
    %c0_53 = arith.constant 0 : index
    %c0_54 = arith.constant 0 : index
    %c0_55 = arith.constant 0 : index
    %c0_56 = arith.constant 0 : index
    %126 = vector.load %arg3[%c1_52, %c0_53, %c0_54, %c0_55, %c0_56] : memref<2x3x4x32x8xf32, #tpu.memory_space<vmem>>, vector<1x3x4x32x8xf32>
    %127 = vector.shape_cast %126 : vector<1x3x4x32x8xf32> to vector<3x4x32x8xf32>
    %c1_57 = arith.constant 1 : index
    %c0_58 = arith.constant 0 : index
    %c0_59 = arith.constant 0 : index
    %c0_60 = arith.constant 0 : index
    %c0_61 = arith.constant 0 : index
    %128 = vector.load %arg4[%c1_57, %c0_58, %c0_59, %c0_60, %c0_61] : memref<2x3x4x1x8xf32, #tpu.memory_space<vmem>>, vector<1x3x4x1x8xf32>
    %129 = vector.shape_cast %128 : vector<1x3x4x1x8xf32> to vector<3x4x1x8xf32>
    %c1_62 = arith.constant 1 : index
    %c0_63 = arith.constant 0 : index
    %c0_64 = arith.constant 0 : index
    %c0_65 = arith.constant 0 : index
    %130 = vector.load %arg5[%c1_62, %c0_63, %c0_64, %c0_65] : memref<2x4x8x32xf32, #tpu.memory_space<vmem>>, vector<1x4x8x32xf32>
    %131 = vector.shape_cast %130 : vector<1x4x8x32xf32> to vector<4x8x32xf32>
    %132 = vector.extract_strided_slice %125 {offsets = [0, 0], sizes = [1, 32], strides = [1, 1]} : vector<6x32xf32> to vector<1x32xf32>
    %133 = vector.shape_cast %123 : vector<8x32xf32> to vector<1x8x32xf32>
    %134 = vector.shape_cast %133 : vector<1x8x32xf32> to vector<1x8x32xf32>
    %135 = vector.broadcast %134 : vector<1x8x32xf32> to vector<4x8x32xf32>
    %136 = vector.shape_cast %123 : vector<8x32xf32> to vector<1x8x32xf32>
    %137 = vector.shape_cast %136 : vector<1x8x32xf32> to vector<1x8x32xf32>
    %138 = vector.broadcast %137 : vector<1x8x32xf32> to vector<4x8x32xf32>
    %139 = vector.extract_strided_slice %127 {offsets = [0, 0, 0, 0], sizes = [1, 4, 32, 8], strides = [1, 1, 1, 1]} : vector<3x4x32x8xf32> to vector<1x4x32x8xf32>
    %140 = vector.shape_cast %139 : vector<1x4x32x8xf32> to vector<4x32x8xf32>
    "tpu.trace_start"() <{level = 10 : i32, message = "hsd,hdk->hsk"}> : () -> ()
    %cst_66 = arith.constant dense<0.000000e+00> : vector<4x8x8xf32>
    %141 = tpu.matmul %135, %140, %cst_66 {dimension_numbers = #tpu.dot_dimension_numbers<[2], [1], [1], [2], [0, 0, 0, 1, 1, 2], [0], [0]>} : vector<4x8x32xf32>, vector<4x32x8xf32>, vector<4x8x8xf32> -> vector<4x8x8xf32>
    "tpu.trace_stop"() : () -> ()
    %142 = vector.extract_strided_slice %129 {offsets = [0, 0, 0, 0], sizes = [1, 4, 1, 8], strides = [1, 1, 1, 1]} : vector<3x4x1x8xf32> to vector<1x4x1x8xf32>
    %143 = vector.shape_cast %142 : vector<1x4x1x8xf32> to vector<4x1x8xf32>
    %144 = vector.broadcast %143 : vector<4x1x8xf32> to vector<4x8x8xf32>
    %145 = arith.addf %141, %144 : vector<4x8x8xf32>
    %146 = vector.extract_strided_slice %127 {offsets = [1, 0, 0, 0], sizes = [1, 4, 32, 8], strides = [1, 1, 1, 1]} : vector<3x4x32x8xf32> to vector<1x4x32x8xf32>
    %147 = vector.shape_cast %146 : vector<1x4x32x8xf32> to vector<4x32x8xf32>
    "tpu.trace_start"() <{level = 10 : i32, message = "hsd,hdk->hsk"}> : () -> ()
    %cst_67 = arith.constant dense<0.000000e+00> : vector<4x8x8xf32>
    %148 = tpu.matmul %138, %147, %cst_67 {dimension_numbers = #tpu.dot_dimension_numbers<[2], [1], [1], [2], [0, 0, 0, 1, 1, 2], [0], [0]>} : vector<4x8x32xf32>, vector<4x32x8xf32>, vector<4x8x8xf32> -> vector<4x8x8xf32>
    "tpu.trace_stop"() : () -> ()
    %149 = vector.extract_strided_slice %129 {offsets = [1, 0, 0, 0], sizes = [1, 4, 1, 8], strides = [1, 1, 1, 1]} : vector<3x4x1x8xf32> to vector<1x4x1x8xf32>
    %150 = vector.shape_cast %149 : vector<1x4x1x8xf32> to vector<4x1x8xf32>
    %151 = vector.broadcast %150 : vector<4x1x8xf32> to vector<4x8x8xf32>
    %152 = arith.addf %148, %151 : vector<4x8x8xf32>
    %153 = vector.extract_strided_slice %127 {offsets = [2, 0, 0, 0], sizes = [1, 4, 32, 8], strides = [1, 1, 1, 1]} : vector<3x4x32x8xf32> to vector<1x4x32x8xf32>
    %154 = vector.shape_cast %153 : vector<1x4x32x8xf32> to vector<4x32x8xf32>
    "tpu.trace_start"() <{level = 10 : i32, message = "hsd,hdk->hsk"}> : () -> ()
    %cst_68 = arith.constant dense<0.000000e+00> : vector<4x8x8xf32>
    %155 = tpu.matmul %138, %154, %cst_68 {dimension_numbers = #tpu.dot_dimension_numbers<[2], [1], [1], [2], [0, 0, 0, 1, 1, 2], [0], [0]>} : vector<4x8x32xf32>, vector<4x32x8xf32>, vector<4x8x8xf32> -> vector<4x8x8xf32>
    "tpu.trace_stop"() : () -> ()
    %156 = vector.extract_strided_slice %129 {offsets = [2, 0, 0, 0], sizes = [1, 4, 1, 8], strides = [1, 1, 1, 1]} : vector<3x4x1x8xf32> to vector<1x4x1x8xf32>
    %157 = vector.shape_cast %156 : vector<1x4x1x8xf32> to vector<4x1x8xf32>
    %158 = vector.broadcast %157 : vector<4x1x8xf32> to vector<4x8x8xf32>
    %159 = arith.addf %155, %158 : vector<4x8x8xf32>
    "tpu.trace_start"() <{level = 10 : i32, message = "hqd,hkd->hqk"}> : () -> ()
    %cst_69 = arith.constant dense<0.000000e+00> : vector<4x8x8xf32>
    %160 = tpu.matmul %145, %152, %cst_69 {dimension_numbers = #tpu.dot_dimension_numbers<[2], [2], [1], [1], [0, 0, 0, 1, 1, 1], [0], [0]>} : vector<4x8x8xf32>, vector<4x8x8xf32>, vector<4x8x8xf32> -> vector<4x8x8xf32>
    "tpu.trace_stop"() : () -> ()
    %cst_70 = arith.constant 0.353553385 : f32
    %161 = vector.broadcast %cst_70 : f32 to vector<4x8x8xf32>
    %162 = arith.mulf %160, %161 : vector<4x8x8xf32>
    %cst_71 = arith.constant dense<0xFF800000> : vector<4x8xf32>
    %163 = vector.multi_reduction <maximumf>, %162, %cst_71 [2] : vector<4x8x8xf32> to vector<4x8xf32>
    %164 = vector.shape_cast %163 : vector<4x8xf32> to vector<4x8x1xf32>
    %165 = vector.broadcast %164 : vector<4x8x1xf32> to vector<4x8x8xf32>
    %166 = arith.subf %162, %165 : vector<4x8x8xf32>
    %167 = math.exp %166 : vector<4x8x8xf32>
    %cst_72 = arith.constant dense<0.000000e+00> : vector<4x8xf32>
    %168 = vector.multi_reduction <add>, %167, %cst_72 [2] : vector<4x8x8xf32> to vector<4x8xf32>
    %169 = vector.shape_cast %168 : vector<4x8xf32> to vector<4x8x1xf32>
    %170 = vector.broadcast %169 : vector<4x8x1xf32> to vector<4x8x8xf32>
    %171 = arith.divf %167, %170 : vector<4x8x8xf32>
    "tpu.trace_start"() <{level = 10 : i32, message = "hqk,hkd->hqd"}> : () -> ()
    %cst_73 = arith.constant dense<0.000000e+00> : vector<4x8x8xf32>
    %172 = tpu.matmul %171, %159, %cst_73 {dimension_numbers = #tpu.dot_dimension_numbers<[2], [1], [1], [2], [0, 0, 0, 1, 1, 2], [0], [0]>} : vector<4x8x8xf32>, vector<4x8x8xf32>, vector<4x8x8xf32> -> vector<4x8x8xf32>
    "tpu.trace_stop"() : () -> ()
    "tpu.trace_start"() <{level = 10 : i32, message = "hqd,hde->hqe"}> : () -> ()
    %cst_74 = arith.constant dense<0.000000e+00> : vector<4x8x32xf32>
    %173 = tpu.matmul %172, %131, %cst_74 {dimension_numbers = #tpu.dot_dimension_numbers<[2], [1], [1], [2], [0, 0, 0, 1, 1, 2], [0], [0]>} : vector<4x8x8xf32>, vector<4x8x32xf32>, vector<4x8x32xf32> -> vector<4x8x32xf32>
    "tpu.trace_stop"() : () -> ()
    %cst_75 = arith.constant dense<0.000000e+00> : vector<8x32xf32>
    %174 = vector.multi_reduction <add>, %173, %cst_75 [0] : vector<4x8x32xf32> to vector<8x32xf32>
    %175 = vector.broadcast %132 : vector<1x32xf32> to vector<8x32xf32>
    %176 = arith.addf %174, %175 : vector<8x32xf32>
    %177 = arith.addf %123, %176 : vector<8x32xf32>
    %178 = vector.extract_strided_slice %125 {offsets = [1, 0], sizes = [1, 32], strides = [1, 1]} : vector<6x32xf32> to vector<1x32xf32>
    %179 = vector.extract_strided_slice %125 {offsets = [2, 0], sizes = [1, 32], strides = [1, 1]} : vector<6x32xf32> to vector<1x32xf32>
    %cst_76 = arith.constant dense<0.000000e+00> : vector<8xf32>
    %180 = vector.multi_reduction <add>, %177, %cst_76 [1] : vector<8x32xf32> to vector<8xf32>
    %181 = vector.shape_cast %180 : vector<8xf32> to vector<8x1xf32>
    %cst_77 = arith.constant 3.200000e+01 : f32
    %182 = vector.broadcast %cst_77 : f32 to vector<8x1xf32>
    %183 = arith.divf %181, %182 : vector<8x1xf32>
    %184 = vector.broadcast %183 : vector<8x1xf32> to vector<8x32xf32>
    %185 = arith.subf %177, %184 : vector<8x32xf32>
    %186 = vector.broadcast %183 : vector<8x1xf32> to vector<8x32xf32>
    %187 = arith.subf %177, %186 : vector<8x32xf32>
    %188 = arith.mulf %185, %187 : vector<8x32xf32>
    %cst_78 = arith.constant dense<0.000000e+00> : vector<8xf32>
    %189 = vector.multi_reduction <add>, %188, %cst_78 [1] : vector<8x32xf32> to vector<8xf32>
    %190 = vector.shape_cast %189 : vector<8xf32> to vector<8x1xf32>
    %cst_79 = arith.constant 3.200000e+01 : f32
    %191 = vector.broadcast %cst_79 : f32 to vector<8x1xf32>
    %192 = arith.divf %190, %191 : vector<8x1xf32>
    %193 = vector.broadcast %183 : vector<8x1xf32> to vector<8x32xf32>
    %194 = arith.subf %177, %193 : vector<8x32xf32>
    %cst_80 = arith.constant 9.99999974E-6 : f32
    %195 = vector.broadcast %cst_80 : f32 to vector<8x1xf32>
    %196 = arith.addf %192, %195 : vector<8x1xf32>
    %197 = math.rsqrt %196 : vector<8x1xf32>
    %198 = vector.broadcast %197 : vector<8x1xf32> to vector<8x32xf32>
    %199 = arith.mulf %194, %198 : vector<8x32xf32>
    %200 = vector.broadcast %178 : vector<1x32xf32> to vector<8x32xf32>
    %201 = arith.mulf %199, %200 : vector<8x32xf32>
    %202 = vector.broadcast %179 : vector<1x32xf32> to vector<8x32xf32>
    %203 = arith.addf %201, %202 : vector<8x32xf32>
    %c1_81 = arith.constant 1 : index
    %c0_82 = arith.constant 0 : index
    %c0_83 = arith.constant 0 : index
    %204 = vector.load %arg6[%c1_81, %c0_82, %c0_83] : memref<2x32x64xf32, #tpu.memory_space<vmem>>, vector<1x32x64xf32>
    %205 = vector.shape_cast %204 : vector<1x32x64xf32> to vector<32x64xf32>
    %c1_84 = arith.constant 1 : index
    %c0_85 = arith.constant 0 : index
    %c0_86 = arith.constant 0 : index
    %206 = vector.load %arg9[%c1_84, %c0_85, %c0_86] : memref<2x1x64xf32, #tpu.memory_space<vmem>>, vector<1x1x64xf32>
    %207 = vector.shape_cast %206 : vector<1x1x64xf32> to vector<1x64xf32>
    %c1_87 = arith.constant 1 : index
    %c0_88 = arith.constant 0 : index
    %c0_89 = arith.constant 0 : index
    %208 = vector.load %arg7[%c1_87, %c0_88, %c0_89] : memref<2x64x32xf32, #tpu.memory_space<vmem>>, vector<1x64x32xf32>
    %209 = vector.shape_cast %208 : vector<1x64x32xf32> to vector<64x32xf32>
    %210 = vector.extract_strided_slice %125 {offsets = [3, 0], sizes = [1, 32], strides = [1, 1]} : vector<6x32xf32> to vector<1x32xf32>
    %cst_90 = arith.constant dense<0.000000e+00> : vector<8x64xf32>
    %211 = tpu.matmul %203, %205, %cst_90 {dimension_numbers = #tpu.dot_dimension_numbers<[1], [0], [0], [1], [0, 0, 1, 1], [], []>} : vector<8x32xf32>, vector<32x64xf32>, vector<8x64xf32> -> vector<8x64xf32>
    %212 = vector.broadcast %207 : vector<1x64xf32> to vector<8x64xf32>
    %213 = arith.addf %211, %212 : vector<8x64xf32>
    %cst_91 = arith.constant 0.000000e+00 : f32
    %214 = vector.broadcast %cst_91 : f32 to vector<8x64xf32>
    %215 = arith.maximumf %213, %214 : vector<8x64xf32>
    %cst_92 = arith.constant dense<0.000000e+00> : vector<8x32xf32>
    %216 = tpu.matmul %215, %209, %cst_92 {dimension_numbers = #tpu.dot_dimension_numbers<[1], [0], [0], [1], [0, 0, 1, 1], [], []>} : vector<8x64xf32>, vector<64x32xf32>, vector<8x32xf32> -> vector<8x32xf32>
    %217 = vector.broadcast %210 : vector<1x32xf32> to vector<8x32xf32>
    %218 = arith.addf %216, %217 : vector<8x32xf32>
    %219 = arith.addf %203, %218 : vector<8x32xf32>
    %220 = vector.extract_strided_slice %125 {offsets = [4, 0], sizes = [1, 32], strides = [1, 1]} : vector<6x32xf32> to vector<1x32xf32>
    %221 = vector.extract_strided_slice %125 {offsets = [5, 0], sizes = [1, 32], strides = [1, 1]} : vector<6x32xf32> to vector<1x32xf32>
    %cst_93 = arith.constant dense<0.000000e+00> : vector<8xf32>
    %222 = vector.multi_reduction <add>, %219, %cst_93 [1] : vector<8x32xf32> to vector<8xf32>
    %223 = vector.shape_cast %222 : vector<8xf32> to vector<8x1xf32>
    %cst_94 = arith.constant 3.200000e+01 : f32
    %224 = vector.broadcast %cst_94 : f32 to vector<8x1xf32>
    %225 = arith.divf %223, %224 : vector<8x1xf32>
    %226 = vector.broadcast %225 : vector<8x1xf32> to vector<8x32xf32>
    %227 = arith.subf %219, %226 : vector<8x32xf32>
    %228 = vector.broadcast %225 : vector<8x1xf32> to vector<8x32xf32>
    %229 = arith.subf %219, %228 : vector<8x32xf32>
    %230 = arith.mulf %227, %229 : vector<8x32xf32>
    %cst_95 = arith.constant dense<0.000000e+00> : vector<8xf32>
    %231 = vector.multi_reduction <add>, %230, %cst_95 [1] : vector<8x32xf32> to vector<8xf32>
    %232 = vector.shape_cast %231 : vector<8xf32> to vector<8x1xf32>
    %cst_96 = arith.constant 3.200000e+01 : f32
    %233 = vector.broadcast %cst_96 : f32 to vector<8x1xf32>
    %234 = arith.divf %232, %233 : vector<8x1xf32>
    %235 = vector.broadcast %225 : vector<8x1xf32> to vector<8x32xf32>
    %236 = arith.subf %219, %235 : vector<8x32xf32>
    %cst_97 = arith.constant 9.99999974E-6 : f32
    %237 = vector.broadcast %cst_97 : f32 to vector<8x1xf32>
    %238 = arith.addf %234, %237 : vector<8x1xf32>
    %239 = math.rsqrt %238 : vector<8x1xf32>
    %240 = vector.broadcast %239 : vector<8x1xf32> to vector<8x32xf32>
    %241 = arith.mulf %236, %240 : vector<8x32xf32>
    %242 = vector.broadcast %220 : vector<1x32xf32> to vector<8x32xf32>
    %243 = arith.mulf %241, %242 : vector<8x32xf32>
    %244 = vector.broadcast %221 : vector<1x32xf32> to vector<8x32xf32>
    %245 = arith.addf %243, %244 : vector<8x32xf32>
    %c0_98 = arith.constant 0 : index
    %c0_99 = arith.constant 0 : index
    %c0_100 = arith.constant 0 : index
    %246 = vector.load %arg2[%c0_98, %c0_99, %c0_100] : memref<1x8x32xf32, #tpu.memory_space<vmem>>, vector<1x8x32xf32>
    %247 = vector.shape_cast %246 : vector<1x8x32xf32> to vector<8x32xf32>
    %c0_101 = arith.constant 0 : index
    %c0_102 = arith.constant 0 : index
    %c0_103 = arith.constant 0 : index
    %248 = vector.load %arg18[%c0_101, %c0_102, %c0_103] : memref<2x9x32xf32, #tpu.memory_space<vmem>>, vector<1x9x32xf32>
    %249 = vector.shape_cast %248 : vector<1x9x32xf32> to vector<9x32xf32>
    %c0_104 = arith.constant 0 : index
    %c0_105 = arith.constant 0 : index
    %c0_106 = arith.constant 0 : index
    %c0_107 = arith.constant 0 : index
    %c0_108 = arith.constant 0 : index
    %250 = vector.load %arg10[%c0_104, %c0_105, %c0_106, %c0_107, %c0_108] : memref<2x3x4x32x8xf32, #tpu.memory_space<vmem>>, vector<1x3x4x32x8xf32>
    %251 = vector.shape_cast %250 : vector<1x3x4x32x8xf32> to vector<3x4x32x8xf32>
    %c0_109 = arith.constant 0 : index
    %c0_110 = arith.constant 0 : index
    %c0_111 = arith.constant 0 : index
    %c0_112 = arith.constant 0 : index
    %c0_113 = arith.constant 0 : index
    %252 = vector.load %arg11[%c0_109, %c0_110, %c0_111, %c0_112, %c0_113] : memref<2x3x4x1x8xf32, #tpu.memory_space<vmem>>, vector<1x3x4x1x8xf32>
    %253 = vector.shape_cast %252 : vector<1x3x4x1x8xf32> to vector<3x4x1x8xf32>
    %c0_114 = arith.constant 0 : index
    %c0_115 = arith.constant 0 : index
    %c0_116 = arith.constant 0 : index
    %c0_117 = arith.constant 0 : index
    %254 = vector.load %arg12[%c0_114, %c0_115, %c0_116, %c0_117] : memref<2x4x8x32xf32, #tpu.memory_space<vmem>>, vector<1x4x8x32xf32>
    %255 = vector.shape_cast %254 : vector<1x4x8x32xf32> to vector<4x8x32xf32>
    %256 = vector.extract_strided_slice %249 {offsets = [0, 0], sizes = [1, 32], strides = [1, 1]} : vector<9x32xf32> to vector<1x32xf32>
    %257 = vector.shape_cast %247 : vector<8x32xf32> to vector<1x8x32xf32>
    %258 = vector.shape_cast %257 : vector<1x8x32xf32> to vector<1x8x32xf32>
    %259 = vector.broadcast %258 : vector<1x8x32xf32> to vector<4x8x32xf32>
    %260 = vector.shape_cast %247 : vector<8x32xf32> to vector<1x8x32xf32>
    %261 = vector.shape_cast %260 : vector<1x8x32xf32> to vector<1x8x32xf32>
    %262 = vector.broadcast %261 : vector<1x8x32xf32> to vector<4x8x32xf32>
    %263 = vector.extract_strided_slice %251 {offsets = [0, 0, 0, 0], sizes = [1, 4, 32, 8], strides = [1, 1, 1, 1]} : vector<3x4x32x8xf32> to vector<1x4x32x8xf32>
    %264 = vector.shape_cast %263 : vector<1x4x32x8xf32> to vector<4x32x8xf32>
    "tpu.trace_start"() <{level = 10 : i32, message = "hsd,hdk->hsk"}> : () -> ()
    %cst_118 = arith.constant dense<0.000000e+00> : vector<4x8x8xf32>
    %265 = tpu.matmul %259, %264, %cst_118 {dimension_numbers = #tpu.dot_dimension_numbers<[2], [1], [1], [2], [0, 0, 0, 1, 1, 2], [0], [0]>} : vector<4x8x32xf32>, vector<4x32x8xf32>, vector<4x8x8xf32> -> vector<4x8x8xf32>
    "tpu.trace_stop"() : () -> ()
    %266 = vector.extract_strided_slice %253 {offsets = [0, 0, 0, 0], sizes = [1, 4, 1, 8], strides = [1, 1, 1, 1]} : vector<3x4x1x8xf32> to vector<1x4x1x8xf32>
    %267 = vector.shape_cast %266 : vector<1x4x1x8xf32> to vector<4x1x8xf32>
    %268 = vector.broadcast %267 : vector<4x1x8xf32> to vector<4x8x8xf32>
    %269 = arith.addf %265, %268 : vector<4x8x8xf32>
    %270 = vector.extract_strided_slice %251 {offsets = [1, 0, 0, 0], sizes = [1, 4, 32, 8], strides = [1, 1, 1, 1]} : vector<3x4x32x8xf32> to vector<1x4x32x8xf32>
    %271 = vector.shape_cast %270 : vector<1x4x32x8xf32> to vector<4x32x8xf32>
    "tpu.trace_start"() <{level = 10 : i32, message = "hsd,hdk->hsk"}> : () -> ()
    %cst_119 = arith.constant dense<0.000000e+00> : vector<4x8x8xf32>
    %272 = tpu.matmul %262, %271, %cst_119 {dimension_numbers = #tpu.dot_dimension_numbers<[2], [1], [1], [2], [0, 0, 0, 1, 1, 2], [0], [0]>} : vector<4x8x32xf32>, vector<4x32x8xf32>, vector<4x8x8xf32> -> vector<4x8x8xf32>
    "tpu.trace_stop"() : () -> ()
    %273 = vector.extract_strided_slice %253 {offsets = [1, 0, 0, 0], sizes = [1, 4, 1, 8], strides = [1, 1, 1, 1]} : vector<3x4x1x8xf32> to vector<1x4x1x8xf32>
    %274 = vector.shape_cast %273 : vector<1x4x1x8xf32> to vector<4x1x8xf32>
    %275 = vector.broadcast %274 : vector<4x1x8xf32> to vector<4x8x8xf32>
    %276 = arith.addf %272, %275 : vector<4x8x8xf32>
    %277 = vector.extract_strided_slice %251 {offsets = [2, 0, 0, 0], sizes = [1, 4, 32, 8], strides = [1, 1, 1, 1]} : vector<3x4x32x8xf32> to vector<1x4x32x8xf32>
    %278 = vector.shape_cast %277 : vector<1x4x32x8xf32> to vector<4x32x8xf32>
    "tpu.trace_start"() <{level = 10 : i32, message = "hsd,hdk->hsk"}> : () -> ()
    %cst_120 = arith.constant dense<0.000000e+00> : vector<4x8x8xf32>
    %279 = tpu.matmul %262, %278, %cst_120 {dimension_numbers = #tpu.dot_dimension_numbers<[2], [1], [1], [2], [0, 0, 0, 1, 1, 2], [0], [0]>} : vector<4x8x32xf32>, vector<4x32x8xf32>, vector<4x8x8xf32> -> vector<4x8x8xf32>
    "tpu.trace_stop"() : () -> ()
    %280 = vector.extract_strided_slice %253 {offsets = [2, 0, 0, 0], sizes = [1, 4, 1, 8], strides = [1, 1, 1, 1]} : vector<3x4x1x8xf32> to vector<1x4x1x8xf32>
    %281 = vector.shape_cast %280 : vector<1x4x1x8xf32> to vector<4x1x8xf32>
    %282 = vector.broadcast %281 : vector<4x1x8xf32> to vector<4x8x8xf32>
    %283 = arith.addf %279, %282 : vector<4x8x8xf32>
    "tpu.trace_start"() <{level = 10 : i32, message = "hqd,hkd->hqk"}> : () -> ()
    %cst_121 = arith.constant dense<0.000000e+00> : vector<4x8x8xf32>
    %284 = tpu.matmul %269, %276, %cst_121 {dimension_numbers = #tpu.dot_dimension_numbers<[2], [2], [1], [1], [0, 0, 0, 1, 1, 1], [0], [0]>} : vector<4x8x8xf32>, vector<4x8x8xf32>, vector<4x8x8xf32> -> vector<4x8x8xf32>
    "tpu.trace_stop"() : () -> ()
    %cst_122 = arith.constant 0.353553385 : f32
    %285 = vector.broadcast %cst_122 : f32 to vector<4x8x8xf32>
    %286 = arith.mulf %284, %285 : vector<4x8x8xf32>
    %287 = tpu.iota {dimensions = array<i32: 1>} : vector<4x8x8xi32>
    %288 = tpu.iota {dimensions = array<i32: 2>} : vector<4x8x8xi32>
    %289 = arith.cmpi sge, %287, %288 : vector<4x8x8xi32>
    %cst_123 = arith.constant -1.000000e+09 : f32
    %290 = vector.broadcast %cst_123 : f32 to vector<4x8x8xf32>
    %291 = arith.select %289, %290, %286 : vector<4x8x8xi1>, vector<4x8x8xf32>
    %cst_124 = arith.constant dense<0xFF800000> : vector<4x8xf32>
    %292 = vector.multi_reduction <maximumf>, %291, %cst_124 [2] : vector<4x8x8xf32> to vector<4x8xf32>
    %293 = vector.shape_cast %292 : vector<4x8xf32> to vector<4x8x1xf32>
    %294 = vector.broadcast %293 : vector<4x8x1xf32> to vector<4x8x8xf32>
    %295 = arith.subf %291, %294 : vector<4x8x8xf32>
    %296 = math.exp %295 : vector<4x8x8xf32>
    %cst_125 = arith.constant dense<0.000000e+00> : vector<4x8xf32>
    %297 = vector.multi_reduction <add>, %296, %cst_125 [2] : vector<4x8x8xf32> to vector<4x8xf32>
    %298 = vector.shape_cast %297 : vector<4x8xf32> to vector<4x8x1xf32>
    %299 = vector.broadcast %298 : vector<4x8x1xf32> to vector<4x8x8xf32>
    %300 = arith.divf %296, %299 : vector<4x8x8xf32>
    "tpu.trace_start"() <{level = 10 : i32, message = "hqk,hkd->hqd"}> : () -> ()
    %cst_126 = arith.constant dense<0.000000e+00> : vector<4x8x8xf32>
    %301 = tpu.matmul %300, %283, %cst_126 {dimension_numbers = #tpu.dot_dimension_numbers<[2], [1], [1], [2], [0, 0, 0, 1, 1, 2], [0], [0]>} : vector<4x8x8xf32>, vector<4x8x8xf32>, vector<4x8x8xf32> -> vector<4x8x8xf32>
    "tpu.trace_stop"() : () -> ()
    "tpu.trace_start"() <{level = 10 : i32, message = "hqd,hde->hqe"}> : () -> ()
    %cst_127 = arith.constant dense<0.000000e+00> : vector<4x8x32xf32>
    %302 = tpu.matmul %301, %255, %cst_127 {dimension_numbers = #tpu.dot_dimension_numbers<[2], [1], [1], [2], [0, 0, 0, 1, 1, 2], [0], [0]>} : vector<4x8x8xf32>, vector<4x8x32xf32>, vector<4x8x32xf32> -> vector<4x8x32xf32>
    "tpu.trace_stop"() : () -> ()
    %cst_128 = arith.constant dense<0.000000e+00> : vector<8x32xf32>
    %303 = vector.multi_reduction <add>, %302, %cst_128 [0] : vector<4x8x32xf32> to vector<8x32xf32>
    %304 = vector.broadcast %256 : vector<1x32xf32> to vector<8x32xf32>
    %305 = arith.addf %303, %304 : vector<8x32xf32>
    %306 = arith.addf %247, %305 : vector<8x32xf32>
    %307 = vector.extract_strided_slice %249 {offsets = [1, 0], sizes = [1, 32], strides = [1, 1]} : vector<9x32xf32> to vector<1x32xf32>
    %308 = vector.extract_strided_slice %249 {offsets = [2, 0], sizes = [1, 32], strides = [1, 1]} : vector<9x32xf32> to vector<1x32xf32>
    %cst_129 = arith.constant dense<0.000000e+00> : vector<8xf32>
    %309 = vector.multi_reduction <add>, %306, %cst_129 [1] : vector<8x32xf32> to vector<8xf32>
    %310 = vector.shape_cast %309 : vector<8xf32> to vector<8x1xf32>
    %cst_130 = arith.constant 3.200000e+01 : f32
    %311 = vector.broadcast %cst_130 : f32 to vector<8x1xf32>
    %312 = arith.divf %310, %311 : vector<8x1xf32>
    %313 = vector.broadcast %312 : vector<8x1xf32> to vector<8x32xf32>
    %314 = arith.subf %306, %313 : vector<8x32xf32>
    %315 = vector.broadcast %312 : vector<8x1xf32> to vector<8x32xf32>
    %316 = arith.subf %306, %315 : vector<8x32xf32>
    %317 = arith.mulf %314, %316 : vector<8x32xf32>
    %cst_131 = arith.constant dense<0.000000e+00> : vector<8xf32>
    %318 = vector.multi_reduction <add>, %317, %cst_131 [1] : vector<8x32xf32> to vector<8xf32>
    %319 = vector.shape_cast %318 : vector<8xf32> to vector<8x1xf32>
    %cst_132 = arith.constant 3.200000e+01 : f32
    %320 = vector.broadcast %cst_132 : f32 to vector<8x1xf32>
    %321 = arith.divf %319, %320 : vector<8x1xf32>
    %322 = vector.broadcast %312 : vector<8x1xf32> to vector<8x32xf32>
    %323 = arith.subf %306, %322 : vector<8x32xf32>
    %cst_133 = arith.constant 9.99999974E-6 : f32
    %324 = vector.broadcast %cst_133 : f32 to vector<8x1xf32>
    %325 = arith.addf %321, %324 : vector<8x1xf32>
    %326 = math.rsqrt %325 : vector<8x1xf32>
    %327 = vector.broadcast %326 : vector<8x1xf32> to vector<8x32xf32>
    %328 = arith.mulf %323, %327 : vector<8x32xf32>
    %329 = vector.broadcast %307 : vector<1x32xf32> to vector<8x32xf32>
    %330 = arith.mulf %328, %329 : vector<8x32xf32>
    %331 = vector.broadcast %308 : vector<1x32xf32> to vector<8x32xf32>
    %332 = arith.addf %330, %331 : vector<8x32xf32>
    %c0_134 = arith.constant 0 : index
    %c0_135 = arith.constant 0 : index
    %c0_136 = arith.constant 0 : index
    %c0_137 = arith.constant 0 : index
    %c0_138 = arith.constant 0 : index
    %333 = vector.load %arg13[%c0_134, %c0_135, %c0_136, %c0_137, %c0_138] : memref<2x3x4x32x8xf32, #tpu.memory_space<vmem>>, vector<1x3x4x32x8xf32>
    %334 = vector.shape_cast %333 : vector<1x3x4x32x8xf32> to vector<3x4x32x8xf32>
    %c0_139 = arith.constant 0 : index
    %c0_140 = arith.constant 0 : index
    %c0_141 = arith.constant 0 : index
    %c0_142 = arith.constant 0 : index
    %c0_143 = arith.constant 0 : index
    %335 = vector.load %arg14[%c0_139, %c0_140, %c0_141, %c0_142, %c0_143] : memref<2x3x4x1x8xf32, #tpu.memory_space<vmem>>, vector<1x3x4x1x8xf32>
    %336 = vector.shape_cast %335 : vector<1x3x4x1x8xf32> to vector<3x4x1x8xf32>
    %c0_144 = arith.constant 0 : index
    %c0_145 = arith.constant 0 : index
    %c0_146 = arith.constant 0 : index
    %c0_147 = arith.constant 0 : index
    %337 = vector.load %arg15[%c0_144, %c0_145, %c0_146, %c0_147] : memref<2x4x8x32xf32, #tpu.memory_space<vmem>>, vector<1x4x8x32xf32>
    %338 = vector.shape_cast %337 : vector<1x4x8x32xf32> to vector<4x8x32xf32>
    %339 = vector.extract_strided_slice %249 {offsets = [3, 0], sizes = [1, 32], strides = [1, 1]} : vector<9x32xf32> to vector<1x32xf32>
    %340 = vector.shape_cast %332 : vector<8x32xf32> to vector<1x8x32xf32>
    %341 = vector.shape_cast %340 : vector<1x8x32xf32> to vector<1x8x32xf32>
    %342 = vector.broadcast %341 : vector<1x8x32xf32> to vector<4x8x32xf32>
    %343 = vector.shape_cast %245 : vector<8x32xf32> to vector<1x8x32xf32>
    %344 = vector.shape_cast %343 : vector<1x8x32xf32> to vector<1x8x32xf32>
    %345 = vector.broadcast %344 : vector<1x8x32xf32> to vector<4x8x32xf32>
    %346 = vector.extract_strided_slice %334 {offsets = [0, 0, 0, 0], sizes = [1, 4, 32, 8], strides = [1, 1, 1, 1]} : vector<3x4x32x8xf32> to vector<1x4x32x8xf32>
    %347 = vector.shape_cast %346 : vector<1x4x32x8xf32> to vector<4x32x8xf32>
    "tpu.trace_start"() <{level = 10 : i32, message = "hsd,hdk->hsk"}> : () -> ()
    %cst_148 = arith.constant dense<0.000000e+00> : vector<4x8x8xf32>
    %348 = tpu.matmul %342, %347, %cst_148 {dimension_numbers = #tpu.dot_dimension_numbers<[2], [1], [1], [2], [0, 0, 0, 1, 1, 2], [0], [0]>} : vector<4x8x32xf32>, vector<4x32x8xf32>, vector<4x8x8xf32> -> vector<4x8x8xf32>
    "tpu.trace_stop"() : () -> ()
    %349 = vector.extract_strided_slice %336 {offsets = [0, 0, 0, 0], sizes = [1, 4, 1, 8], strides = [1, 1, 1, 1]} : vector<3x4x1x8xf32> to vector<1x4x1x8xf32>
    %350 = vector.shape_cast %349 : vector<1x4x1x8xf32> to vector<4x1x8xf32>
    %351 = vector.broadcast %350 : vector<4x1x8xf32> to vector<4x8x8xf32>
    %352 = arith.addf %348, %351 : vector<4x8x8xf32>
    %353 = vector.extract_strided_slice %334 {offsets = [1, 0, 0, 0], sizes = [1, 4, 32, 8], strides = [1, 1, 1, 1]} : vector<3x4x32x8xf32> to vector<1x4x32x8xf32>
    %354 = vector.shape_cast %353 : vector<1x4x32x8xf32> to vector<4x32x8xf32>
    "tpu.trace_start"() <{level = 10 : i32, message = "hsd,hdk->hsk"}> : () -> ()
    %cst_149 = arith.constant dense<0.000000e+00> : vector<4x8x8xf32>
    %355 = tpu.matmul %345, %354, %cst_149 {dimension_numbers = #tpu.dot_dimension_numbers<[2], [1], [1], [2], [0, 0, 0, 1, 1, 2], [0], [0]>} : vector<4x8x32xf32>, vector<4x32x8xf32>, vector<4x8x8xf32> -> vector<4x8x8xf32>
    "tpu.trace_stop"() : () -> ()
    %356 = vector.extract_strided_slice %336 {offsets = [1, 0, 0, 0], sizes = [1, 4, 1, 8], strides = [1, 1, 1, 1]} : vector<3x4x1x8xf32> to vector<1x4x1x8xf32>
    %357 = vector.shape_cast %356 : vector<1x4x1x8xf32> to vector<4x1x8xf32>
    %358 = vector.broadcast %357 : vector<4x1x8xf32> to vector<4x8x8xf32>
    %359 = arith.addf %355, %358 : vector<4x8x8xf32>
    %360 = vector.extract_strided_slice %334 {offsets = [2, 0, 0, 0], sizes = [1, 4, 32, 8], strides = [1, 1, 1, 1]} : vector<3x4x32x8xf32> to vector<1x4x32x8xf32>
    %361 = vector.shape_cast %360 : vector<1x4x32x8xf32> to vector<4x32x8xf32>
    "tpu.trace_start"() <{level = 10 : i32, message = "hsd,hdk->hsk"}> : () -> ()
    %cst_150 = arith.constant dense<0.000000e+00> : vector<4x8x8xf32>
    %362 = tpu.matmul %345, %361, %cst_150 {dimension_numbers = #tpu.dot_dimension_numbers<[2], [1], [1], [2], [0, 0, 0, 1, 1, 2], [0], [0]>} : vector<4x8x32xf32>, vector<4x32x8xf32>, vector<4x8x8xf32> -> vector<4x8x8xf32>
    "tpu.trace_stop"() : () -> ()
    %363 = vector.extract_strided_slice %336 {offsets = [2, 0, 0, 0], sizes = [1, 4, 1, 8], strides = [1, 1, 1, 1]} : vector<3x4x1x8xf32> to vector<1x4x1x8xf32>
    %364 = vector.shape_cast %363 : vector<1x4x1x8xf32> to vector<4x1x8xf32>
    %365 = vector.broadcast %364 : vector<4x1x8xf32> to vector<4x8x8xf32>
    %366 = arith.addf %362, %365 : vector<4x8x8xf32>
    "tpu.trace_start"() <{level = 10 : i32, message = "hqd,hkd->hqk"}> : () -> ()
    %cst_151 = arith.constant dense<0.000000e+00> : vector<4x8x8xf32>
    %367 = tpu.matmul %352, %359, %cst_151 {dimension_numbers = #tpu.dot_dimension_numbers<[2], [2], [1], [1], [0, 0, 0, 1, 1, 1], [0], [0]>} : vector<4x8x8xf32>, vector<4x8x8xf32>, vector<4x8x8xf32> -> vector<4x8x8xf32>
    "tpu.trace_stop"() : () -> ()
    %cst_152 = arith.constant 0.353553385 : f32
    %368 = vector.broadcast %cst_152 : f32 to vector<4x8x8xf32>
    %369 = arith.mulf %367, %368 : vector<4x8x8xf32>
    %cst_153 = arith.constant dense<0xFF800000> : vector<4x8xf32>
    %370 = vector.multi_reduction <maximumf>, %369, %cst_153 [2] : vector<4x8x8xf32> to vector<4x8xf32>
    %371 = vector.shape_cast %370 : vector<4x8xf32> to vector<4x8x1xf32>
    %372 = vector.broadcast %371 : vector<4x8x1xf32> to vector<4x8x8xf32>
    %373 = arith.subf %369, %372 : vector<4x8x8xf32>
    %374 = math.exp %373 : vector<4x8x8xf32>
    %cst_154 = arith.constant dense<0.000000e+00> : vector<4x8xf32>
    %375 = vector.multi_reduction <add>, %374, %cst_154 [2] : vector<4x8x8xf32> to vector<4x8xf32>
    %376 = vector.shape_cast %375 : vector<4x8xf32> to vector<4x8x1xf32>
    %377 = vector.broadcast %376 : vector<4x8x1xf32> to vector<4x8x8xf32>
    %378 = arith.divf %374, %377 : vector<4x8x8xf32>
    "tpu.trace_start"() <{level = 10 : i32, message = "hqk,hkd->hqd"}> : () -> ()
    %cst_155 = arith.constant dense<0.000000e+00> : vector<4x8x8xf32>
    %379 = tpu.matmul %378, %366, %cst_155 {dimension_numbers = #tpu.dot_dimension_numbers<[2], [1], [1], [2], [0, 0, 0, 1, 1, 2], [0], [0]>} : vector<4x8x8xf32>, vector<4x8x8xf32>, vector<4x8x8xf32> -> vector<4x8x8xf32>
    "tpu.trace_stop"() : () -> ()
    "tpu.trace_start"() <{level = 10 : i32, message = "hqd,hde->hqe"}> : () -> ()
    %cst_156 = arith.constant dense<0.000000e+00> : vector<4x8x32xf32>
    %380 = tpu.matmul %379, %338, %cst_156 {dimension_numbers = #tpu.dot_dimension_numbers<[2], [1], [1], [2], [0, 0, 0, 1, 1, 2], [0], [0]>} : vector<4x8x8xf32>, vector<4x8x32xf32>, vector<4x8x32xf32> -> vector<4x8x32xf32>
    "tpu.trace_stop"() : () -> ()
    %cst_157 = arith.constant dense<0.000000e+00> : vector<8x32xf32>
    %381 = vector.multi_reduction <add>, %380, %cst_157 [0] : vector<4x8x32xf32> to vector<8x32xf32>
    %382 = vector.broadcast %339 : vector<1x32xf32> to vector<8x32xf32>
    %383 = arith.addf %381, %382 : vector<8x32xf32>
    %384 = arith.addf %332, %383 : vector<8x32xf32>
    %385 = vector.extract_strided_slice %249 {offsets = [4, 0], sizes = [1, 32], strides = [1, 1]} : vector<9x32xf32> to vector<1x32xf32>
    %386 = vector.extract_strided_slice %249 {offsets = [5, 0], sizes = [1, 32], strides = [1, 1]} : vector<9x32xf32> to vector<1x32xf32>
    %cst_158 = arith.constant dense<0.000000e+00> : vector<8xf32>
    %387 = vector.multi_reduction <add>, %384, %cst_158 [1] : vector<8x32xf32> to vector<8xf32>
    %388 = vector.shape_cast %387 : vector<8xf32> to vector<8x1xf32>
    %cst_159 = arith.constant 3.200000e+01 : f32
    %389 = vector.broadcast %cst_159 : f32 to vector<8x1xf32>
    %390 = arith.divf %388, %389 : vector<8x1xf32>
    %391 = vector.broadcast %390 : vector<8x1xf32> to vector<8x32xf32>
    %392 = arith.subf %384, %391 : vector<8x32xf32>
    %393 = vector.broadcast %390 : vector<8x1xf32> to vector<8x32xf32>
    %394 = arith.subf %384, %393 : vector<8x32xf32>
    %395 = arith.mulf %392, %394 : vector<8x32xf32>
    %cst_160 = arith.constant dense<0.000000e+00> : vector<8xf32>
    %396 = vector.multi_reduction <add>, %395, %cst_160 [1] : vector<8x32xf32> to vector<8xf32>
    %397 = vector.shape_cast %396 : vector<8xf32> to vector<8x1xf32>
    %cst_161 = arith.constant 3.200000e+01 : f32
    %398 = vector.broadcast %cst_161 : f32 to vector<8x1xf32>
    %399 = arith.divf %397, %398 : vector<8x1xf32>
    %400 = vector.broadcast %390 : vector<8x1xf32> to vector<8x32xf32>
    %401 = arith.subf %384, %400 : vector<8x32xf32>
    %cst_162 = arith.constant 9.99999974E-6 : f32
    %402 = vector.broadcast %cst_162 : f32 to vector<8x1xf32>
    %403 = arith.addf %399, %402 : vector<8x1xf32>
    %404 = math.rsqrt %403 : vector<8x1xf32>
    %405 = vector.broadcast %404 : vector<8x1xf32> to vector<8x32xf32>
    %406 = arith.mulf %401, %405 : vector<8x32xf32>
    %407 = vector.broadcast %385 : vector<1x32xf32> to vector<8x32xf32>
    %408 = arith.mulf %406, %407 : vector<8x32xf32>
    %409 = vector.broadcast %386 : vector<1x32xf32> to vector<8x32xf32>
    %410 = arith.addf %408, %409 : vector<8x32xf32>
    %c0_163 = arith.constant 0 : index
    %c0_164 = arith.constant 0 : index
    %c0_165 = arith.constant 0 : index
    %411 = vector.load %arg16[%c0_163, %c0_164, %c0_165] : memref<2x32x64xf32, #tpu.memory_space<vmem>>, vector<1x32x64xf32>
    %412 = vector.shape_cast %411 : vector<1x32x64xf32> to vector<32x64xf32>
    %c0_166 = arith.constant 0 : index
    %c0_167 = arith.constant 0 : index
    %c0_168 = arith.constant 0 : index
    %413 = vector.load %arg19[%c0_166, %c0_167, %c0_168] : memref<2x1x64xf32, #tpu.memory_space<vmem>>, vector<1x1x64xf32>
    %414 = vector.shape_cast %413 : vector<1x1x64xf32> to vector<1x64xf32>
    %c0_169 = arith.constant 0 : index
    %c0_170 = arith.constant 0 : index
    %c0_171 = arith.constant 0 : index
    %415 = vector.load %arg17[%c0_169, %c0_170, %c0_171] : memref<2x64x32xf32, #tpu.memory_space<vmem>>, vector<1x64x32xf32>
    %416 = vector.shape_cast %415 : vector<1x64x32xf32> to vector<64x32xf32>
    %417 = vector.extract_strided_slice %249 {offsets = [6, 0], sizes = [1, 32], strides = [1, 1]} : vector<9x32xf32> to vector<1x32xf32>
    %cst_172 = arith.constant dense<0.000000e+00> : vector<8x64xf32>
    %418 = tpu.matmul %410, %412, %cst_172 {dimension_numbers = #tpu.dot_dimension_numbers<[1], [0], [0], [1], [0, 0, 1, 1], [], []>} : vector<8x32xf32>, vector<32x64xf32>, vector<8x64xf32> -> vector<8x64xf32>
    %419 = vector.broadcast %414 : vector<1x64xf32> to vector<8x64xf32>
    %420 = arith.addf %418, %419 : vector<8x64xf32>
    %cst_173 = arith.constant 0.000000e+00 : f32
    %421 = vector.broadcast %cst_173 : f32 to vector<8x64xf32>
    %422 = arith.maximumf %420, %421 : vector<8x64xf32>
    %cst_174 = arith.constant dense<0.000000e+00> : vector<8x32xf32>
    %423 = tpu.matmul %422, %416, %cst_174 {dimension_numbers = #tpu.dot_dimension_numbers<[1], [0], [0], [1], [0, 0, 1, 1], [], []>} : vector<8x64xf32>, vector<64x32xf32>, vector<8x32xf32> -> vector<8x32xf32>
    %424 = vector.broadcast %417 : vector<1x32xf32> to vector<8x32xf32>
    %425 = arith.addf %423, %424 : vector<8x32xf32>
    %426 = arith.addf %410, %425 : vector<8x32xf32>
    %427 = vector.extract_strided_slice %249 {offsets = [7, 0], sizes = [1, 32], strides = [1, 1]} : vector<9x32xf32> to vector<1x32xf32>
    %428 = vector.extract_strided_slice %249 {offsets = [8, 0], sizes = [1, 32], strides = [1, 1]} : vector<9x32xf32> to vector<1x32xf32>
    %cst_175 = arith.constant dense<0.000000e+00> : vector<8xf32>
    %429 = vector.multi_reduction <add>, %426, %cst_175 [1] : vector<8x32xf32> to vector<8xf32>
    %430 = vector.shape_cast %429 : vector<8xf32> to vector<8x1xf32>
    %cst_176 = arith.constant 3.200000e+01 : f32
    %431 = vector.broadcast %cst_176 : f32 to vector<8x1xf32>
    %432 = arith.divf %430, %431 : vector<8x1xf32>
    %433 = vector.broadcast %432 : vector<8x1xf32> to vector<8x32xf32>
    %434 = arith.subf %426, %433 : vector<8x32xf32>
    %435 = vector.broadcast %432 : vector<8x1xf32> to vector<8x32xf32>
    %436 = arith.subf %426, %435 : vector<8x32xf32>
    %437 = arith.mulf %434, %436 : vector<8x32xf32>
    %cst_177 = arith.constant dense<0.000000e+00> : vector<8xf32>
    %438 = vector.multi_reduction <add>, %437, %cst_177 [1] : vector<8x32xf32> to vector<8xf32>
    %439 = vector.shape_cast %438 : vector<8xf32> to vector<8x1xf32>
    %cst_178 = arith.constant 3.200000e+01 : f32
    %440 = vector.broadcast %cst_178 : f32 to vector<8x1xf32>
    %441 = arith.divf %439, %440 : vector<8x1xf32>
    %442 = vector.broadcast %432 : vector<8x1xf32> to vector<8x32xf32>
    %443 = arith.subf %426, %442 : vector<8x32xf32>
    %cst_179 = arith.constant 9.99999974E-6 : f32
    %444 = vector.broadcast %cst_179 : f32 to vector<8x1xf32>
    %445 = arith.addf %441, %444 : vector<8x1xf32>
    %446 = math.rsqrt %445 : vector<8x1xf32>
    %447 = vector.broadcast %446 : vector<8x1xf32> to vector<8x32xf32>
    %448 = arith.mulf %443, %447 : vector<8x32xf32>
    %449 = vector.broadcast %427 : vector<1x32xf32> to vector<8x32xf32>
    %450 = arith.mulf %448, %449 : vector<8x32xf32>
    %451 = vector.broadcast %428 : vector<1x32xf32> to vector<8x32xf32>
    %452 = arith.addf %450, %451 : vector<8x32xf32>
    %c1_180 = arith.constant 1 : index
    %c0_181 = arith.constant 0 : index
    %c0_182 = arith.constant 0 : index
    %453 = vector.load %arg18[%c1_180, %c0_181, %c0_182] : memref<2x9x32xf32, #tpu.memory_space<vmem>>, vector<1x9x32xf32>
    %454 = vector.shape_cast %453 : vector<1x9x32xf32> to vector<9x32xf32>
    %c1_183 = arith.constant 1 : index
    %c0_184 = arith.constant 0 : index
    %c0_185 = arith.constant 0 : index
    %c0_186 = arith.constant 0 : index
    %c0_187 = arith.constant 0 : index
    %455 = vector.load %arg10[%c1_183, %c0_184, %c0_185, %c0_186, %c0_187] : memref<2x3x4x32x8xf32, #tpu.memory_space<vmem>>, vector<1x3x4x32x8xf32>
    %456 = vector.shape_cast %455 : vector<1x3x4x32x8xf32> to vector<3x4x32x8xf32>
    %c1_188 = arith.constant 1 : index
    %c0_189 = arith.constant 0 : index
    %c0_190 = arith.constant 0 : index
    %c0_191 = arith.constant 0 : index
    %c0_192 = arith.constant 0 : index
    %457 = vector.load %arg11[%c1_188, %c0_189, %c0_190, %c0_191, %c0_192] : memref<2x3x4x1x8xf32, #tpu.memory_space<vmem>>, vector<1x3x4x1x8xf32>
    %458 = vector.shape_cast %457 : vector<1x3x4x1x8xf32> to vector<3x4x1x8xf32>
    %c1_193 = arith.constant 1 : index
    %c0_194 = arith.constant 0 : index
    %c0_195 = arith.constant 0 : index
    %c0_196 = arith.constant 0 : index
    %459 = vector.load %arg12[%c1_193, %c0_194, %c0_195, %c0_196] : memref<2x4x8x32xf32, #tpu.memory_space<vmem>>, vector<1x4x8x32xf32>
    %460 = vector.shape_cast %459 : vector<1x4x8x32xf32> to vector<4x8x32xf32>
    %461 = vector.extract_strided_slice %454 {offsets = [0, 0], sizes = [1, 32], strides = [1, 1]} : vector<9x32xf32> to vector<1x32xf32>
    %462 = vector.shape_cast %452 : vector<8x32xf32> to vector<1x8x32xf32>
    %463 = vector.shape_cast %462 : vector<1x8x32xf32> to vector<1x8x32xf32>
    %464 = vector.broadcast %463 : vector<1x8x32xf32> to vector<4x8x32xf32>
    %465 = vector.shape_cast %452 : vector<8x32xf32> to vector<1x8x32xf32>
    %466 = vector.shape_cast %465 : vector<1x8x32xf32> to vector<1x8x32xf32>
    %467 = vector.broadcast %466 : vector<1x8x32xf32> to vector<4x8x32xf32>
    %468 = vector.extract_strided_slice %456 {offsets = [0, 0, 0, 0], sizes = [1, 4, 32, 8], strides = [1, 1, 1, 1]} : vector<3x4x32x8xf32> to vector<1x4x32x8xf32>
    %469 = vector.shape_cast %468 : vector<1x4x32x8xf32> to vector<4x32x8xf32>
    "tpu.trace_start"() <{level = 10 : i32, message = "hsd,hdk->hsk"}> : () -> ()
    %cst_197 = arith.constant dense<0.000000e+00> : vector<4x8x8xf32>
    %470 = tpu.matmul %464, %469, %cst_197 {dimension_numbers = #tpu.dot_dimension_numbers<[2], [1], [1], [2], [0, 0, 0, 1, 1, 2], [0], [0]>} : vector<4x8x32xf32>, vector<4x32x8xf32>, vector<4x8x8xf32> -> vector<4x8x8xf32>
    "tpu.trace_stop"() : () -> ()
    %471 = vector.extract_strided_slice %458 {offsets = [0, 0, 0, 0], sizes = [1, 4, 1, 8], strides = [1, 1, 1, 1]} : vector<3x4x1x8xf32> to vector<1x4x1x8xf32>
    %472 = vector.shape_cast %471 : vector<1x4x1x8xf32> to vector<4x1x8xf32>
    %473 = vector.broadcast %472 : vector<4x1x8xf32> to vector<4x8x8xf32>
    %474 = arith.addf %470, %473 : vector<4x8x8xf32>
    %475 = vector.extract_strided_slice %456 {offsets = [1, 0, 0, 0], sizes = [1, 4, 32, 8], strides = [1, 1, 1, 1]} : vector<3x4x32x8xf32> to vector<1x4x32x8xf32>
    %476 = vector.shape_cast %475 : vector<1x4x32x8xf32> to vector<4x32x8xf32>
    "tpu.trace_start"() <{level = 10 : i32, message = "hsd,hdk->hsk"}> : () -> ()
    %cst_198 = arith.constant dense<0.000000e+00> : vector<4x8x8xf32>
    %477 = tpu.matmul %467, %476, %cst_198 {dimension_numbers = #tpu.dot_dimension_numbers<[2], [1], [1], [2], [0, 0, 0, 1, 1, 2], [0], [0]>} : vector<4x8x32xf32>, vector<4x32x8xf32>, vector<4x8x8xf32> -> vector<4x8x8xf32>
    "tpu.trace_stop"() : () -> ()
    %478 = vector.extract_strided_slice %458 {offsets = [1, 0, 0, 0], sizes = [1, 4, 1, 8], strides = [1, 1, 1, 1]} : vector<3x4x1x8xf32> to vector<1x4x1x8xf32>
    %479 = vector.shape_cast %478 : vector<1x4x1x8xf32> to vector<4x1x8xf32>
    %480 = vector.broadcast %479 : vector<4x1x8xf32> to vector<4x8x8xf32>
    %481 = arith.addf %477, %480 : vector<4x8x8xf32>
    %482 = vector.extract_strided_slice %456 {offsets = [2, 0, 0, 0], sizes = [1, 4, 32, 8], strides = [1, 1, 1, 1]} : vector<3x4x32x8xf32> to vector<1x4x32x8xf32>
    %483 = vector.shape_cast %482 : vector<1x4x32x8xf32> to vector<4x32x8xf32>
    "tpu.trace_start"() <{level = 10 : i32, message = "hsd,hdk->hsk"}> : () -> ()
    %cst_199 = arith.constant dense<0.000000e+00> : vector<4x8x8xf32>
    %484 = tpu.matmul %467, %483, %cst_199 {dimension_numbers = #tpu.dot_dimension_numbers<[2], [1], [1], [2], [0, 0, 0, 1, 1, 2], [0], [0]>} : vector<4x8x32xf32>, vector<4x32x8xf32>, vector<4x8x8xf32> -> vector<4x8x8xf32>
    "tpu.trace_stop"() : () -> ()
    %485 = vector.extract_strided_slice %458 {offsets = [2, 0, 0, 0], sizes = [1, 4, 1, 8], strides = [1, 1, 1, 1]} : vector<3x4x1x8xf32> to vector<1x4x1x8xf32>
    %486 = vector.shape_cast %485 : vector<1x4x1x8xf32> to vector<4x1x8xf32>
    %487 = vector.broadcast %486 : vector<4x1x8xf32> to vector<4x8x8xf32>
    %488 = arith.addf %484, %487 : vector<4x8x8xf32>
    "tpu.trace_start"() <{level = 10 : i32, message = "hqd,hkd->hqk"}> : () -> ()
    %cst_200 = arith.constant dense<0.000000e+00> : vector<4x8x8xf32>
    %489 = tpu.matmul %474, %481, %cst_200 {dimension_numbers = #tpu.dot_dimension_numbers<[2], [2], [1], [1], [0, 0, 0, 1, 1, 1], [0], [0]>} : vector<4x8x8xf32>, vector<4x8x8xf32>, vector<4x8x8xf32> -> vector<4x8x8xf32>
    "tpu.trace_stop"() : () -> ()
    %cst_201 = arith.constant 0.353553385 : f32
    %490 = vector.broadcast %cst_201 : f32 to vector<4x8x8xf32>
    %491 = arith.mulf %489, %490 : vector<4x8x8xf32>
    %492 = tpu.iota {dimensions = array<i32: 1>} : vector<4x8x8xi32>
    %493 = tpu.iota {dimensions = array<i32: 2>} : vector<4x8x8xi32>
    %494 = arith.cmpi sge, %492, %493 : vector<4x8x8xi32>
    %cst_202 = arith.constant -1.000000e+09 : f32
    %495 = vector.broadcast %cst_202 : f32 to vector<4x8x8xf32>
    %496 = arith.select %494, %495, %491 : vector<4x8x8xi1>, vector<4x8x8xf32>
    %cst_203 = arith.constant dense<0xFF800000> : vector<4x8xf32>
    %497 = vector.multi_reduction <maximumf>, %496, %cst_203 [2] : vector<4x8x8xf32> to vector<4x8xf32>
    %498 = vector.shape_cast %497 : vector<4x8xf32> to vector<4x8x1xf32>
    %499 = vector.broadcast %498 : vector<4x8x1xf32> to vector<4x8x8xf32>
    %500 = arith.subf %496, %499 : vector<4x8x8xf32>
    %501 = math.exp %500 : vector<4x8x8xf32>
    %cst_204 = arith.constant dense<0.000000e+00> : vector<4x8xf32>
    %502 = vector.multi_reduction <add>, %501, %cst_204 [2] : vector<4x8x8xf32> to vector<4x8xf32>
    %503 = vector.shape_cast %502 : vector<4x8xf32> to vector<4x8x1xf32>
    %504 = vector.broadcast %503 : vector<4x8x1xf32> to vector<4x8x8xf32>
    %505 = arith.divf %501, %504 : vector<4x8x8xf32>
    "tpu.trace_start"() <{level = 10 : i32, message = "hqk,hkd->hqd"}> : () -> ()
    %cst_205 = arith.constant dense<0.000000e+00> : vector<4x8x8xf32>
    %506 = tpu.matmul %505, %488, %cst_205 {dimension_numbers = #tpu.dot_dimension_numbers<[2], [1], [1], [2], [0, 0, 0, 1, 1, 2], [0], [0]>} : vector<4x8x8xf32>, vector<4x8x8xf32>, vector<4x8x8xf32> -> vector<4x8x8xf32>
    "tpu.trace_stop"() : () -> ()
    "tpu.trace_start"() <{level = 10 : i32, message = "hqd,hde->hqe"}> : () -> ()
    %cst_206 = arith.constant dense<0.000000e+00> : vector<4x8x32xf32>
    %507 = tpu.matmul %506, %460, %cst_206 {dimension_numbers = #tpu.dot_dimension_numbers<[2], [1], [1], [2], [0, 0, 0, 1, 1, 2], [0], [0]>} : vector<4x8x8xf32>, vector<4x8x32xf32>, vector<4x8x32xf32> -> vector<4x8x32xf32>
    "tpu.trace_stop"() : () -> ()
    %cst_207 = arith.constant dense<0.000000e+00> : vector<8x32xf32>
    %508 = vector.multi_reduction <add>, %507, %cst_207 [0] : vector<4x8x32xf32> to vector<8x32xf32>
    %509 = vector.broadcast %461 : vector<1x32xf32> to vector<8x32xf32>
    %510 = arith.addf %508, %509 : vector<8x32xf32>
    %511 = arith.addf %452, %510 : vector<8x32xf32>
    %512 = vector.extract_strided_slice %454 {offsets = [1, 0], sizes = [1, 32], strides = [1, 1]} : vector<9x32xf32> to vector<1x32xf32>
    %513 = vector.extract_strided_slice %454 {offsets = [2, 0], sizes = [1, 32], strides = [1, 1]} : vector<9x32xf32> to vector<1x32xf32>
    %cst_208 = arith.constant dense<0.000000e+00> : vector<8xf32>
    %514 = vector.multi_reduction <add>, %511, %cst_208 [1] : vector<8x32xf32> to vector<8xf32>
    %515 = vector.shape_cast %514 : vector<8xf32> to vector<8x1xf32>
    %cst_209 = arith.constant 3.200000e+01 : f32
    %516 = vector.broadcast %cst_209 : f32 to vector<8x1xf32>
    %517 = arith.divf %515, %516 : vector<8x1xf32>
    %518 = vector.broadcast %517 : vector<8x1xf32> to vector<8x32xf32>
    %519 = arith.subf %511, %518 : vector<8x32xf32>
    %520 = vector.broadcast %517 : vector<8x1xf32> to vector<8x32xf32>
    %521 = arith.subf %511, %520 : vector<8x32xf32>
    %522 = arith.mulf %519, %521 : vector<8x32xf32>
    %cst_210 = arith.constant dense<0.000000e+00> : vector<8xf32>
    %523 = vector.multi_reduction <add>, %522, %cst_210 [1] : vector<8x32xf32> to vector<8xf32>
    %524 = vector.shape_cast %523 : vector<8xf32> to vector<8x1xf32>
    %cst_211 = arith.constant 3.200000e+01 : f32
    %525 = vector.broadcast %cst_211 : f32 to vector<8x1xf32>
    %526 = arith.divf %524, %525 : vector<8x1xf32>
    %527 = vector.broadcast %517 : vector<8x1xf32> to vector<8x32xf32>
    %528 = arith.subf %511, %527 : vector<8x32xf32>
    %cst_212 = arith.constant 9.99999974E-6 : f32
    %529 = vector.broadcast %cst_212 : f32 to vector<8x1xf32>
    %530 = arith.addf %526, %529 : vector<8x1xf32>
    %531 = math.rsqrt %530 : vector<8x1xf32>
    %532 = vector.broadcast %531 : vector<8x1xf32> to vector<8x32xf32>
    %533 = arith.mulf %528, %532 : vector<8x32xf32>
    %534 = vector.broadcast %512 : vector<1x32xf32> to vector<8x32xf32>
    %535 = arith.mulf %533, %534 : vector<8x32xf32>
    %536 = vector.broadcast %513 : vector<1x32xf32> to vector<8x32xf32>
    %537 = arith.addf %535, %536 : vector<8x32xf32>
    %c1_213 = arith.constant 1 : index
    %c0_214 = arith.constant 0 : index
    %c0_215 = arith.constant 0 : index
    %c0_216 = arith.constant 0 : index
    %c0_217 = arith.constant 0 : index
    %538 = vector.load %arg13[%c1_213, %c0_214, %c0_215, %c0_216, %c0_217] : memref<2x3x4x32x8xf32, #tpu.memory_space<vmem>>, vector<1x3x4x32x8xf32>
    %539 = vector.shape_cast %538 : vector<1x3x4x32x8xf32> to vector<3x4x32x8xf32>
    %c1_218 = arith.constant 1 : index
    %c0_219 = arith.constant 0 : index
    %c0_220 = arith.constant 0 : index
    %c0_221 = arith.constant 0 : index
    %c0_222 = arith.constant 0 : index
    %540 = vector.load %arg14[%c1_218, %c0_219, %c0_220, %c0_221, %c0_222] : memref<2x3x4x1x8xf32, #tpu.memory_space<vmem>>, vector<1x3x4x1x8xf32>
    %541 = vector.shape_cast %540 : vector<1x3x4x1x8xf32> to vector<3x4x1x8xf32>
    %c1_223 = arith.constant 1 : index
    %c0_224 = arith.constant 0 : index
    %c0_225 = arith.constant 0 : index
    %c0_226 = arith.constant 0 : index
    %542 = vector.load %arg15[%c1_223, %c0_224, %c0_225, %c0_226] : memref<2x4x8x32xf32, #tpu.memory_space<vmem>>, vector<1x4x8x32xf32>
    %543 = vector.shape_cast %542 : vector<1x4x8x32xf32> to vector<4x8x32xf32>
    %544 = vector.extract_strided_slice %454 {offsets = [3, 0], sizes = [1, 32], strides = [1, 1]} : vector<9x32xf32> to vector<1x32xf32>
    %545 = vector.shape_cast %537 : vector<8x32xf32> to vector<1x8x32xf32>
    %546 = vector.shape_cast %545 : vector<1x8x32xf32> to vector<1x8x32xf32>
    %547 = vector.broadcast %546 : vector<1x8x32xf32> to vector<4x8x32xf32>
    %548 = vector.shape_cast %245 : vector<8x32xf32> to vector<1x8x32xf32>
    %549 = vector.shape_cast %548 : vector<1x8x32xf32> to vector<1x8x32xf32>
    %550 = vector.broadcast %549 : vector<1x8x32xf32> to vector<4x8x32xf32>
    %551 = vector.extract_strided_slice %539 {offsets = [0, 0, 0, 0], sizes = [1, 4, 32, 8], strides = [1, 1, 1, 1]} : vector<3x4x32x8xf32> to vector<1x4x32x8xf32>
    %552 = vector.shape_cast %551 : vector<1x4x32x8xf32> to vector<4x32x8xf32>
    "tpu.trace_start"() <{level = 10 : i32, message = "hsd,hdk->hsk"}> : () -> ()
    %cst_227 = arith.constant dense<0.000000e+00> : vector<4x8x8xf32>
    %553 = tpu.matmul %547, %552, %cst_227 {dimension_numbers = #tpu.dot_dimension_numbers<[2], [1], [1], [2], [0, 0, 0, 1, 1, 2], [0], [0]>} : vector<4x8x32xf32>, vector<4x32x8xf32>, vector<4x8x8xf32> -> vector<4x8x8xf32>
    "tpu.trace_stop"() : () -> ()
    %554 = vector.extract_strided_slice %541 {offsets = [0, 0, 0, 0], sizes = [1, 4, 1, 8], strides = [1, 1, 1, 1]} : vector<3x4x1x8xf32> to vector<1x4x1x8xf32>
    %555 = vector.shape_cast %554 : vector<1x4x1x8xf32> to vector<4x1x8xf32>
    %556 = vector.broadcast %555 : vector<4x1x8xf32> to vector<4x8x8xf32>
    %557 = arith.addf %553, %556 : vector<4x8x8xf32>
    %558 = vector.extract_strided_slice %539 {offsets = [1, 0, 0, 0], sizes = [1, 4, 32, 8], strides = [1, 1, 1, 1]} : vector<3x4x32x8xf32> to vector<1x4x32x8xf32>
    %559 = vector.shape_cast %558 : vector<1x4x32x8xf32> to vector<4x32x8xf32>
    "tpu.trace_start"() <{level = 10 : i32, message = "hsd,hdk->hsk"}> : () -> ()
    %cst_228 = arith.constant dense<0.000000e+00> : vector<4x8x8xf32>
    %560 = tpu.matmul %550, %559, %cst_228 {dimension_numbers = #tpu.dot_dimension_numbers<[2], [1], [1], [2], [0, 0, 0, 1, 1, 2], [0], [0]>} : vector<4x8x32xf32>, vector<4x32x8xf32>, vector<4x8x8xf32> -> vector<4x8x8xf32>
    "tpu.trace_stop"() : () -> ()
    %561 = vector.extract_strided_slice %541 {offsets = [1, 0, 0, 0], sizes = [1, 4, 1, 8], strides = [1, 1, 1, 1]} : vector<3x4x1x8xf32> to vector<1x4x1x8xf32>
    %562 = vector.shape_cast %561 : vector<1x4x1x8xf32> to vector<4x1x8xf32>
    %563 = vector.broadcast %562 : vector<4x1x8xf32> to vector<4x8x8xf32>
    %564 = arith.addf %560, %563 : vector<4x8x8xf32>
    %565 = vector.extract_strided_slice %539 {offsets = [2, 0, 0, 0], sizes = [1, 4, 32, 8], strides = [1, 1, 1, 1]} : vector<3x4x32x8xf32> to vector<1x4x32x8xf32>
    %566 = vector.shape_cast %565 : vector<1x4x32x8xf32> to vector<4x32x8xf32>
    "tpu.trace_start"() <{level = 10 : i32, message = "hsd,hdk->hsk"}> : () -> ()
    %cst_229 = arith.constant dense<0.000000e+00> : vector<4x8x8xf32>
    %567 = tpu.matmul %550, %566, %cst_229 {dimension_numbers = #tpu.dot_dimension_numbers<[2], [1], [1], [2], [0, 0, 0, 1, 1, 2], [0], [0]>} : vector<4x8x32xf32>, vector<4x32x8xf32>, vector<4x8x8xf32> -> vector<4x8x8xf32>
    "tpu.trace_stop"() : () -> ()
    %568 = vector.extract_strided_slice %541 {offsets = [2, 0, 0, 0], sizes = [1, 4, 1, 8], strides = [1, 1, 1, 1]} : vector<3x4x1x8xf32> to vector<1x4x1x8xf32>
    %569 = vector.shape_cast %568 : vector<1x4x1x8xf32> to vector<4x1x8xf32>
    %570 = vector.broadcast %569 : vector<4x1x8xf32> to vector<4x8x8xf32>
    %571 = arith.addf %567, %570 : vector<4x8x8xf32>
    "tpu.trace_start"() <{level = 10 : i32, message = "hqd,hkd->hqk"}> : () -> ()
    %cst_230 = arith.constant dense<0.000000e+00> : vector<4x8x8xf32>
    %572 = tpu.matmul %557, %564, %cst_230 {dimension_numbers = #tpu.dot_dimension_numbers<[2], [2], [1], [1], [0, 0, 0, 1, 1, 1], [0], [0]>} : vector<4x8x8xf32>, vector<4x8x8xf32>, vector<4x8x8xf32> -> vector<4x8x8xf32>
    "tpu.trace_stop"() : () -> ()
    %cst_231 = arith.constant 0.353553385 : f32
    %573 = vector.broadcast %cst_231 : f32 to vector<4x8x8xf32>
    %574 = arith.mulf %572, %573 : vector<4x8x8xf32>
    %cst_232 = arith.constant dense<0xFF800000> : vector<4x8xf32>
    %575 = vector.multi_reduction <maximumf>, %574, %cst_232 [2] : vector<4x8x8xf32> to vector<4x8xf32>
    %576 = vector.shape_cast %575 : vector<4x8xf32> to vector<4x8x1xf32>
    %577 = vector.broadcast %576 : vector<4x8x1xf32> to vector<4x8x8xf32>
    %578 = arith.subf %574, %577 : vector<4x8x8xf32>
    %579 = math.exp %578 : vector<4x8x8xf32>
    %cst_233 = arith.constant dense<0.000000e+00> : vector<4x8xf32>
    %580 = vector.multi_reduction <add>, %579, %cst_233 [2] : vector<4x8x8xf32> to vector<4x8xf32>
    %581 = vector.shape_cast %580 : vector<4x8xf32> to vector<4x8x1xf32>
    %582 = vector.broadcast %581 : vector<4x8x1xf32> to vector<4x8x8xf32>
    %583 = arith.divf %579, %582 : vector<4x8x8xf32>
    "tpu.trace_start"() <{level = 10 : i32, message = "hqk,hkd->hqd"}> : () -> ()
    %cst_234 = arith.constant dense<0.000000e+00> : vector<4x8x8xf32>
    %584 = tpu.matmul %583, %571, %cst_234 {dimension_numbers = #tpu.dot_dimension_numbers<[2], [1], [1], [2], [0, 0, 0, 1, 1, 2], [0], [0]>} : vector<4x8x8xf32>, vector<4x8x8xf32>, vector<4x8x8xf32> -> vector<4x8x8xf32>
    "tpu.trace_stop"() : () -> ()
    "tpu.trace_start"() <{level = 10 : i32, message = "hqd,hde->hqe"}> : () -> ()
    %cst_235 = arith.constant dense<0.000000e+00> : vector<4x8x32xf32>
    %585 = tpu.matmul %584, %543, %cst_235 {dimension_numbers = #tpu.dot_dimension_numbers<[2], [1], [1], [2], [0, 0, 0, 1, 1, 2], [0], [0]>} : vector<4x8x8xf32>, vector<4x8x32xf32>, vector<4x8x32xf32> -> vector<4x8x32xf32>
    "tpu.trace_stop"() : () -> ()
    %cst_236 = arith.constant dense<0.000000e+00> : vector<8x32xf32>
    %586 = vector.multi_reduction <add>, %585, %cst_236 [0] : vector<4x8x32xf32> to vector<8x32xf32>
    %587 = vector.broadcast %544 : vector<1x32xf32> to vector<8x32xf32>
    %588 = arith.addf %586, %587 : vector<8x32xf32>
    %589 = arith.addf %537, %588 : vector<8x32xf32>
    %590 = vector.extract_strided_slice %454 {offsets = [4, 0], sizes = [1, 32], strides = [1, 1]} : vector<9x32xf32> to vector<1x32xf32>
    %591 = vector.extract_strided_slice %454 {offsets = [5, 0], sizes = [1, 32], strides = [1, 1]} : vector<9x32xf32> to vector<1x32xf32>
    %cst_237 = arith.constant dense<0.000000e+00> : vector<8xf32>
    %592 = vector.multi_reduction <add>, %589, %cst_237 [1] : vector<8x32xf32> to vector<8xf32>
    %593 = vector.shape_cast %592 : vector<8xf32> to vector<8x1xf32>
    %cst_238 = arith.constant 3.200000e+01 : f32
    %594 = vector.broadcast %cst_238 : f32 to vector<8x1xf32>
    %595 = arith.divf %593, %594 : vector<8x1xf32>
    %596 = vector.broadcast %595 : vector<8x1xf32> to vector<8x32xf32>
    %597 = arith.subf %589, %596 : vector<8x32xf32>
    %598 = vector.broadcast %595 : vector<8x1xf32> to vector<8x32xf32>
    %599 = arith.subf %589, %598 : vector<8x32xf32>
    %600 = arith.mulf %597, %599 : vector<8x32xf32>
    %cst_239 = arith.constant dense<0.000000e+00> : vector<8xf32>
    %601 = vector.multi_reduction <add>, %600, %cst_239 [1] : vector<8x32xf32> to vector<8xf32>
    %602 = vector.shape_cast %601 : vector<8xf32> to vector<8x1xf32>
    %cst_240 = arith.constant 3.200000e+01 : f32
    %603 = vector.broadcast %cst_240 : f32 to vector<8x1xf32>
    %604 = arith.divf %602, %603 : vector<8x1xf32>
    %605 = vector.broadcast %595 : vector<8x1xf32> to vector<8x32xf32>
    %606 = arith.subf %589, %605 : vector<8x32xf32>
    %cst_241 = arith.constant 9.99999974E-6 : f32
    %607 = vector.broadcast %cst_241 : f32 to vector<8x1xf32>
    %608 = arith.addf %604, %607 : vector<8x1xf32>
    %609 = math.rsqrt %608 : vector<8x1xf32>
    %610 = vector.broadcast %609 : vector<8x1xf32> to vector<8x32xf32>
    %611 = arith.mulf %606, %610 : vector<8x32xf32>
    %612 = vector.broadcast %590 : vector<1x32xf32> to vector<8x32xf32>
    %613 = arith.mulf %611, %612 : vector<8x32xf32>
    %614 = vector.broadcast %591 : vector<1x32xf32> to vector<8x32xf32>
    %615 = arith.addf %613, %614 : vector<8x32xf32>
    %c1_242 = arith.constant 1 : index
    %c0_243 = arith.constant 0 : index
    %c0_244 = arith.constant 0 : index
    %616 = vector.load %arg16[%c1_242, %c0_243, %c0_244] : memref<2x32x64xf32, #tpu.memory_space<vmem>>, vector<1x32x64xf32>
    %617 = vector.shape_cast %616 : vector<1x32x64xf32> to vector<32x64xf32>
    %c1_245 = arith.constant 1 : index
    %c0_246 = arith.constant 0 : index
    %c0_247 = arith.constant 0 : index
    %618 = vector.load %arg19[%c1_245, %c0_246, %c0_247] : memref<2x1x64xf32, #tpu.memory_space<vmem>>, vector<1x1x64xf32>
    %619 = vector.shape_cast %618 : vector<1x1x64xf32> to vector<1x64xf32>
    %c1_248 = arith.constant 1 : index
    %c0_249 = arith.constant 0 : index
    %c0_250 = arith.constant 0 : index
    %620 = vector.load %arg17[%c1_248, %c0_249, %c0_250] : memref<2x64x32xf32, #tpu.memory_space<vmem>>, vector<1x64x32xf32>
    %621 = vector.shape_cast %620 : vector<1x64x32xf32> to vector<64x32xf32>
    %622 = vector.extract_strided_slice %454 {offsets = [6, 0], sizes = [1, 32], strides = [1, 1]} : vector<9x32xf32> to vector<1x32xf32>
    %cst_251 = arith.constant dense<0.000000e+00> : vector<8x64xf32>
    %623 = tpu.matmul %615, %617, %cst_251 {dimension_numbers = #tpu.dot_dimension_numbers<[1], [0], [0], [1], [0, 0, 1, 1], [], []>} : vector<8x32xf32>, vector<32x64xf32>, vector<8x64xf32> -> vector<8x64xf32>
    %624 = vector.broadcast %619 : vector<1x64xf32> to vector<8x64xf32>
    %625 = arith.addf %623, %624 : vector<8x64xf32>
    %cst_252 = arith.constant 0.000000e+00 : f32
    %626 = vector.broadcast %cst_252 : f32 to vector<8x64xf32>
    %627 = arith.maximumf %625, %626 : vector<8x64xf32>
    %cst_253 = arith.constant dense<0.000000e+00> : vector<8x32xf32>
    %628 = tpu.matmul %627, %621, %cst_253 {dimension_numbers = #tpu.dot_dimension_numbers<[1], [0], [0], [1], [0, 0, 1, 1], [], []>} : vector<8x64xf32>, vector<64x32xf32>, vector<8x32xf32> -> vector<8x32xf32>
    %629 = vector.broadcast %622 : vector<1x32xf32> to vector<8x32xf32>
    %630 = arith.addf %628, %629 : vector<8x32xf32>
    %631 = arith.addf %615, %630 : vector<8x32xf32>
    %632 = vector.extract_strided_slice %454 {offsets = [7, 0], sizes = [1, 32], strides = [1, 1]} : vector<9x32xf32> to vector<1x32xf32>
    %633 = vector.extract_strided_slice %454 {offsets = [8, 0], sizes = [1, 32], strides = [1, 1]} : vector<9x32xf32> to vector<1x32xf32>
    %cst_254 = arith.constant dense<0.000000e+00> : vector<8xf32>
    %634 = vector.multi_reduction <add>, %631, %cst_254 [1] : vector<8x32xf32> to vector<8xf32>
    %635 = vector.shape_cast %634 : vector<8xf32> to vector<8x1xf32>
    %cst_255 = arith.constant 3.200000e+01 : f32
    %636 = vector.broadcast %cst_255 : f32 to vector<8x1xf32>
    %637 = arith.divf %635, %636 : vector<8x1xf32>
    %638 = vector.broadcast %637 : vector<8x1xf32> to vector<8x32xf32>
    %639 = arith.subf %631, %638 : vector<8x32xf32>
    %640 = vector.broadcast %637 : vector<8x1xf32> to vector<8x32xf32>
    %641 = arith.subf %631, %640 : vector<8x32xf32>
    %642 = arith.mulf %639, %641 : vector<8x32xf32>
    %cst_256 = arith.constant dense<0.000000e+00> : vector<8xf32>
    %643 = vector.multi_reduction <add>, %642, %cst_256 [1] : vector<8x32xf32> to vector<8xf32>
    %644 = vector.shape_cast %643 : vector<8xf32> to vector<8x1xf32>
    %cst_257 = arith.constant 3.200000e+01 : f32
    %645 = vector.broadcast %cst_257 : f32 to vector<8x1xf32>
    %646 = arith.divf %644, %645 : vector<8x1xf32>
    %647 = vector.broadcast %637 : vector<8x1xf32> to vector<8x32xf32>
    %648 = arith.subf %631, %647 : vector<8x32xf32>
    %cst_258 = arith.constant 9.99999974E-6 : f32
    %649 = vector.broadcast %cst_258 : f32 to vector<8x1xf32>
    %650 = arith.addf %646, %649 : vector<8x1xf32>
    %651 = math.rsqrt %650 : vector<8x1xf32>
    %652 = vector.broadcast %651 : vector<8x1xf32> to vector<8x32xf32>
    %653 = arith.mulf %648, %652 : vector<8x32xf32>
    %654 = vector.broadcast %632 : vector<1x32xf32> to vector<8x32xf32>
    %655 = arith.mulf %653, %654 : vector<8x32xf32>
    %656 = vector.broadcast %633 : vector<1x32xf32> to vector<8x32xf32>
    %657 = arith.addf %655, %656 : vector<8x32xf32>
    %c0_259 = arith.constant 0 : index
    %c0_260 = arith.constant 0 : index
    %658 = vector.load %arg20[%c0_259, %c0_260] : memref<32x128xf32, #tpu.memory_space<vmem>>, vector<32x128xf32>
    %cst_261 = arith.constant dense<0.000000e+00> : vector<8x128xf32>
    %659 = tpu.matmul %657, %658, %cst_261 {dimension_numbers = #tpu.dot_dimension_numbers<[1], [0], [0], [1], [0, 0, 1, 1], [], []>} : vector<8x32xf32>, vector<32x128xf32>, vector<8x128xf32> -> vector<8x128xf32>
    %c0_262 = arith.constant 0 : index
    %c0_263 = arith.constant 0 : index
    %660 = vector.load %arg21[%c0_262, %c0_263] : memref<1x128xf32, #tpu.memory_space<vmem>>, vector<1x128xf32>
    %661 = vector.broadcast %660 : vector<1x128xf32> to vector<8x128xf32>
    %662 = arith.addf %659, %661 : vector<8x128xf32>
    %c0_264 = arith.constant 0 : index
    %c0_265 = arith.constant 0 : index
    %c0_266 = arith.constant 0 : index
    %663 = vector.load %arg22[%c0_264, %c0_265, %c0_266] : memref<1x8x128xf32, #tpu.memory_space<vmem>>, vector<1x8x128xf32>
    %664 = vector.shape_cast %663 : vector<1x8x128xf32> to vector<8x128xf32>
    %665 = vector.shape_cast %662 : vector<8x128xf32> to vector<1x8x128xf32>
    tpu.vector_store %arg22[%c0_264, %c0_265, %c0_266], %665 {strides = array<i32>} : memref<1x8x128xf32, #tpu.memory_space<vmem>>, vector<1x8x128xf32>,
    return
  }
  func.func @transform_0(%arg0: i32) -> (i32, i32, i32) {
    %c0_i32 = arith.constant 0 : i32
    %c0_i32_0 = arith.constant 0 : i32
    %c0_i32_1 = arith.constant 0 : i32
    return %arg0, %c0_i32, %c0_i32_0 : i32, i32, i32
  }
  func.func @transform_1(%arg0: i32) -> (i32, i32, i32) {
    %c0_i32 = arith.constant 0 : i32
    %c0_i32_0 = arith.constant 0 : i32
    %c0_i32_1 = arith.constant 0 : i32
    return %arg0, %c0_i32, %c0_i32_0 : i32, i32, i32
  }
  func.func @transform_2(%arg0: i32) -> (i32, i32, i32, i32, i32) {
    %c0_i32 = arith.constant 0 : i32
    %c0_i32_0 = arith.constant 0 : i32
    %c0_i32_1 = arith.constant 0 : i32
    %c0_i32_2 = arith.constant 0 : i32
    %c0_i32_3 = arith.constant 0 : i32
    %c0_i32_4 = arith.constant 0 : i32
    return %c0_i32, %c0_i32_0, %c0_i32_1, %c0_i32_2, %c0_i32_3 : i32, i32, i32, i32, i32
  }
  func.func @transform_3(%arg0: i32) -> (i32, i32, i32, i32, i32) {
    %c0_i32 = arith.constant 0 : i32
    %c0_i32_0 = arith.constant 0 : i32
    %c0_i32_1 = arith.constant 0 : i32
    %c0_i32_2 = arith.constant 0 : i32
    %c0_i32_3 = arith.constant 0 : i32
    %c0_i32_4 = arith.constant 0 : i32
    return %c0_i32, %c0_i32_0, %c0_i32_1, %c0_i32_2, %c0_i32_3 : i32, i32, i32, i32, i32
  }
  func.func @transform_4(%arg0: i32) -> (i32, i32, i32, i32) {
    %c0_i32 = arith.constant 0 : i32
    %c0_i32_0 = arith.constant 0 : i32
    %c0_i32_1 = arith.constant 0 : i32
    %c0_i32_2 = arith.constant 0 : i32
    %c0_i32_3 = arith.constant 0 : i32
    return %c0_i32, %c0_i32_0, %c0_i32_1, %c0_i32_2 : i32, i32, i32, i32
  }
  func.func @transform_5(%arg0: i32) -> (i32, i32, i32) {
    %c0_i32 = arith.constant 0 : i32
    %c0_i32_0 = arith.constant 0 : i32
    %c0_i32_1 = arith.constant 0 : i32
    %c0_i32_2 = arith.constant 0 : i32
    return %c0_i32, %c0_i32_0, %c0_i32_1 : i32, i32, i32
  }
  func.func @transform_6(%arg0: i32) -> (i32, i32, i32) {
    %c0_i32 = arith.constant 0 : i32
    %c0_i32_0 = arith.constant 0 : i32
    %c0_i32_1 = arith.constant 0 : i32
    %c0_i32_2 = arith.constant 0 : i32
    return %c0_i32, %c0_i32_0, %c0_i32_1 : i32, i32, i32
  }
  func.func @transform_7(%arg0: i32) -> (i32, i32, i32) {
    %c0_i32 = arith.constant 0 : i32
    %c0_i32_0 = arith.constant 0 : i32
    %c0_i32_1 = arith.constant 0 : i32
    %c0_i32_2 = arith.constant 0 : i32
    return %c0_i32, %c0_i32_0, %c0_i32_1 : i32, i32, i32
  }
  func.func @transform_8(%arg0: i32) -> (i32, i32, i32) {
    %c0_i32 = arith.constant 0 : i32
    %c0_i32_0 = arith.constant 0 : i32
    %c0_i32_1 = arith.constant 0 : i32
    %c0_i32_2 = arith.constant 0 : i32
    return %c0_i32, %c0_i32_0, %c0_i32_1 : i32, i32, i32
  }
  func.func @transform_9(%arg0: i32) -> (i32, i32, i32, i32, i32) {
    %c0_i32 = arith.constant 0 : i32
    %c0_i32_0 = arith.constant 0 : i32
    %c0_i32_1 = arith.constant 0 : i32
    %c0_i32_2 = arith.constant 0 : i32
    %c0_i32_3 = arith.constant 0 : i32
    %c0_i32_4 = arith.constant 0 : i32
    return %c0_i32, %c0_i32_0, %c0_i32_1, %c0_i32_2, %c0_i32_3 : i32, i32, i32, i32, i32
  }
  func.func @transform_10(%arg0: i32) -> (i32, i32, i32, i32, i32) {
    %c0_i32 = arith.constant 0 : i32
    %c0_i32_0 = arith.constant 0 : i32
    %c0_i32_1 = arith.constant 0 : i32
    %c0_i32_2 = arith.constant 0 : i32
    %c0_i32_3 = arith.constant 0 : i32
    %c0_i32_4 = arith.constant 0 : i32
    return %c0_i32, %c0_i32_0, %c0_i32_1, %c0_i32_2, %c0_i32_3 : i32, i32, i32, i32, i32
  }
  func.func @transform_11(%arg0: i32) -> (i32, i32, i32, i32) {
    %c0_i32 = arith.constant 0 : i32
    %c0_i32_0 = arith.constant 0 : i32
    %c0_i32_1 = arith.constant 0 : i32
    %c0_i32_2 = arith.constant 0 : i32
    %c0_i32_3 = arith.constant 0 : i32
    return %c0_i32, %c0_i32_0, %c0_i32_1, %c0_i32_2 : i32, i32, i32, i32
  }
  func.func @transform_12(%arg0: i32) -> (i32, i32, i32, i32, i32) {
    %c0_i32 = arith.constant 0 : i32
    %c0_i32_0 = arith.constant 0 : i32
    %c0_i32_1 = arith.constant 0 : i32
    %c0_i32_2 = arith.constant 0 : i32
    %c0_i32_3 = arith.constant 0 : i32
    %c0_i32_4 = arith.constant 0 : i32
    return %c0_i32, %c0_i32_0, %c0_i32_1, %c0_i32_2, %c0_i32_3 : i32, i32, i32, i32, i32
  }
  func.func @transform_13(%arg0: i32) -> (i32, i32, i32, i32, i32) {
    %c0_i32 = arith.constant 0 : i32
    %c0_i32_0 = arith.constant 0 : i32
    %c0_i32_1 = arith.constant 0 : i32
    %c0_i32_2 = arith.constant 0 : i32
    %c0_i32_3 = arith.constant 0 : i32
    %c0_i32_4 = arith.constant 0 : i32
    return %c0_i32, %c0_i32_0, %c0_i32_1, %c0_i32_2, %c0_i32_3 : i32, i32, i32, i32, i32
  }
  func.func @transform_14(%arg0: i32) -> (i32, i32, i32, i32) {
    %c0_i32 = arith.constant 0 : i32
    %c0_i32_0 = arith.constant 0 : i32
    %c0_i32_1 = arith.constant 0 : i32
    %c0_i32_2 = arith.constant 0 : i32
    %c0_i32_3 = arith.constant 0 : i32
    return %c0_i32, %c0_i32_0, %c0_i32_1, %c0_i32_2 : i32, i32, i32, i32
  }
  func.func @transform_15(%arg0: i32) -> (i32, i32, i32) {
    %c0_i32 = arith.constant 0 : i32
    %c0_i32_0 = arith.constant 0 : i32
    %c0_i32_1 = arith.constant 0 : i32
    %c0_i32_2 = arith.constant 0 : i32
    return %c0_i32, %c0_i32_0, %c0_i32_1 : i32, i32, i32
  }
  func.func @transform_16(%arg0: i32) -> (i32, i32, i32) {
    %c0_i32 = arith.constant 0 : i32
    %c0_i32_0 = arith.constant 0 : i32
    %c0_i32_1 = arith.constant 0 : i32
    %c0_i32_2 = arith.constant 0 : i32
    return %c0_i32, %c0_i32_0, %c0_i32_1 : i32, i32, i32
  }
  func.func @transform_17(%arg0: i32) -> (i32, i32, i32) {
    %c0_i32 = arith.constant 0 : i32
    %c0_i32_0 = arith.constant 0 : i32
    %c0_i32_1 = arith.constant 0 : i32
    %c0_i32_2 = arith.constant 0 : i32
    return %c0_i32, %c0_i32_0, %c0_i32_1 : i32, i32, i32
  }
  func.func @transform_18(%arg0: i32) -> (i32, i32, i32) {
    %c0_i32 = arith.constant 0 : i32
    %c0_i32_0 = arith.constant 0 : i32
    %c0_i32_1 = arith.constant 0 : i32
    %c0_i32_2 = arith.constant 0 : i32
    return %c0_i32, %c0_i32_0, %c0_i32_1 : i32, i32, i32
  }
  func.func @transform_19(%arg0: i32) -> (i32, i32) {
    %c0_i32 = arith.constant 0 : i32
    %c0_i32_0 = arith.constant 0 : i32
    %c0_i32_1 = arith.constant 0 : i32
    return %c0_i32, %c0_i32_0 : i32, i32
  }
  func.func @transform_20(%arg0: i32) -> (i32, i32) {
    %c0_i32 = arith.constant 0 : i32
    %c0_i32_0 = arith.constant 0 : i32
    %c0_i32_1 = arith.constant 0 : i32
    return %c0_i32, %c0_i32_0 : i32, i32
  }
  func.func @transform_21(%arg0: i32) -> (i32, i32, i32) {
    %c0_i32 = arith.constant 0 : i32
    %c0_i32_0 = arith.constant 0 : i32
    %c0_i32_1 = arith.constant 0 : i32
    return %arg0, %c0_i32, %c0_i32_0 : i32, i32, i32
  }
}

</mosaic_0001>

<bundles_post_ra>
// kernel: transformer_forward.1
= control target key start
LH: loop header
LB: loop body
LE: loop exit
PB: predicated region body
PF: predicated region fallthrough
CT: control target
= control target key end

     0   :  { %s19072_s0 = inlined_call_operand.vmem [shape: f32[2,8,32], index: 0, kind: input, shape index: {}]   ;;  %s19073_s1 = inlined_call_operand.vmem [shape: f32[2,8,32], index: 1, kind: input, shape index: {}]   ;;  %s19074_s2 = inlined_call_operand.vmem [shape: f32[2,3,4,32,8], index: 2, kind: input, shape index: {}]   ;;  %s19075_s3 = inlined_call_operand.vmem [shape: f32[2,3,4,1,8], index: 3, kind: input, shape index: {}]   ;;  %s19076_s4 = inlined_call_operand.vmem [shape: f32[2,4,8,32], index: 4, kind: input, shape index: {}]   ;;  %s19077_s5 = inlined_call_operand.vmem [shape: f32[2,32,64], index: 5, kind: input, shape index: {}]   ;;  %s19078_s6 = inlined_call_operand.vmem [shape: f32[2,64,32], index: 6, kind: input, shape index: {}]   ;;  %s19079_s7 = inlined_call_operand.vmem [shape: f32[2,6,32], index: 7, kind: input, shape index: {}]   ;;  %s19080_s8 = inlined_call_operand.vmem [shape: f32[2,1,64], index: 8, kind: input, shape index: {}]   ;;  %s19081_s9 = inlined_call_operand.vmem [shape: f32[2,3,4,32,8], index: 9, kind: input, shape index: {}]   ;;  %s19082_s10 = inlined_call_operand.vmem [shape: f32[2,3,4,1,8], index: 10, kind: input, shape index: {}]   ;;  %s19083_s11 = inlined_call_operand.vmem [shape: f32[2,4,8,32], index: 11, kind: input, shape index: {}]   ;;  %s19084_s12 = inlined_call_operand.vmem [shape: f32[2,3,4,32,8], index: 12, kind: input, shape index: {}]   ;;  %s19085_s13 = inlined_call_operand.vmem [shape: f32[2,3,4,1,8], index: 13, kind: input, shape index: {}]   ;;  %s19086_s14 = inlined_call_operand.vmem [shape: f32[2,4,8,32], index: 14, kind: input, shape index: {}]   ;;  %s19087_s15 = inlined_call_operand.vmem [shape: f32[2,32,64], index: 15, kind: input, shape index: {}]   ;;  %s19088_s16 = inlined_call_operand.vmem [shape: f32[2,64,32], index: 16, kind: input, shape index: {}]   ;;  %s19089_s17 = inlined_call_operand.vmem [shape: f32[2,9,32], index: 17, kind: input, shape index: {}]   ;;  %s19090_s18 = inlined_call_operand.vmem [shape: f32[2,1,64], index: 18, kind: input, shape index: {}]   ;;  %s19091_s19 = inlined_call_operand.vmem [shape: f32[32,128], index: 19, kind: input, shape index: {}]   ;;  %s19092_s20 = inlined_call_operand.vmem [shape: f32[1,128], index: 20, kind: input, shape index: {}]   ;;  %s19093_s21 = inlined_call_operand.hbm [shape: f32[2,8,128], index: 21, kind: output, shape index: {}]  }
   0x1   :  { %19106 = sst [smem:[#allocation11_spill]] %s19072_s0 }
   0x2   :  { %19107 = sst [smem:[#allocation12_spill]] %s19073_s1 }
   0x3   :  { %19108 = sst [smem:[#allocation13_spill]] %s19074_s2 }
   0x4   :  { %19109 = sst [smem:[#allocation14_spill]] %s19075_s3 }
   0x5   :  { %19110 = sst [smem:[#allocation15_spill]] %s19076_s4 }
   0x6   :  { %19111 = sst [smem:[#allocation16_spill]] %s19077_s5 }
   0x7   :  { %19112 = sst [smem:[#allocation17_spill]] %s19078_s6 }
   0x8   :  { %19113 = sst [smem:[#allocation18_spill]] %s19079_s7 }
   0x9   :  { %19114 = sst [smem:[#allocation19_spill]] %s19080_s8 }
   0xa   :  { %19115 = sst [smem:[#allocation20_spill]] %s19092_s20 }
   0xb   :  { %19116 = sst [smem:[#allocation21_spill]] %s19093_s21 }
   0xc   :  { %26 = vsyncpa [#allocation3], 0 }
   0xd   :  { %28 = vsyncpa [#allocation3 + $0x1], 0  ;;  %s16548_s2 = smov 0   ;;  %s16550_s25 = smov 0  }
   0xe   :  { %s16552_s26 = smov 0   ;;  %s16554_s27 = smov 0  }
   0xf LB: > { %19117 = sst [smem:[#allocation5_spill]] %s16420_s2  ;;  %s16569_s3 = sadd.s32 4294967295, %s16432_s27   ;;  %s16432_s27 = sphi %s16554_s27, %s19143_s27   ;;  %s16428_s26 = sphi %s16552_s26, %s19145_s26   ;;  %s16424_s25 = sphi %s16550_s25, %s19147_s25   ;;  %s16420_s2 = sphi %s16548_s2, %s19146_s2  }
  0x10   : > { %19118 = sst [smem:[#allocation6_spill]] %s16428_s26  ;;  %s13366_s28 = sadd.s32 4294967294, %s16432_s27  }
  0x11   : > { %19119 = sst [smem:[#allocation7_spill]] %s16432_s27  ;;  %s16573_s29 = sadd.s32 1, %s16432_s27  }
  0x12   : > { %19120 = sst [smem:[#allocation8_spill]] %s16573_s29  ;;  %s492_s0 = sadd.s32 1, %s16428_s26 }
  0x13   : > { %s489_s4 = ssub.s32 %s16432_s27, %s16573_s29  ;;  %p502_p0 = scmp.ne.s32.totalorder %s16428_s26, %s16424_s25 }
  0x14   : > { %p490_p1 = scmp.eq.s32.totalorder %s489_s4, 0  ;;  %p503_p2 = scmp.eq.s32.totalorder %s16569_s3, 1 }
  0x15   : > { %p508_p3 = scmp.ne.s32.totalorder %s16424_s25, %s16420_s2  ;;  %p509_p4 = scmp.eq.s32.totalorder %s13366_s28, 1 }
  0x16   : > { %s16584_s30 = scalar_select %p490_p1, %s16428_s26, %s492_s0  }
  0x17   : > { %p16586_p5 = por %p503_p2, %p502_p0  ;;  %p16590_p6 = por %p509_p4, %p508_p3 }
  0x18   : > { %19121 = sst [smem:[#allocation9_spill]] %s16584_s30  ;;  %p13369_p7 = scmp.ge.s32.totalorder %s16432_s27, 1 }
  0x19   : > { %s19123_s22 = scalar_select %p16590_p6, 1, 0 }
  0x1a   : > { %p598_p8 = scmp.lt.s32.totalorder %s16432_s27, 3 }
  0x1b   : > { %19124 = sst [smem:[#allocation10_spill]] %s19123_s22 }
  0x1c   : > { %p599_p9 = pnand %p13369_p7, %p598_p8 }
  0x1d   : > { %s19125_s24 = sld [smem:[#allocation13_spill]] (!%p599_p9)  ;;  %v16434_v3 = vmov (!%p599_p9), 0.0|0.0   ;;  %p661_p10 = scmp.lt.s32.totalorder (!%p599_p9), %s16569_s3, 1  ;;  %vm16435_vm0 = vmmov (!%p599_p9), 0   ;;  %v16436_v11 = vmov (!%p599_p9), 0.0   ;;  %vm759_vm1 = vcmask (!%p599_p9), 261120  }
  0x1e   : > { %602 = sbr.rel (%p599_p9) target bundleno = 11833 (0x2e39), region = 104  ;;  %15702 = vmatprep.subr.bf16.mxu0 (!%p599_p9), %v16434_v3  ;;  %15708 = vmatprep.subr.bf16.mxu1 (!%p599_p9), %v16434_v3  ;;  %s19126_s2 = sld [smem:[#allocation11_spill]] (!%p599_p9)  ;;  %vm1651_vm2 = vcmask (!%p599_p9), 64512   ;;  %vm2722_vm3 = vcmask (!%p599_p9), 523264  }
  0x1f   : > { %14427 = vmatprep.mubr.msk.f32.mxu0 (!%p599_p9), %vm16435_vm0, %v16436_v11  ;;  %14438 = vmatprep.mubr.msk.f32.mxu1 (!%p599_p9), %vm16435_vm0, %v16436_v11  ;;  %s19127_s21 = sld [smem:[#allocation14_spill]] (!%p599_p9)  ;;  %s19128_s23 = sld [smem:[#allocation15_spill]] (!%p599_p9) }
  0x20   : > { %s19129_s7 = sld [smem:[#allocation18_spill]] (!%p599_p9)  ;;  %s19130_s27 = sld [smem:[#allocation16_spill]] (!%p599_p9) }
  0x21   : > { %s19132_s6 = sld [smem:[#allocation17_spill]] (!%p599_p9)  ;;  %s19133_s8 = sld [smem:[#allocation19_spill]] (!%p599_p9) }
  0x22   : > { %s19135_s22 = sld [smem:[#allocation12_spill]] (!%p599_p9) }
  0x23   : > { %v671_v0 = vld [vmem:[%s19125_s24] sm:$0xff] (!%p599_p9)  ;;  %v672_v1 = vld [vmem:[%s19125_s24 + $0x8] sm:$0xff] (!%p599_p9)  ;;  %v673_v6 = vld [vmem:[%s19125_s24 + $0x10] sm:$0xff] (!%p599_p9)  ;;  %s19138_s4 = sld [smem:[#allocation20_spill]] (!%p599_p9) }
  0x24   : > { %v675_v2 = vld [vmem:[%s19125_s24 + $0x20] sm:$0xff] (!%p599_p9)  ;;  %v15703_v4 = vpack.c.bf16 (!%p599_p9), %v672_v1, %v671_v0  ;;  %v676_v5 = vld [vmem:[%s19125_s24 + $0x28] sm:$0xff] (!%p599_p9)  ;;  %v674_v7 = vld [vmem:[%s19125_s24 + $0x18] sm:$0xff] (!%p599_p9) }
  0x25   : > { %v15709_v8 = vpack.c.bf16 %v676_v5, %v675_v2  ;;  %v677_v9 = vld [vmem:[%s19125_s24 + $0x30] sm:$0xff]  ;;  %v678_v10 = vld [vmem:[%s19125_s24 + $0x38] sm:$0xff]  ;;  %v15706_v12 = vpack.c.bf16 %v674_v7, %v673_v6  ;;  %s16628_s26 = scalar_select %p661_p10, %s16569_s3, 1  ;;  %v679_v14 = vld [vmem:[%s19125_s24 + $0x40] sm:$0xff] }
  0x26   : > { %15704 = vmatpush3.bf16.msra.mxu0 %v15703_v4  ;;  %v15712_v13 = vpack.c.bf16 %v678_v10, %v677_v9  ;;  %v680_v15 = vld [vmem:[%s19125_s24 + $0x48] sm:$0xff]  ;;  %v683_v16 = vld [vmem:[%s19125_s24 + $0x60] sm:$0xff]  ;;  %v681_v21 = vld [vmem:[%s19125_s24 + $0x50] sm:$0xff]  ;;  %s19131_s30 = smov %s19130_s27 }
  0x27   : > { %15710 = vmatpush3.bf16.msra.mxu1 %v15709_v8  ;;  %15705 = vmatprep.subr.bf16.mxu0 %v16434_v3  ;;  %s19105_s1 = sshll.u32 %s16628_s26, 3  ;;  %v684_v17 = vld [vmem:[%s19125_s24 + $0x68] sm:$0xff]  ;;  %v15715_v19 = vpack.c.bf16 %v680_v15, %v679_v14  ;;  %v682_v22 = vld [vmem:[%s19125_s24 + $0x58] sm:$0xff]  ;;  %v685_v23 = vld [vmem:[%s19125_s24 + $0x70] sm:$0xff] }
  0x28   : > { %15711 = vmatprep.subr.bf16.mxu1 %v16434_v3  ;;  %s664_s29 = scalar_lea.vmem %s19126_s2, %s19105_s1  ;;  %v15721_v20 = vpack.c.bf16 %v684_v17, %v683_v16  ;;  %v686_v24 = vld [vmem:[%s19125_s24 + $0x78] sm:$0xff]  ;;  %v15718_v25 = vpack.c.bf16 %v682_v22, %v681_v21  ;;  %v687_v27 = vld [vmem:[%s19125_s24 + $0x80] sm:$0xff]  ;;  %v688_v28 = vld [vmem:[%s19125_s24 + $0x88] sm:$0xff]  ;;  %s13851_s2 = sshll.u32 %s16569_s3, 7 }
  0x29   : > { %v16650_v18 = vld [vmem:[%s664_s29] sm:$0xff]  ;;  %v15724_v26 = vpack.c.bf16 %v686_v24, %v685_v23  ;;  %v692_v30 = vld [vmem:[%s19125_s24 + $0xa8] sm:$0xff]  ;;  %v15727_v31 = vpack.c.bf16 %v688_v28, %v687_v27  ;;  %v689_v33 = vld [vmem:[%s19125_s24 + $0x90] sm:$0xff]  ;;  %s19134_s29 = sshll.u32 %s16628_s26, 3  ;;  %s19139_s1 = sld [smem:[#allocation21_spill]] }
  0x2a   : > { %15707 = vmatpush3.bf16.msra.mxu0 %v15706_v12  ;;  %v691_v29 = vld [vmem:[%s19125_s24 + $0xa0] sm:$0xff]  ;;  %v690_v34 = vld [vmem:[%s19125_s24 + $0x98] sm:$0xff]  ;;  %v693_v35 = vld [vmem:[%s19125_s24 + $0xb0] sm:$0xff]  ;;  %s668_s28 = scalar_lea.vmem %s19135_s22, %s19134_s29  ;;  %s658_s22 = sand.u32 1, %s16424_s25  }
  0x2b   : > { %15713 = vmatpush3.bf16.msra.mxu1 %v15712_v13  ;;  %15714 = vmatprep.subr.bf16.mxu0 %v16434_v3  ;;  %v15733_v32 = vpack.c.bf16 %v692_v30, %v691_v29  ;;  %v694_v36 = vld [vmem:[%s19125_s24 + $0xb8] sm:$0xff]  ;;  %v15730_v37 = vpack.c.bf16 %v690_v34, %v689_v33  ;;  %v695_v39 = vld [vmem:[%s19125_s24 + $0xc0] sm:$0xff]  ;;  %v696_v40 = vld [vmem:[%s19125_s24 + $0xc8] sm:$0xff]  ;;  %s16437_s3 = smov [#allocation2]  }
  0x2c   : > { %15720 = vmatprep.subr.bf16.mxu1 %v16434_v3  ;;  %v15736_v38 = vpack.c.bf16 %v694_v36, %v693_v35  ;;  %v699_v41 = vld [vmem:[%s19125_s24 + $0xe0] sm:$0xff]  ;;  %v700_v42 = vld [vmem:[%s19125_s24 + $0xe8] sm:$0xff]  ;;  %v15739_v43 = vpack.c.bf16 %v696_v40, %v695_v39  ;;  %v697_v45 = vld [vmem:[%s19125_s24 + $0xd0] sm:$0xff] }
  0x2d   : > { %14428 = vmatmul.mubr.msk.f32.vlgmr.msra.gmra.mrb[0].mxu0 %vm759_vm1, %v16650_v18  ;;  %v15745_v44 = vpack.c.bf16 %v700_v42, %v699_v41  ;;  %v698_v46 = vld [vmem:[%s19125_s24 + $0xd8] sm:$0xff]  ;;  %v701_v47 = vld [vmem:[%s19125_s24 + $0xf0] sm:$0xff]  ;;  %v703_v51 = vld [vmem:[%s19125_s24 + $0x100] sm:$0xff] }
  0x2e   : > { %14439 = vmatmul.mubr.msk.f32.vlgmr.msra.gmra.mrb[0].mxu1 %vm759_vm1, %v16650_v18  ;;  %15716 = vmatpush3.bf16.msra.mxu0 %v15715_v19  ;;  %v702_v48 = vld [vmem:[%s19125_s24 + $0xf8] sm:$0xff]  ;;  %v15742_v49 = vpack.c.bf16 %v698_v46, %v697_v45  ;;  %v704_v52 = vld [vmem:[%s19125_s24 + $0x108] sm:$0xff]  ;;  %v707_v53 = vld [vmem:[%s19125_s24 + $0x120] sm:$0xff] }
  0x2f   : > { %15722 = vmatpush3.bf16.msra.mxu1 %v15721_v20  ;;  %15717 = vmatprep.subr.bf16.mxu0 %v16434_v3  ;;  %v15748_v50 = vpack.c.bf16 %v702_v48, %v701_v47  ;;  %v708_v54 = vld [vmem:[%s19125_s24 + $0x128] sm:$0xff]  ;;  %v15751_v55 = vpack.c.bf16 %v704_v52, %v703_v51  ;;  %v705_v57 = vld [vmem:[%s19125_s24 + $0x110] sm:$0xff]  ;;  %v706_v58 = vld [vmem:[%s19125_s24 + $0x118] sm:$0xff] }
  0x30   : > { %15723 = vmatprep.subr.bf16.mxu1 %v16434_v3  ;;  %14449 = vmatprep.mubr.msk.f32.mxu0 %vm16435_vm0, %v16436_v11  ;;  %v15757_v56 = vpack.c.bf16 %v708_v54, %v707_v53  ;;  %v709_v59 = vld [vmem:[%s19125_s24 + $0x130] sm:$0xff]  ;;  %v15754_v60 = vpack.c.bf16 %v706_v58, %v705_v57  ;;  %v710_v61 = vld [vmem:[%s19125_s24 + $0x138] sm:$0xff]  ;;  %v711_v63 = vld [vmem:[%s19125_s24 + $0x140] sm:$0xff] }
  0x31   : > { %14460 = vmatprep.mubr.msk.f32.mxu1 %vm16435_vm0, %v16436_v11  ;;  %v15760_v62 = vpack.c.bf16 %v710_v61, %v709_v59  ;;  %v712_v0 = vld [vmem:[%s19125_s24 + $0x148] sm:$0xff]  ;;  %v715_v1 = vld [vmem:[%s19125_s24 + $0x160] sm:$0xff]  ;;  %v713_v6 = vld [vmem:[%s19125_s24 + $0x150] sm:$0xff] }
  0x32   : > { %15719 = vmatpush3.bf16.msra.mxu0 %v15718_v25  ;;  %v15763_v2 = vpack.c.bf16 %v712_v0, %v711_v63  ;;  %v716_v4 = vld [vmem:[%s19125_s24 + $0x168] sm:$0xff]  ;;  %v714_v7 = vld [vmem:[%s19125_s24 + $0x158] sm:$0xff]  ;;  %v717_v8 = vld [vmem:[%s19125_s24 + $0x170] sm:$0xff] }
  0x33   : > { %15725 = vmatpush3.bf16.msra.mxu1 %v15724_v26  ;;  %15726 = vmatprep.subr.bf16.mxu0 %v16434_v3  ;;  %v15769_v5 = vpack.c.bf16 %v716_v4, %v715_v1  ;;  %v15766_v9 = vpack.c.bf16 %v714_v7, %v713_v6  ;;  %v718_v10 = vld [vmem:[%s19125_s24 + $0x178] sm:$0xff]  ;;  %v13381_v22 = vld [vmem:[%s19127_s21 + $0x4] ss:$0 sm:$0xff]  ;;  %v13382_v23 = vld [vmem:[%s19127_s21 + $0x5] ss:$0 sm:$0xff] }
  0x34   : > { %15732 = vmatprep.subr.bf16.mxu1 %v16434_v3  ;;  %v15772_v12 = vpack.c.bf16 %v718_v10, %v717_v8  ;;  %v13373_v25 = vld [vmem:[%s19127_s21] ss:$0 sm:$0xff]  ;;  %v13374_v29 = vld [vmem:[%s19127_s21 + $0x1] ss:$0 sm:$0xff]  ;;  %v13383_v34 = vld [vmem:[%s19127_s21 + $0x6] ss:$0 sm:$0xff] }
  0x35   : > { %14450 = vmatmul.mubr.msk.f32.vlgmr.msra.gmra.mrb[2].mxu0 %vm759_vm1, %v16650_v18  ;;  %v13384_v35 = vld [vmem:[%s19127_s21 + $0x7] ss:$0 sm:$0xff]  ;;  %v13376_v41 = vld [vmem:[%s19127_s21 + $0x3] ss:$0 sm:$0xff]  ;;  %v13389_v46 = vld [vmem:[%s19127_s21 + $0x8] ss:$0 sm:$0xff] }
  0x36   : > { %14461 = vmatmul.mubr.msk.f32.vlgmr.msra.gmra.mrb[2].mxu1 %vm759_vm1, %v16650_v18  ;;  %15728 = vmatpush3.bf16.msra.mxu0 %v15727_v31  ;;  %v13390_v47 = vld [vmem:[%s19127_s21 + $0x9] ss:$0 sm:$0xff] }
  0x37   : > { %15734 = vmatpush3.bf16.msra.mxu1 %v15733_v32  ;;  %15729 = vmatprep.subr.bf16.mxu0 %v16434_v3 }
  0x38   : > { %15735 = vmatprep.subr.bf16.mxu1 %v16434_v3  ;;  %14471 = vmatprep.mubr.msk.f32.mxu0 %vm16435_vm0, %v16436_v11 }
  0x39   : > { %14482 = vmatprep.mubr.msk.f32.mxu1 %vm16435_vm0, %v16436_v11 }
  0x3a   : > { %15731 = vmatpush3.bf16.msra.mxu0 %v15730_v37  ;;  %v13375_v37 = vld [vmem:[%s19127_s21 + $0x2] ss:$0 sm:$0xff] }
  0x3b   : > { %15737 = vmatpush3.bf16.msra.mxu1 %v15736_v38  ;;  %15738 = vmatprep.subr.bf16.mxu0 %v16434_v3 }
  0x3c   : > { %15744 = vmatprep.subr.bf16.mxu1 %v16434_v3 }
  0x3d   : > { %14472 = vmatmul.mubr.msk.f32.vlgmr.msra.gmra.mrb[4].mxu0 %vm759_vm1, %v16650_v18 }
  0x3e   : > { %14483 = vmatmul.mubr.msk.f32.vlgmr.msra.gmra.mrb[4].mxu1 %vm759_vm1, %v16650_v18  ;;  %15740 = vmatpush3.bf16.msra.mxu0 %v15739_v43 }
  0x3f   : > { %15746 = vmatpush3.bf16.msra.mxu1 %v15745_v44  ;;  %15741 = vmatprep.subr.bf16.mxu0 %v16434_v3 }
  0x40   : > { %15747 = vmatprep.subr.bf16.mxu1 %v16434_v3  ;;  %14493 = vmatprep.mubr.msk.f32.mxu0 %vm16435_vm0, %v16436_v11 }
  0x41   : > { %14504 = vmatprep.mubr.msk.f32.mxu1 %vm16435_vm0, %v16436_v11 }
  0x42   : > { %15743 = vmatpush3.bf16.msra.mxu0 %v15742_v49 }
  0x43   : > { %15749 = vmatpush3.bf16.msra.mxu1 %v15748_v50  ;;  %15750 = vmatprep.subr.bf16.mxu0 %v16434_v3 }
  0x44   : > { %15756 = vmatprep.subr.bf16.mxu1 %v16434_v3 }
  0x45   : > { %14494 = vmatmul.mubr.msk.f32.vlgmr.msra.gmra.mrb[6].mxu0 %vm759_vm1, %v16650_v18 }
  0x46   : > { %14505 = vmatmul.mubr.msk.f32.vlgmr.msra.gmra.mrb[6].mxu1 %vm759_vm1, %v16650_v18  ;;  %15752 = vmatpush3.bf16.msra.mxu0 %v15751_v55 }
  0x47   : > { %15758 = vmatpush3.bf16.msra.mxu1 %v15757_v56  ;;  %15753 = vmatprep.subr.bf16.mxu0 %v16434_v3 }
  0x48   : > { %15759 = vmatprep.subr.bf16.mxu1 %v16434_v3  ;;  %14515 = vmatprep.mubr.msk.f32.mxu0 %vm16435_vm0, %v16436_v11 }
  0x49   : > { %14526 = vmatprep.mubr.msk.f32.mxu1 %vm16435_vm0, %v16436_v11 }
  0x4a   : > { %15755 = vmatpush3.bf16.msra.mxu0 %v15754_v60 }
  0x4b   : > { %15761 = vmatpush3.bf16.msra.mxu1 %v15760_v62  ;;  %15762 = vmatprep.subr.bf16.mxu0 %v16434_v3 }
  0x4c   : > { %15768 = vmatprep.subr.bf16.mxu1 %v16434_v3 }
  0x4d   : > { %14516 = vmatmul.mubr.msk.f32.vlgmr.msra.gmra.mrb[8].mxu0 %vm759_vm1, %v16650_v18 }
  0x4e   : > { %14527 = vmatmul.mubr.msk.f32.vlgmr.msra.gmra.mrb[8].mxu1 %vm759_vm1, %v16650_v18  ;;  %15764 = vmatpush3.bf16.msra.mxu0 %v15763_v2 }
  0x4f   : > { %15770 = vmatpush3.bf16.msra.mxu1 %v15769_v5  ;;  %15765 = vmatprep.subr.bf16.mxu0 %v16434_v3 }
  0x50   : > { %15771 = vmatprep.subr.bf16.mxu1 %v16434_v3  ;;  %14537 = vmatprep.mubr.msk.f32.mxu0 %vm16435_vm0, %v16436_v11 }
  0x51   : > { %14548 = vmatprep.mubr.msk.f32.mxu1 %vm16435_vm0, %v16436_v11 }
  0x52   : > { %15767 = vmatpush3.bf16.msra.mxu0 %v15766_v9 }
  0x53   : > { %15773 = vmatpush3.bf16.msra.mxu1 %v15772_v12  ;;  %14551 = vmatprep.subr.mxu0 %v16436_v11 }
  0x54   : > { %14556 = vmatprep.subr.mxu1 %v16436_v11 }
  0x55   : > { %14538 = vmatmul.mubr.msk.f32.vlgmr.msra.gmra.mrb[10].mxu0 %vm759_vm1, %v16650_v18 }
  0x56   : > { %14549 = vmatmul.mubr.msk.f32.vlgmr.msra.gmra.mrb[10].mxu1 %vm759_vm1, %v16650_v18  ;;  %14553 = vmatprep.mubr.msk.f32.mxu0 %vm16435_vm0, %v16436_v11 }
  0x57   : > { %14558 = vmatprep.mubr.msk.f32.mxu1 %vm16435_vm0, %v16436_v11 }
 0x100   : > { %v829_v13 = vpop.f32.mrb[0].mxu0 }
 0x101   : > { %v14429_v14 = vpop.f32.mrb[1].mxu0  ;;  %v899_v15 = vpop.f32.mrb[0].mxu1  ;;  %v830_v32 = vadd.f32 %v13373_v25, %v829_v13 }
 0x102   : > { %v14440_v16 = vpop.f32.mrb[1].mxu1  ;;  %v900_v33 = vadd.f32 %v13374_v29, %v899_v15 }
 0x108   : > { %v969_v17 = vpop.f32.mrb[2].mxu0 }
 0x109   : > { %v14451_v19 = vpop.f32.mrb[3].mxu0  ;;  %v1039_v20 = vpop.f32.mrb[2].mxu1  ;;  %v970_v44 = vadd.f32 %v13375_v37, %v969_v17 }
 0x10a   : > { %v14462_v21 = vpop.f32.mrb[3].mxu1  ;;  %v1040_v45 = vadd.f32 %v13376_v41, %v1039_v20  ;;  %v13392_v41 = vld [vmem:[%s19127_s21 + $0xb] ss:$0 sm:$0xff] }
 0x110   : > { %v1133_v24 = vpop.f32.mrb[4].mxu0 }
 0x111   : > { %v1134_v26 = vadd.f32 %v13381_v22, %v1133_v24  ;;  %v1203_v27 = vpop.f32.mrb[4].mxu1  ;;  %v14473_v28 = vpop.f32.mrb[5].mxu0 }
 0x112   : > { %v1204_v30 = vadd.f32 %v13382_v23, %v1203_v27  ;;  %v14484_v31 = vpop.f32.mrb[5].mxu1 }
 0x113   : > { %14552 = vmatpush3.xpose.msk.msra.mxu0 %vm1651_vm2, %v1134_v26 }
 0x114   : > { %14557 = vmatpush3.xpose.msk.msra.mxu1 %vm1651_vm2, %v1204_v30  ;;  %14561 = vmatprep.subr.mxu0 %v16436_v11 }
 0x115   : > { %14566 = vmatprep.subr.mxu1 %v16436_v11 }
 0x116   : > { %14554 = vmatmul.mubr.msk.f32.vlgmr.msra.gmra.mrb[12].mxu0 %vm1651_vm2, %v830_v32 }
 0x117   : > { %14559 = vmatmul.mubr.msk.f32.vlgmr.msra.gmra.mrb[12].mxu1 %vm1651_vm2, %v900_v33  ;;  %14563 = vmatprep.mubr.msk.f32.mxu0 %vm16435_vm0, %v16436_v11 }
 0x118   : > { %v1273_v36 = vpop.f32.mrb[6].mxu0  ;;  %14568 = vmatprep.mubr.msk.f32.mxu1 %vm16435_vm0, %v16436_v11 }
 0x119   : > { %v1274_v38 = vadd.f32 %v13383_v34, %v1273_v36  ;;  %v1343_v39 = vpop.f32.mrb[6].mxu1  ;;  %v14495_v40 = vpop.f32.mrb[7].mxu0  ;;  %v13391_v36 = vld [vmem:[%s19127_s21 + $0xa] ss:$0 sm:$0xff] }
 0x11a   : > { %v1344_v42 = vadd.f32 %v13384_v35, %v1343_v39  ;;  %v14506_v43 = vpop.f32.mrb[7].mxu1 }
 0x11b   : > { %14562 = vmatpush3.xpose.msk.msra.mxu0 %vm1651_vm2, %v1274_v38 }
 0x11c   : > { %14567 = vmatpush3.xpose.msk.msra.mxu1 %vm1651_vm2, %v1344_v42  ;;  %14571 = vmatprep.subr.mxu0 %v16436_v11 }
 0x11d   : > { %14576 = vmatprep.subr.mxu1 %v16436_v11 }
 0x11e   : > { %14564 = vmatmul.mubr.msk.f32.vlgmr.msra.gmra.mrb[14].mxu0 %vm1651_vm2, %v970_v44 }
 0x11f   : > { %14569 = vmatmul.mubr.msk.f32.vlgmr.msra.gmra.mrb[14].mxu1 %vm1651_vm2, %v1040_v45  ;;  %14573 = vmatprep.mubr.msk.f32.mxu0 %vm16435_vm0, %v16436_v11 }
 0x120   : > { %14578 = vmatprep.mubr.msk.f32.mxu1 %vm16435_vm0, %v16436_v11  ;;  %v1437_v48 = vpop.f32.mrb[8].mxu0 }
 0x121   : > { %v1438_v49 = vadd.f32 %v13389_v46, %v1437_v48  ;;  %v14517_v50 = vpop.f32.mrb[9].mxu0  ;;  %v1507_v51 = vpop.f32.mrb[8].mxu1 }
 0x122   : > { %v1508_v52 = vadd.f32 %v13390_v47, %v1507_v51  ;;  %v14528_v53 = vpop.f32.mrb[9].mxu1  ;;  %v732_v50 = vld [vmem:[%s19128_s23 + $0x8] sm:$0xff]  ;;  %v733_v51 = vld [vmem:[%s19128_s23 + $0x10] sm:$0xff] }
 0x123   : > { %14572 = vmatpush3.msra.mxu0 %v1438_v49  ;;  %v731_v49 = vld [vmem:[%s19128_s23] sm:$0xff] }
 0x124   : > { %14577 = vmatpush3.msra.mxu1 %v1508_v52  ;;  %14581 = vmatprep.subr.mxu0 %v16436_v11 }
 0x125   : > { %14586 = vmatprep.subr.mxu1 %v16436_v11 }
 0x128   : > { %v1577_v54 = vpop.f32.mrb[10].mxu0 }
 0x129   : > { %v16882_v55 = vpop.f32.mrb[10].mxu1  ;;  %v14539_v56 = vpop.f32.mrb[11].mxu0  ;;  %v1578_v40 = vadd.f32 %v13391_v36, %v1577_v54  ;;  %v734_v54 = vld [vmem:[%s19128_s23 + $0x18] sm:$0xff] }
 0x12a   : > { %v14550_v57 = vpop.f32.mrb[11].mxu1  ;;  %v1648_v44 = vadd.f32 %v13392_v41, %v16882_v55 }
 0x1e9   : > { %v1724_v58 = vpop.f32.mrb[12].mxu0 }
 0x1ea   : > { %v1956_v59 = vmul.f32 0.35355338, %v1724_v58  ;;  %v1800_v60 = vpop.f32.mrb[12].mxu1  ;;  %v14555_v61 = vpop.f32.mrb[13].mxu0 }
 0x1eb   : > { %v14560_v62 = vpop.f32.mrb[13].mxu1  ;;  %v1957_v63 = vmul.f32 0.35355338, %v1800_v60 }
 0x1ec   : > { %v1960_v0 = vsel %vm1651_vm2, %v1956_v59, -inf  ;;  %v2595_v62 = vlaneseq }
 0x1ed   : > { %1961 = vmax.xlane.f32.xlu0 %v1960_v0  ;;  %v1963_v1 = vsel %vm1651_vm2, %v1957_v63, -inf }
 0x1f1   : > { %1964 = vmax.xlane.f32.xlu0 %v1963_v1  ;;  %v1876_v2 = vpop.f32.mrb[14].mxu0  ;;  %v16942_v1 = vshrl.u32 %v2595_v62, 7 }
 0x1f2   : > { %v1952_v4 = vpop.f32.mrb[14].mxu1  ;;  %v1958_v5 = vmul.f32 0.35355338, %v1876_v2  ;;  %v14565_v6 = vpop.f32.mrb[15].mxu0 }
 0x1f3   : > { %v14570_v7 = vpop.f32.mrb[15].mxu1  ;;  %v1959_v8 = vmul.f32 0.35355338, %v1952_v4 }
 0x1f4   : > { %v1966_v9 = vsel %vm1651_vm2, %v1958_v5, -inf }
 0x1f5   : > { %1967 = vmax.xlane.f32.xlu1 %v1966_v9  ;;  %v1969_v10 = vsel %vm1651_vm2, %v1959_v8, -inf }
 0x1f9   : > { %1970 = vmax.xlane.f32.xlu1 %v1969_v10 }
 0x27a   : > { %v1962_v12 = vpop.xlane.xlu0 %1961 }
 0x27b   : > { %v1972_v13 = vsub.f32 %v1956_v59, %v1962_v12  ;;  %v16953_v12 = vld [vmem:[%s19129_s7] sm:$0x3f] }
 0x27d   : > { %v1976_v14 = vmul.f32 1.442695, %v1972_v13 }
 0x27e   : > { %v1965_v15 = vpop.xlane.xlu0 %1964 }
 0x27f   : > { %16254 = vpow2.f32 %v1976_v14  ;;  %v1973_v16 = vsub.f32 %v1957_v63, %v1965_v15 }
 0x281   : > { %v1978_v17 = vmul.f32 1.442695, %v1973_v16 }
 0x282   : > { %v1968_v19 = vpop.xlane.xlu1 %1967 }
 0x283   : > { %16256 = vpow2.f32 %v1978_v17  ;;  %v1974_v20 = vsub.f32 %v1958_v5, %v1968_v19 }
 0x285   : > { %v1980_v21 = vmul.f32 1.442695, %v1974_v20 }
 0x286   : > { %v1971_v22 = vpop.xlane.xlu1 %1970 }
 0x287   : > { %16258 = vpow2.f32 %v1980_v21  ;;  %v1975_v23 = vsub.f32 %v1959_v8, %v1971_v22  ;;  %v16947_v8 = vsub.s32 0, %v16942_v1 }
 0x289   : > { %v16255_v24 = vpop.eup %16254  ;;  %v1982_v25 = vmul.f32 1.442695, %v1975_v23  ;;  %v2598_v15 = vrot.slane %v16953_v12, %v16947_v8 }
 0x28a   : > { %v1984_v26 = vsel %vm1651_vm2, %v16255_v24, 0.0 }
 0x28b   : > { %16260 = vpow2.f32 %v1982_v25  ;;  %1985 = vadd.xlane.f32.xlu0 %v1984_v26 }
 0x28d   : > { %v16257_v27 = vpop.eup %16256 }
 0x28e   : > { %v1987_v28 = vsel %vm1651_vm2, %v16257_v27, 0.0 }
 0x28f   : > { %1988 = vadd.xlane.f32.xlu1 %v1987_v28  ;;  %v2625_v28 = vld [vmem:[%s19130_s27] sm:$0xff] }
 0x291   : > { %v16259_v29 = vpop.eup %16258 }
 0x292   : > { %v1990_v30 = vsel %vm1651_vm2, %v16259_v29, 0.0 }
 0x293   : > { %1991 = vadd.xlane.f32.xlu0 %v1990_v30 }
 0x295   : > { %v16261_v31 = vpop.eup %16260 }
 0x296   : > { %v1993_v32 = vsel %vm1651_vm2, %v16261_v31, 0.0 }
 0x297   : > { %1994 = vadd.xlane.f32.xlu1 %v1993_v32 }
 0x318   : > { %v1986_v33 = vpop.xlane.xlu0 %1985 }
 0x319   : > { %16262 = vrcp.f32 %v1986_v33  ;;  %v2630_v33 = vld [vmem:[%s19132_s6] sm:$0xff] }
 0x31c   : > { %v1989_v34 = vpop.xlane.xlu1 %1988 }
 0x31d   : > { %16264 = vrcp.f32 %v1989_v34  ;;  %v2631_v34 = vld [vmem:[%s19132_s6 + $0x8] sm:$0xff] }
 0x31e   : > { %v15781_v36 = vpack.c.bf16 %v2631_v34, %v2630_v33  ;;  %v13421_v34 = vld [vmem:[%s19125_s24 + $0x1a0] sm:$0xff] }
 0x320   : > { %v1992_v35 = vpop.xlane.xlu0 %1991 }
 0x321   : > { %16266 = vrcp.f32 %v1992_v35  ;;  %v2632_v35 = vld [vmem:[%s19132_s6 + $0x10] sm:$0xff] }
 0x323   : > { %v16263_v37 = vpop.eup %16262 }
 0x324   : > { %v1997_v38 = vmul.f32 %v16263_v37, %v16255_v24  ;;  %v1995_v39 = vpop.xlane.xlu1 %1994  ;;  %v2633_v37 = vld [vmem:[%s19132_s6 + $0x18] sm:$0xff] }
 0x325   : > { %16268 = vrcp.f32 %v1995_v39  ;;  %v2634_v39 = vld [vmem:[%s19132_s6 + $0x20] sm:$0xff] }
 0x326   : > { %14574 = vmatmul.mubr.msk.f32.vlgmr.msra.gmra.mrb[16].mxu0 %vm1651_vm2, %v1997_v38  ;;  %v15784_v38 = vpack.c.bf16 %v2633_v37, %v2632_v35  ;;  %v13422_v37 = vld [vmem:[%s19125_s24 + $0x1a8] sm:$0xff] }
 0x327   : > { %v16265_v42 = vpop.eup %16264  ;;  %14582 = vmatpush3.msra.mxu0 %v1578_v40  ;;  %14583 = vmatprep.mubr.msk.f32.mxu0 %vm16435_vm0, %v16436_v11  ;;  %v2635_v40 = vld [vmem:[%s19132_s6 + $0x28] sm:$0xff] }
 0x328   : > { %v1999_v43 = vmul.f32 %v16265_v42, %v16257_v27  ;;  %14591 = vmatprep.subr.mxu0 %v16436_v11  ;;  %v15787_v41 = vpack.c.bf16 %v2635_v40, %v2634_v39  ;;  %v13434_v39 = vld [vmem:[%s19125_s24 + $0x208] sm:$0xff] }
 0x32a   : > { %14579 = vmatmul.mubr.msk.f32.vlgmr.msra.gmra.mrb[16].mxu1 %vm1651_vm2, %v1999_v43 }
 0x32b   : > { %v16267_v45 = vpop.eup %16266  ;;  %14587 = vmatpush3.msra.mxu1 %v1648_v44  ;;  %14588 = vmatprep.mubr.msk.f32.mxu1 %vm16435_vm0, %v16436_v11 }
 0x32c   : > { %v2001_v46 = vmul.f32 %v16267_v45, %v16259_v29  ;;  %14596 = vmatprep.subr.mxu1 %v16436_v11  ;;  %v2626_v29 = vld [vmem:[%s19131_s30 + $0x8] sm:$0xff]  ;;  %v16997_v45 = vsub.s32 1, %v16942_v1 }
 0x32d   : > { %v15775_v30 = vpack.c.bf16 %v2626_v29, %v2625_v28 }
 0x32e   : > { %14584 = vmatmul.mubr.msk.f32.vlgmr.msra.gmra.mrb[18].mxu0 %vm1651_vm2, %v2001_v46  ;;  %v17000_v46 = vsub.s32 2, %v16942_v1 }
 0x32f   : > { %v16269_v47 = vpop.eup %16268  ;;  %14593 = vmatprep.mubr.msk.f32.mxu0 %vm16435_vm0, %v16436_v11  ;;  %14592 = vmatpush3.msra.mxu0 %v731_v49 }
 0x330   : > { %v2003_v48 = vmul.f32 %v16269_v47, %v16261_v31  ;;  %14601 = vmatprep.subr.mxu0 %v16436_v11  ;;  %v2628_v31 = vld [vmem:[%s19131_s30 + $0x18] sm:$0xff]  ;;  %v2618_v47 = vrot.slane %v16953_v12, %v16997_v45 }
 0x332   : > { %14589 = vmatmul.mubr.msk.f32.vlgmr.msra.gmra.mrb[18].mxu1 %vm1651_vm2, %v2003_v48 }
 0x333   : > { %14598 = vmatprep.mubr.msk.f32.mxu1 %vm16435_vm0, %v16436_v11  ;;  %14597 = vmatpush3.msra.mxu1 %v732_v50  ;;  %v2623_v50 = vrot.slane %v16953_v12, %v17000_v46 }
 0x334   : > { %14606 = vmatprep.subr.mxu1 %v16436_v11 }
 0x3f9   : > { %v2073_v52 = vpop.f32.mrb[16].mxu0 }
 0x3fa   : > { %v14575_v53 = vpop.f32.mrb[17].mxu0  ;;  %14594 = vmatmul.mubr.msk.f32.vlgmr.msra.gmra.mrb[20].mxu0 %vm1651_vm2, %v2073_v52 }
 0x3fb   : > { %14602 = vmatpush3.msra.mxu0 %v733_v51  ;;  %14603 = vmatprep.mubr.msk.f32.mxu0 %vm16435_vm0, %v16436_v11  ;;  %v2636_v53 = vld [vmem:[%s19132_s6 + $0x30] sm:$0xff] }
 0x3fc   : > { %15774 = vmatprep.subr.bf16.mxu0 %v16434_v3 }
 0x3fd   : > { %v2146_v55 = vpop.f32.mrb[16].mxu1 }
 0x3fe   : > { %v14580_v56 = vpop.f32.mrb[17].mxu1  ;;  %14599 = vmatmul.mubr.msk.f32.vlgmr.msra.gmra.mrb[20].mxu1 %vm1651_vm2, %v2146_v55 }
 0x3ff   : > { %14607 = vmatpush3.msra.mxu1 %v734_v54  ;;  %14608 = vmatprep.mubr.msk.f32.mxu1 %vm16435_vm0, %v16436_v11  ;;  %v2637_v54 = vld [vmem:[%s19132_s6 + $0x38] sm:$0xff]  ;;  %v13413_v56 = vld [vmem:[%s19133_s8] ss:$0 sm:$0xff] }
 0x400   : > { %15780 = vmatprep.subr.bf16.mxu1 %v16434_v3  ;;  %v15790_v55 = vpack.c.bf16 %v2637_v54, %v2636_v53  ;;  %v13441_v53 = vld [vmem:[%s19125_s24 + $0x240] sm:$0xff]  ;;  %v13442_v54 = vld [vmem:[%s19125_s24 + $0x248] sm:$0xff] }
 0x401   : > { %v2219_v57 = vpop.f32.mrb[18].mxu0 }
 0x402   : > { %v14585_v58 = vpop.f32.mrb[19].mxu0  ;;  %14604 = vmatmul.mubr.msk.f32.vlgmr.msra.gmra.mrb[22].mxu0 %vm1651_vm2, %v2219_v57 }
 0x403   : > { %14619 = vmatprep.mubr.msk.f32.mxu0 %vm16435_vm0, %v16436_v11  ;;  %15776 = vmatpush3.bf16.msra.mxu0 %v15775_v30 }
 0x404   : > { %15777 = vmatprep.subr.bf16.mxu0 %v16434_v3 }
 0x405   : > { %v2292_v59 = vpop.f32.mrb[18].mxu1 }
 0x406   : > { %v14590_v60 = vpop.f32.mrb[19].mxu1  ;;  %14609 = vmatmul.mubr.msk.f32.vlgmr.msra.gmra.mrb[22].mxu1 %vm1651_vm2, %v2292_v59 }
 0x407   : > { %14638 = vmatprep.mubr.msk.f32.mxu1 %vm16435_vm0, %v16436_v11  ;;  %15782 = vmatpush3.bf16.msra.mxu1 %v15781_v36 }
 0x408   : > { %15783 = vmatprep.subr.bf16.mxu1 %v16434_v3 }
 0x40b   : > { %15785 = vmatpush3.bf16.msra.mxu1 %v15784_v38  ;;  %v13433_v38 = vld [vmem:[%s19125_s24 + $0x200] sm:$0xff] }
 0x40c   : > { %15786 = vmatprep.subr.bf16.mxu1 %v16434_v3 }
 0x40f   : > { %15788 = vmatpush3.bf16.msra.mxu1 %v15787_v41  ;;  %v15799_v41 = vpack.c.bf16 %v13422_v37, %v13421_v34 }
 0x410   : > { %15789 = vmatprep.subr.bf16.mxu1 %v16434_v3 }
 0x413   : > { %15791 = vmatpush3.bf16.msra.mxu1 %v15790_v55 }
 0x414   : > { %15804 = vmatprep.subr.bf16.mxu1 %v16434_v3 }
 0x4cd   : > { %v2365_v61 = vpop.f32.mrb[20].mxu0 }
 0x4ce   : > { %v14595_v63 = vpop.f32.mrb[21].mxu0  ;;  %v2588_v2 = vsel %vm759_vm1, %v2365_v61, 0.0  ;;  %v17023_v61 = vsub.s32 3, %v16942_v1 }
 0x4d0   : > { %v2721_v63 = vrot.slane %v16953_v12, %v17023_v61 }
 0x4d1   : > { %v2438_v0 = vpop.f32.mrb[20].mxu1 }
 0x4d2   : > { %v2589_v4 = vsel %vm759_vm1, %v2438_v0, 0.0  ;;  %v14600_v5 = vpop.f32.mrb[21].mxu1 }
 0x4d3   : > { %v2590_v6 = vadd.f32 %v2589_v4, %v2588_v2 }
 0x4d5   : > { %v2511_v7 = vpop.f32.mrb[22].mxu0 }
 0x4d6   : > { %v2591_v9 = vsel %vm759_vm1, %v2511_v7, 0.0  ;;  %v14605_v10 = vpop.f32.mrb[23].mxu0 }
 0x4d7   : > { %v2592_v13 = vadd.f32 %v2591_v9, %v2590_v6 }
 0x4d9   : > { %v2584_v14 = vpop.f32.mrb[22].mxu1 }
 0x4da   : > { %v2593_v16 = vsel %vm759_vm1, %v2584_v14, 0.0  ;;  %v14610_v17 = vpop.f32.mrb[23].mxu1 }
 0x4db   : > { %v2594_v19 = vadd.f32 %v2593_v16, %v2592_v13  ;;  %v13418_v16 = vld [vmem:[%s19125_s24 + $0x188] sm:$0xff]  ;;  %v13425_v17 = vld [vmem:[%s19125_s24 + $0x1c0] sm:$0xff] }
 0x4dd   : > { %v2599_v20 = vadd.f32 %v2598_v15, %v2594_v19  ;;  %v13417_v15 = vld [vmem:[%s19125_s24 + $0x180] sm:$0xff] }
 0x4de   : > { %v15793_v19 = vpack.c.bf16 %v13418_v16, %v13417_v15  ;;  %v13452_v15 = vld [vmem:[%s19125_s24 + $0x298] sm:$0xff] }
 0x4df   : > { %v2600_v21 = vadd.f32 %v2599_v20, %v16650_v18  ;;  %v2627_v18 = vld [vmem:[%s19131_s30 + $0x10] sm:$0xff]  ;;  %v13426_v20 = vld [vmem:[%s19125_s24 + $0x1c8] sm:$0xff] }
 0x4e0   : > { %v15778_v32 = vpack.c.bf16 %v2628_v31, %v2627_v18  ;;  %v17058_v18 = vsub.s32 4, %v16942_v1  ;;  %v17061_v31 = vsub.s32 5, %v16942_v1 }
 0x4e1   : > { %v2601_v22 = vsel %vm759_vm1, %v2600_v21, 0.0 }
 0x4e2   : > { %2602 = vadd.xlane.f32.xlu0 %v2601_v22  ;;  %15779 = vmatpush3.bf16.msra.mxu0 %v15778_v32  ;;  %v13419_v22 = vld [vmem:[%s19125_s24 + $0x190] sm:$0xff]  ;;  %v2813_v32 = vrot.slane %v16953_v12, %v17058_v18  ;;  %v2818_v35 = vrot.slane %v16953_v12, %v17061_v31 }
 0x4e3   : > { %15792 = vmatprep.subr.bf16.mxu0 %v16434_v3  ;;  %v13423_v12 = vld [vmem:[%s19125_s24 + $0x1b0] sm:$0xff] }
 0x56f   : > { %v2603_v23 = vpop.xlane.xlu0 %2602 }
 0x570   : > { %v2605_v24 = vmul.f32 0.03125, %v2603_v23  ;;  %v13420_v23 = vld [vmem:[%s19125_s24 + $0x198] sm:$0xff] }
 0x572   : > { %v2606_v25 = vsub.f32 %v2600_v21, %v2605_v24  ;;  %v15805_v21 = vpack.c.bf16 %v13426_v20, %v13425_v17  ;;  %v13427_v24 = vld [vmem:[%s19125_s24 + $0x1d0] sm:$0xff]  ;;  %v13446_v20 = vld [vmem:[%s19125_s24 + $0x268] sm:$0xff] }
 0x574   : > { %v2607_v26 = vmul.f32 %v2606_v25, %v2606_v25 }
 0x576   : > { %v2608_v27 = vsel %vm759_vm1, %v2607_v26, 0.0  ;;  %v13428_v26 = vld [vmem:[%s19125_s24 + $0x1d8] sm:$0xff] }
 0x577   : > { %2609 = vadd.xlane.f32.xlu1 %v2608_v27  ;;  %v15808_v27 = vpack.c.bf16 %v13428_v26, %v13427_v24  ;;  %v13448_v26 = vld [vmem:[%s19125_s24 + $0x278] sm:$0xff] }
 0x604   : > { %v2610_v42 = vpop.xlane.xlu1 %2609 }
 0x605   : > { %v2611_v43 = vmul.f32 0.03125, %v2610_v42  ;;  %v15817_v42 = vpack.c.bf16 %v13434_v39, %v13433_v38  ;;  %v13461_v38 = vld [vmem:[%s19125_s24 + $0x2e0] sm:$0xff]  ;;  %v13462_v39 = vld [vmem:[%s19125_s24 + $0x2e8] sm:$0xff] }
 0x607   : > { %v2612_v44 = vadd.f32 1e-05, %v2611_v43 }
 0x609   : > { %16270 = vrsqrt.f32 %v2612_v44  ;;  %v13424_v44 = vld [vmem:[%s19125_s24 + $0x1b8] sm:$0xff] }
 0x613   : > { %v16271_v48 = vpop.eup %16270 }
 0x614   : > { %v2614_v49 = vmul.f32 %v16271_v48, %v2606_v25  ;;  %v15796_v25 = vpack.c.bf16 %v13420_v23, %v13419_v22  ;;  %v13436_v48 = vld [vmem:[%s19125_s24 + $0x218] sm:$0xff]  ;;  %v13458_v22 = vld [vmem:[%s19125_s24 + $0x2c8] sm:$0xff] }
 0x616   : > { %v2619_v51 = vmul.f32 %v2618_v47, %v2614_v49  ;;  %v13435_v47 = vld [vmem:[%s19125_s24 + $0x210] sm:$0xff]  ;;  %v15802_v49 = vpack.c.bf16 %v13424_v44, %v13423_v12 }
 0x618   : > { %v2624_v52 = vadd.f32 %v2623_v50, %v2619_v51  ;;  %v15820_v50 = vpack.c.bf16 %v13436_v48, %v13435_v47  ;;  %v13429_v51 = vld [vmem:[%s19125_s24 + $0x1e0] sm:$0xff] }
 0x61a   : > { %14620 = vmatmul.mubr.msk.f32.vlgmr.msra.gmra.mrb[24].mxu0 %vm759_vm1, %v2624_v52 }
 0x61b   : > { %14649 = vmatprep.mubr.msk.f32.mxu0 %vm16435_vm0, %v16436_v11  ;;  %15794 = vmatpush3.bf16.msra.mxu0 %v15793_v19  ;;  %v13445_v19 = vld [vmem:[%s19125_s24 + $0x260] sm:$0xff] }
 0x61c   : > { %15795 = vmatprep.subr.bf16.mxu0 %v16434_v3  ;;  %v15835_v23 = vpack.c.bf16 %v13446_v20, %v13445_v19  ;;  %v13492_v20 = vld [vmem:[%s19127_s21 + $0x13] ss:$0 sm:$0xff] }
 0x61f   : > { %15797 = vmatpush3.bf16.msra.mxu0 %v15796_v25  ;;  %v13447_v25 = vld [vmem:[%s19125_s24 + $0x270] sm:$0xff] }
 0x620   : > { %15798 = vmatprep.subr.bf16.mxu0 %v16434_v3 }
 0x6ed   : > { %v2713_v57 = vpop.f32.mrb[24].mxu0 }
 0x6ee   : > { %v2714_v58 = vadd.f32 %v13413_v56, %v2713_v57  ;;  %v14621_v59 = vpop.f32.mrb[25].mxu0  ;;  %v15829_v56 = vpack.c.bf16 %v13442_v54, %v13441_v53  ;;  %v13431_v57 = vld [vmem:[%s19125_s24 + $0x1f0] sm:$0xff]  ;;  %v13481_v53 = vld [vmem:[%s19127_s21 + $0xc] ss:$0 sm:$0xff] }
 0x6ef   : > { %v13443_v59 = vld [vmem:[%s19125_s24 + $0x250] sm:$0xff] }
 0x6f0   : > { %v2717_v60 = vmax.f32 %v2714_v58, 0.0  ;;  %v13432_v58 = vld [vmem:[%s19125_s24 + $0x1f8] sm:$0xff] }
 0x6f2   : > { %14639 = vmatmul.mubr.msk.f32.vlgmr.msra.gmra.mrb[24].mxu1 %vm2722_vm3, %v2717_v60  ;;  %v13444_v60 = vld [vmem:[%s19125_s24 + $0x258] sm:$0xff] }
 0x6f3   : > { %14671 = vmatprep.mubr.msk.f32.mxu1 %vm16435_vm0, %v16436_v11  ;;  %15806 = vmatpush3.bf16.msra.mxu1 %v15805_v21  ;;  %v13457_v21 = vld [vmem:[%s19125_s24 + $0x2c0] sm:$0xff] }
 0x6f4   : > { %15807 = vmatprep.subr.bf16.mxu1 %v16434_v3  ;;  %v15853_v24 = vpack.c.bf16 %v13458_v22, %v13457_v21 }
 0x6f7   : > { %15809 = vmatpush3.bf16.msra.mxu1 %v15808_v27  ;;  %v13459_v27 = vld [vmem:[%s19125_s24 + $0x2d0] sm:$0xff] }
 0x6f8   : > { %15816 = vmatprep.subr.bf16.mxu1 %v16434_v3 }
 0x7c5   : > { %v2792_v0 = vpop.f32.mrb[24].mxu1 }
 0x7c6   : > { %v2793_v2 = vadd.f32 %v2792_v0, %v2721_v63  ;;  %v14640_v4 = vpop.f32.mrb[25].mxu1  ;;  %v15814_v63 = vpack.c.bf16 %v13432_v58, %v13431_v57  ;;  %v15832_v0 = vpack.c.bf16 %v13444_v60, %v13443_v59  ;;  %v13491_v58 = vld [vmem:[%s19127_s21 + $0x12] ss:$0 sm:$0xff] }
 0x7c7   : > { %v13438_v4 = vld [vmem:[%s19125_s24 + $0x228] sm:$0xff] }
 0x7c8   : > { %v2796_v5 = vadd.f32 %v2793_v2, %v2624_v52  ;;  %v13430_v52 = vld [vmem:[%s19125_s24 + $0x1e8] sm:$0xff]  ;;  %v13437_v2 = vld [vmem:[%s19125_s24 + $0x220] sm:$0xff] }
 0x7c9   : > { %v15811_v55 = vpack.c.bf16 %v13430_v52, %v13429_v51 }
 0x7ca   : > { %v2797_v6 = vsel %vm759_vm1, %v2796_v5, 0.0 }
 0x7cb   : > { %2798 = vadd.xlane.f32.xlu0 %v2797_v6  ;;  %v13450_v6 = vld [vmem:[%s19125_s24 + $0x288] sm:$0xff] }
 0x858   : > { %v2799_v7 = vpop.xlane.xlu0 %2798 }
 0x859   : > { %v2800_v9 = vmul.f32 0.03125, %v2799_v7  ;;  %v15823_v7 = vpack.c.bf16 %v13438_v4, %v13437_v2 }
 0x85b   : > { %v2801_v10 = vsub.f32 %v2796_v5, %v2800_v9  ;;  %v13449_v5 = vld [vmem:[%s19125_s24 + $0x280] sm:$0xff] }
 0x85c   : > { %v15841_v9 = vpack.c.bf16 %v13450_v6, %v13449_v5  ;;  %v13490_v6 = vld [vmem:[%s19127_s21 + $0x11] ss:$0 sm:$0xff] }
 0x85d   : > { %v2802_v13 = vmul.f32 %v2801_v10, %v2801_v10 }
 0x85f   : > { %v2803_v14 = vsel %vm759_vm1, %v2802_v13, 0.0  ;;  %v13440_v13 = vld [vmem:[%s19125_s24 + $0x238] sm:$0xff] }
 0x860   : > { %2804 = vadd.xlane.f32.xlu1 %v2803_v14  ;;  %v13451_v14 = vld [vmem:[%s19125_s24 + $0x290] sm:$0xff] }
 0x861   : > { %v15844_v17 = vpack.c.bf16 %v13452_v15, %v13451_v14 }
 0x8ed   : > { %v2805_v28 = vpop.xlane.xlu1 %2804 }
 0x8ee   : > { %v2806_v29 = vmul.f32 0.03125, %v2805_v28  ;;  %v13460_v28 = vld [vmem:[%s19125_s24 + $0x2d8] sm:$0xff] }
 0x8f0   : > { %v2807_v30 = vadd.f32 1e-05, %v2806_v29  ;;  %v15838_v29 = vpack.c.bf16 %v13448_v26, %v13447_v25 }
 0x8f2   : > { %16272 = vrsqrt.f32 %v2807_v30  ;;  %v15856_v30 = vpack.c.bf16 %v13460_v28, %v13459_v27  ;;  %v13498_v28 = vld [vmem:[%s19127_s21 + $0x15] ss:$0 sm:$0xff] }
 0x8fc   : > { %v16273_v33 = vpop.eup %16272 }
 0x8fd   : > { %v2809_v36 = vmul.f32 %v16273_v33, %v2801_v10  ;;  %v13439_v10 = vld [vmem:[%s19125_s24 + $0x230] sm:$0xff]  ;;  %v13454_v33 = vld [vmem:[%s19125_s24 + $0x2a8] sm:$0xff] }
 0x8fe   : > { %v15826_v16 = vpack.c.bf16 %v13440_v13, %v13439_v10  ;;  %v13482_v13 = vld [vmem:[%s19127_s21 + $0xd] ss:$0 sm:$0xff] }
 0x8ff   : > { %v2814_v40 = vmul.f32 %v2813_v32, %v2809_v36  ;;  %v13453_v32 = vld [vmem:[%s19125_s24 + $0x2a0] sm:$0xff]  ;;  %v13456_v36 = vld [vmem:[%s19125_s24 + $0x2b8] sm:$0xff] }
 0x900   : > { %v15847_v34 = vpack.c.bf16 %v13454_v33, %v13453_v32 }
 0x901   : > { %v17082_v43 = vadd.f32 %v2818_v35, %v2814_v40  ;;  %v13455_v35 = vld [vmem:[%s19125_s24 + $0x2b0] sm:$0xff]  ;;  %v15859_v40 = vpack.c.bf16 %v13462_v39, %v13461_v38 }
 0x902   : > { %v15850_v37 = vpack.c.bf16 %v13456_v36, %v13455_v35 }
 0x903   : > { %14650 = vmatmul.mubr.msk.f32.vlgmr.msra.gmra.mrb[26].mxu0 %vm759_vm1, %v17082_v43  ;;  %14672 = vmatmul.mubr.msk.f32.vlgmr.msra.gmra.mrb[26].mxu1 %vm759_vm1, %v17082_v43 }
 0x904   : > { %15800 = vmatpush3.bf16.msra.mxu0 %v15799_v41  ;;  %15818 = vmatpush3.bf16.msra.mxu1 %v15817_v42  ;;  %v13463_v41 = vld [vmem:[%s19125_s24 + $0x2f0] sm:$0xff]  ;;  %v13464_v42 = vld [vmem:[%s19125_s24 + $0x2f8] sm:$0xff] }
 0x905   : > { %15801 = vmatprep.subr.bf16.mxu0 %v16434_v3  ;;  %15819 = vmatprep.subr.bf16.mxu1 %v16434_v3  ;;  %v15862_v12 = vpack.c.bf16 %v13464_v42, %v13463_v41 }
 0x906   : > { %14660 = vmatprep.mubr.msk.f32.mxu0 %vm16435_vm0, %v16436_v11  ;;  %14693 = vmatprep.mubr.msk.f32.mxu1 %vm16435_vm0, %v16436_v11 }
 0x908   : > { %15803 = vmatpush3.bf16.msra.mxu0 %v15802_v49  ;;  %15821 = vmatpush3.bf16.msra.mxu1 %v15820_v50  ;;  %v13489_v50 = vld [vmem:[%s19127_s21 + $0x10] ss:$0 sm:$0xff] }
 0x909   : > { %15810 = vmatprep.subr.bf16.mxu0 %v16434_v3  ;;  %15828 = vmatprep.subr.bf16.mxu1 %v16434_v3 }
 0x90b   : > { %14661 = vmatmul.mubr.msk.f32.vlgmr.msra.gmra.mrb[28].mxu0 %vm759_vm1, %v17082_v43  ;;  %14694 = vmatmul.mubr.msk.f32.vlgmr.msra.gmra.mrb[28].mxu1 %vm759_vm1, %v17082_v43 }
 0x90c   : > { %15812 = vmatpush3.bf16.msra.mxu0 %v15811_v55  ;;  %15830 = vmatpush3.bf16.msra.mxu1 %v15829_v56 }
 0x90d   : > { %15813 = vmatprep.subr.bf16.mxu0 %v16434_v3  ;;  %15831 = vmatprep.subr.bf16.mxu1 %v16434_v3 }
 0x90e   : > { %14682 = vmatprep.mubr.msk.f32.mxu0 %vm16435_vm0, %v16436_v11  ;;  %14715 = vmatprep.mubr.msk.f32.mxu1 %vm16435_vm0, %v16436_v11 }
 0x910   : > { %15815 = vmatpush3.bf16.msra.mxu0 %v15814_v63  ;;  %15833 = vmatpush3.bf16.msra.mxu1 %v15832_v0  ;;  %v13483_v63 = vld [vmem:[%s19127_s21 + $0xe] ss:$0 sm:$0xff] }
 0x911   : > { %15822 = vmatprep.subr.bf16.mxu0 %v16434_v3  ;;  %15840 = vmatprep.subr.bf16.mxu1 %v16434_v3 }
 0x913   : > { %14683 = vmatmul.mubr.msk.f32.vlgmr.msra.gmra.mrb[30].mxu0 %vm759_vm1, %v17082_v43  ;;  %14716 = vmatmul.mubr.msk.f32.vlgmr.msra.gmra.mrb[30].mxu1 %vm759_vm1, %v17082_v43 }
 0x914   : > { %15824 = vmatpush3.bf16.msra.mxu0 %v15823_v7  ;;  %15842 = vmatpush3.bf16.msra.mxu1 %v15841_v9  ;;  %v13497_v7 = vld [vmem:[%s19127_s21 + $0x14] ss:$0 sm:$0xff] }
 0x915   : > { %15825 = vmatprep.subr.bf16.mxu0 %v16434_v3  ;;  %15843 = vmatprep.subr.bf16.mxu1 %v16434_v3 }
 0x916   : > { %14704 = vmatprep.mubr.msk.f32.mxu0 %vm16435_vm0, %v16436_v11  ;;  %14737 = vmatprep.mubr.msk.f32.mxu1 %vm16435_vm0, %v16436_v11 }
 0x918   : > { %15827 = vmatpush3.bf16.msra.mxu0 %v15826_v16  ;;  %15845 = vmatpush3.bf16.msra.mxu1 %v15844_v17 }
 0x919   : > { %15834 = vmatprep.subr.bf16.mxu0 %v16434_v3  ;;  %15852 = vmatprep.subr.bf16.mxu1 %v16434_v3 }
 0x91b   : > { %14705 = vmatmul.mubr.msk.f32.vlgmr.msra.gmra.mrb[32].mxu0 %vm759_vm1, %v17082_v43  ;;  %14738 = vmatmul.mubr.msk.f32.vlgmr.msra.gmra.mrb[32].mxu1 %vm759_vm1, %v17082_v43 }
 0x91c   : > { %15836 = vmatpush3.bf16.msra.mxu0 %v15835_v23  ;;  %15854 = vmatpush3.bf16.msra.mxu1 %v15853_v24  ;;  %v13484_v23 = vld [vmem:[%s19127_s21 + $0xf] ss:$0 sm:$0xff] }
 0x91d   : > { %15837 = vmatprep.subr.bf16.mxu0 %v16434_v3  ;;  %15855 = vmatprep.subr.bf16.mxu1 %v16434_v3 }
 0x91e   : > { %14726 = vmatprep.mubr.msk.f32.mxu0 %vm16435_vm0, %v16436_v11  ;;  %14759 = vmatprep.mubr.msk.f32.mxu1 %vm16435_vm0, %v16436_v11 }
 0x920   : > { %15839 = vmatpush3.bf16.msra.mxu0 %v15838_v29  ;;  %15857 = vmatpush3.bf16.msra.mxu1 %v15856_v30 }
 0x921   : > { %15846 = vmatprep.subr.bf16.mxu0 %v16434_v3  ;;  %14773 = vmatprep.subr.mxu1 %v16436_v11 }
 0x923   : > { %14727 = vmatmul.mubr.msk.f32.vlgmr.msra.gmra.mrb[34].mxu0 %vm759_vm1, %v17082_v43  ;;  %14760 = vmatmul.mubr.msk.f32.vlgmr.msra.gmra.mrb[34].mxu1 %vm759_vm1, %v17082_v43 }
 0x924   : > { %15848 = vmatpush3.bf16.msra.mxu0 %v15847_v34  ;;  %14748 = vmatprep.mubr.msk.f32.mxu0 %vm16435_vm0, %v16436_v11 }
 0x925   : > { %15849 = vmatprep.subr.bf16.mxu0 %v16434_v3  ;;  %14775 = vmatprep.mubr.msk.f32.mxu1 %vm16435_vm0, %v16436_v11 }
 0x928   : > { %15851 = vmatpush3.bf16.msra.mxu0 %v15850_v37 }
 0x929   : > { %15858 = vmatprep.subr.bf16.mxu0 %v16434_v3 }
 0x92b   : > { %14749 = vmatmul.mubr.msk.f32.vlgmr.msra.gmra.mrb[36].mxu0 %vm759_vm1, %v17082_v43 }
 0x92c   : > { %15860 = vmatpush3.bf16.msra.mxu0 %v15859_v40  ;;  %14770 = vmatprep.mubr.msk.f32.mxu0 %vm16435_vm0, %v16436_v11 }
 0x92d   : > { %15861 = vmatprep.subr.bf16.mxu0 %v16434_v3 }
 0x930   : > { %15863 = vmatpush3.bf16.msra.mxu0 %v15862_v12 }
 0x931   : > { %14783 = vmatprep.subr.mxu0 %v16436_v11 }
 0x933   : > { %14771 = vmatmul.mubr.msk.f32.vlgmr.msra.gmra.mrb[38].mxu0 %vm759_vm1, %v17082_v43 }
 0x934   : > { %14785 = vmatprep.mubr.msk.f32.mxu0 %vm16435_vm0, %v16436_v11 }
 0x9d6   : > { %v2982_v44 = vpop.f32.mrb[26].mxu0  ;;  %v3122_v47 = vpop.f32.mrb[26].mxu1 }
 0x9d7   : > { %v14651_v48 = vpop.f32.mrb[27].mxu0  ;;  %v14673_v49 = vpop.f32.mrb[27].mxu1  ;;  %v2983_v57 = vadd.f32 %v13481_v53, %v2982_v44  ;;  %v3123_v5 = vadd.f32 %v13483_v63, %v3122_v47 }
 0x9de   : > { %v3052_v51 = vpop.f32.mrb[28].mxu0  ;;  %v3286_v52 = vpop.f32.mrb[28].mxu1 }
 0x9df   : > { %v3287_v54 = vadd.f32 %v13489_v50, %v3286_v52  ;;  %v14662_v55 = vpop.f32.mrb[29].mxu0  ;;  %v14695_v56 = vpop.f32.mrb[29].mxu1  ;;  %v3053_v19 = vadd.f32 %v13482_v13, %v3052_v51 }
 0x9e1   : > { %14774 = vmatpush3.xpose.msk.msra.mxu1 %vm1651_vm2, %v3287_v54 }
 0x9e2   : > { %14778 = vmatprep.subr.mxu1 %v16436_v11 }
 0x9e4   : > { %14776 = vmatmul.mubr.msk.f32.vlgmr.msra.gmra.mrb[36].mxu1 %vm1651_vm2, %v2983_v57 }
 0x9e5   : > { %14780 = vmatprep.mubr.msk.f32.mxu1 %vm16435_vm0, %v16436_v11 }
 0x9e6   : > { %v3192_v59 = vpop.f32.mrb[30].mxu0  ;;  %v3426_v60 = vpop.f32.mrb[30].mxu1 }
 0x9e7   : > { %v3427_v0 = vadd.f32 %v13491_v58, %v3426_v60  ;;  %v14684_v2 = vpop.f32.mrb[31].mxu0  ;;  %v14717_v4 = vpop.f32.mrb[31].mxu1  ;;  %v3193_v27 = vadd.f32 %v13484_v23, %v3192_v59 }
 0x9e9   : > { %14784 = vmatpush3.xpose.msk.msra.mxu0 %vm1651_vm2, %v3427_v0 }
 0x9ea   : > { %14793 = vmatprep.subr.mxu0 %v16436_v11 }
 0x9ec   : > { %14786 = vmatmul.mubr.msk.f32.vlgmr.msra.gmra.mrb[40].mxu0 %vm1651_vm2, %v3123_v5 }
 0x9ed   : > { %14795 = vmatprep.mubr.msk.f32.mxu0 %vm16435_vm0, %v16436_v11 }
 0x9ee   : > { %v3356_v9 = vpop.f32.mrb[32].mxu0  ;;  %v3590_v10 = vpop.f32.mrb[32].mxu1 }
 0x9ef   : > { %v3357_v14 = vadd.f32 %v13490_v6, %v3356_v9  ;;  %v3591_v15 = vadd.f32 %v13497_v7, %v3590_v10  ;;  %v14706_v16 = vpop.f32.mrb[33].mxu0  ;;  %v14739_v17 = vpop.f32.mrb[33].mxu1 }
 0x9f1   : > { %14779 = vmatpush3.xpose.msk.msra.mxu1 %vm1651_vm2, %v3357_v14  ;;  %14794 = vmatpush3.msra.mxu0 %v3591_v15 }
 0x9f2   : > { %14788 = vmatprep.subr.mxu1 %v16436_v11  ;;  %14803 = vmatprep.subr.mxu0 %v16436_v11 }
 0x9f4   : > { %14781 = vmatmul.mubr.msk.f32.vlgmr.msra.gmra.mrb[38].mxu1 %vm1651_vm2, %v3053_v19  ;;  %v13499_v19 = vld [vmem:[%s19127_s21 + $0x16] ss:$0 sm:$0xff] }
 0x9f5   : > { %14790 = vmatprep.mubr.msk.f32.mxu1 %vm16435_vm0, %v16436_v11 }
 0x9f6   : > { %v3496_v21 = vpop.f32.mrb[34].mxu0  ;;  %v17297_v22 = vpop.f32.mrb[34].mxu1 }
 0x9f7   : > { %v3497_v24 = vadd.f32 %v13492_v20, %v3496_v21  ;;  %v14728_v25 = vpop.f32.mrb[35].mxu0  ;;  %v14761_v26 = vpop.f32.mrb[35].mxu1  ;;  %v3731_v23 = vadd.f32 %v13499_v19, %v17297_v22  ;;  %v13500_v22 = vld [vmem:[%s19127_s21 + $0x17] ss:$0 sm:$0xff] }
 0x9f9   : > { %14789 = vmatpush3.xpose.msk.msra.mxu1 %vm1651_vm2, %v3497_v24 }
 0x9fa   : > { %14798 = vmatprep.subr.mxu1 %v16436_v11 }
 0x9fc   : > { %14791 = vmatmul.mubr.msk.f32.vlgmr.msra.gmra.mrb[40].mxu1 %vm1651_vm2, %v3193_v27 }
 0x9fd   : > { %14800 = vmatprep.mubr.msk.f32.mxu1 %vm16435_vm0, %v16436_v11 }
 0x9fe   : > { %v3660_v29 = vpop.f32.mrb[36].mxu0 }
 0x9ff   : > { %v3661_v30 = vadd.f32 %v13498_v28, %v3660_v29  ;;  %v14750_v32 = vpop.f32.mrb[37].mxu0 }
 0xa01   : > { %14799 = vmatpush3.msra.mxu1 %v3661_v30 }
 0xa02   : > { %14808 = vmatprep.subr.mxu1 %v16436_v11 }
 0xa06   : > { %v17311_v33 = vpop.f32.mrb[38].mxu0 }
 0xa07   : > { %v14772_v34 = vpop.f32.mrb[39].mxu0  ;;  %v3801_v30 = vadd.f32 %v13500_v22, %v17311_v33  ;;  %v13478_v33 = vld [vmem:[%s19128_s23 + $0x28] sm:$0xff] }
 0xab7   : > { %v3876_v35 = vpop.f32.mrb[36].mxu1 }
 0xab8   : > { %v4108_v36 = vmul.f32 0.35355338, %v3876_v35  ;;  %v14777_v37 = vpop.f32.mrb[37].mxu1  ;;  %v13477_v35 = vld [vmem:[%s19128_s23 + $0x20] sm:$0xff] }
 0xaba   : > { %v4112_v38 = vsel %vm1651_vm2, %v4108_v36, -inf }
 0xabb   : > { %4113 = vmax.xlane.f32.xlu0 %v4112_v38 }
 0xabf   : > { %v4028_v39 = vpop.f32.mrb[40].mxu0 }
 0xac0   : > { %v4110_v40 = vmul.f32 0.35355338, %v4028_v39  ;;  %v14787_v41 = vpop.f32.mrb[41].mxu0 }
 0xac1   : > { %v13480_v41 = vld [vmem:[%s19128_s23 + $0x38] sm:$0xff] }
 0xac2   : > { %v4118_v42 = vsel %vm1651_vm2, %v4110_v40, -inf }
 0xac3   : > { %4119 = vmax.xlane.f32.xlu0 %v4118_v42 }
 0xac7   : > { %v3952_v12 = vpop.f32.mrb[38].mxu1 }
 0xac8   : > { %v4109_v44 = vmul.f32 0.35355338, %v3952_v12  ;;  %v14782_v47 = vpop.f32.mrb[39].mxu1 }
 0xaca   : > { %v4115_v48 = vsel %vm1651_vm2, %v4109_v44, -inf }
 0xacb   : > { %4116 = vmax.xlane.f32.xlu1 %v4115_v48 }
 0xacf   : > { %v4104_v49 = vpop.f32.mrb[40].mxu1 }
 0xad0   : > { %v4111_v50 = vmul.f32 0.35355338, %v4104_v49  ;;  %v14792_v51 = vpop.f32.mrb[41].mxu1 }
 0xad2   : > { %v4121_v52 = vsel %vm1651_vm2, %v4111_v50, -inf }
 0xad3   : > { %4122 = vmax.xlane.f32.xlu1 %v4121_v52 }
 0xb48   : > { %v4114_v53 = vpop.xlane.xlu0 %4113 }
 0xb49   : > { %v4124_v54 = vsub.f32 %v4108_v36, %v4114_v53  ;;  %v13479_v36 = vld [vmem:[%s19128_s23 + $0x30] sm:$0xff] }
 0xb4b   : > { %v4128_v55 = vmul.f32 1.442695, %v4124_v54 }
 0xb4d   : > { %16274 = vpow2.f32 %v4128_v55 }
 0xb50   : > { %v4120_v56 = vpop.xlane.xlu0 %4119 }
 0xb51   : > { %v4126_v57 = vsub.f32 %v4110_v40, %v4120_v56 }
 0xb53   : > { %v4132_v58 = vmul.f32 1.442695, %v4126_v57 }
 0xb55   : > { %16276 = vpow2.f32 %v4132_v58 }
 0xb57   : > { %v16275_v59 = vpop.eup %16274 }
 0xb58   : > { %v4117_v60 = vpop.xlane.xlu1 %4116  ;;  %v4136_v63 = vsel %vm1651_vm2, %v16275_v59, 0.0 }
 0xb59   : > { %v4125_v0 = vsub.f32 %v4109_v44, %v4117_v60  ;;  %4137 = vadd.xlane.f32.xlu0 %v4136_v63 }
 0xb5b   : > { %v4130_v2 = vmul.f32 1.442695, %v4125_v0 }
 0xb5d   : > { %16278 = vpow2.f32 %v4130_v2 }
 0xb5f   : > { %v16277_v4 = vpop.eup %16276 }
 0xb60   : > { %v4123_v5 = vpop.xlane.xlu1 %4122  ;;  %v4142_v6 = vsel %vm1651_vm2, %v16277_v4, 0.0 }
 0xb61   : > { %v4127_v7 = vsub.f32 %v4111_v50, %v4123_v5  ;;  %4143 = vadd.xlane.f32.xlu0 %v4142_v6 }
 0xb63   : > { %v4134_v9 = vmul.f32 1.442695, %v4127_v7 }
 0xb65   : > { %16280 = vpow2.f32 %v4134_v9 }
 0xb67   : > { %v16279_v10 = vpop.eup %16278 }
 0xb68   : > { %v4139_v13 = vsel %vm1651_vm2, %v16279_v10, 0.0 }
 0xb69   : > { %4140 = vadd.xlane.f32.xlu1 %v4139_v13 }
 0xb6f   : > { %v16281_v14 = vpop.eup %16280 }
 0xb70   : > { %v4145_v15 = vsel %vm1651_vm2, %v16281_v14, 0.0 }
 0xb71   : > { %4146 = vadd.xlane.f32.xlu1 %v4145_v15 }
 0xbe6   : > { %v4138_v16 = vpop.xlane.xlu0 %4137 }
 0xbe7   : > { %16282 = vrcp.f32 %v4138_v16  ;;  %v13521_v16 = vld [vmem:[%s19131_s30 + $0x20] sm:$0xff] }
 0xbee   : > { %v4144_v17 = vpop.xlane.xlu0 %4143 }
 0xbef   : > { %16284 = vrcp.f32 %v4144_v17  ;;  %v13522_v17 = vld [vmem:[%s19131_s30 + $0x28] sm:$0xff] }
 0xbf0   : > { %v15865_v19 = vpack.c.bf16 %v13522_v17, %v13521_v16  ;;  %v5005_v16 = vld [vmem:[%s19081_s9 + $0xe8] sm:$0xff] }
 0xbf1   : > { %v16283_v20 = vpop.eup %16282 }
 0xbf2   : > { %v4149_v21 = vmul.f32 %v16283_v20, %v16275_v59  ;;  %v17377_v59 = vld [vmem:[%s19129_s7 + $0x8] sm:$0x3f]  ;;  %v13524_v20 = vld [vmem:[%s19131_s30 + $0x38] sm:$0xff]  ;;  %s19030_s7 = scalar_lea.hbm %s19139_s1, %s13851_s2 }
 0xbf3   : > { %v4750_v63 = vrot.slane %v17377_v59, %v16947_v8 }
 0xbf4   : > { %14796 = vmatmul.mubr.msk.f32.vlgmr.msra.gmra.mrb[42].mxu0 %vm1651_vm2, %v4149_v21 }
 0xbf5   : > { %14804 = vmatpush3.msra.mxu0 %v3731_v23  ;;  %14805 = vmatprep.mubr.msk.f32.mxu0 %vm16435_vm0, %v16436_v11  ;;  %v13526_v23 = vld [vmem:[%s19132_s6 + $0x40] sm:$0xff] }
 0xbf6   : > { %v4141_v24 = vpop.xlane.xlu1 %4140  ;;  %14813 = vmatprep.subr.mxu0 %v16436_v11 }
 0xbf7   : > { %16286 = vrcp.f32 %v4141_v24  ;;  %v13527_v24 = vld [vmem:[%s19132_s6 + $0x48] sm:$0xff] }
 0xbf9   : > { %v16285_v25 = vpop.eup %16284 }
 0xbfa   : > { %v4153_v26 = vmul.f32 %v16285_v25, %v16277_v4  ;;  %v15871_v25 = vpack.c.bf16 %v13527_v24, %v13526_v23  ;;  %v4984_v23 = vld [vmem:[%s19081_s9 + $0x40] sm:$0xff]  ;;  %v4985_v24 = vld [vmem:[%s19081_s9 + $0x48] sm:$0xff] }
 0xbfc   : > { %14806 = vmatmul.mubr.msk.f32.vlgmr.msra.gmra.mrb[44].mxu0 %vm1651_vm2, %v4153_v26  ;;  %v13528_v26 = vld [vmem:[%s19132_s6 + $0x50] sm:$0xff] }
 0xbfd   : > { %14815 = vmatprep.mubr.msk.f32.mxu0 %vm16435_vm0, %v16436_v11  ;;  %14814 = vmatpush3.msra.mxu0 %v13477_v35 }
 0xbfe   : > { %v4147_v27 = vpop.xlane.xlu1 %4146  ;;  %14823 = vmatprep.subr.mxu0 %v16436_v11 }
 0xbff   : > { %16288 = vrcp.f32 %v4147_v27  ;;  %v13529_v27 = vld [vmem:[%s19132_s6 + $0x58] sm:$0xff] }
 0xc00   : > { %v15874_v22 = vpack.c.bf16 %v13529_v27, %v13528_v26 }
 0xc01   : > { %v16287_v28 = vpop.eup %16286 }
 0xc02   : > { %v4151_v29 = vmul.f32 %v16287_v28, %v16279_v10  ;;  %v13530_v28 = vld [vmem:[%s19132_s6 + $0x60] sm:$0xff] }
 0xc04   : > { %14801 = vmatmul.mubr.msk.f32.vlgmr.msra.gmra.mrb[42].mxu1 %vm1651_vm2, %v4151_v29  ;;  %v13531_v29 = vld [vmem:[%s19132_s6 + $0x68] sm:$0xff] }
 0xc05   : > { %14809 = vmatpush3.msra.mxu1 %v3801_v30  ;;  %14810 = vmatprep.mubr.msk.f32.mxu1 %vm16435_vm0, %v16436_v11  ;;  %v15877_v30 = vpack.c.bf16 %v13531_v29, %v13530_v28  ;;  %v4986_v29 = vld [vmem:[%s19081_s9 + $0x50] sm:$0xff] }
 0xc06   : > { %14818 = vmatprep.subr.mxu1 %v16436_v11 }
 0xc09   : > { %v16289_v32 = vpop.eup %16288 }
 0xc0a   : > { %v4155_v34 = vmul.f32 %v16289_v32, %v16281_v14 }
 0xc0c   : > { %14811 = vmatmul.mubr.msk.f32.vlgmr.msra.gmra.mrb[44].mxu1 %vm1651_vm2, %v4155_v34 }
 0xc0d   : > { %14820 = vmatprep.mubr.msk.f32.mxu1 %vm16435_vm0, %v16436_v11  ;;  %14819 = vmatpush3.msra.mxu1 %v13478_v33  ;;  %v4769_v33 = vrot.slane %v17377_v59, %v16997_v45 }
 0xc0e   : > { %14828 = vmatprep.subr.mxu1 %v16436_v11 }
 0xcc7   : > { %v4225_v37 = vpop.f32.mrb[42].mxu0 }
 0xcc8   : > { %v14797_v38 = vpop.f32.mrb[43].mxu0  ;;  %14816 = vmatmul.mubr.msk.f32.vlgmr.msra.gmra.mrb[46].mxu0 %vm1651_vm2, %v4225_v37 }
 0xcc9   : > { %14824 = vmatpush3.msra.mxu0 %v13479_v36  ;;  %14825 = vmatprep.mubr.msk.f32.mxu0 %vm16435_vm0, %v16436_v11  ;;  %v4774_v38 = vrot.slane %v17377_v59, %v17000_v46 }
 0xcca   : > { %15864 = vmatprep.subr.bf16.mxu0 %v16434_v3 }
 0xccf   : > { %v4371_v39 = vpop.f32.mrb[44].mxu0 }
 0xcd0   : > { %v14807_v40 = vpop.f32.mrb[45].mxu0  ;;  %14826 = vmatmul.mubr.msk.f32.vlgmr.msra.gmra.mrb[48].mxu0 %vm1651_vm2, %v4371_v39  ;;  %v4976_v39 = vld [vmem:[%s19081_s9] sm:$0xff] }
 0xcd1   : > { %14841 = vmatprep.mubr.msk.f32.mxu0 %vm16435_vm0, %v16436_v11  ;;  %15866 = vmatpush3.bf16.msra.mxu0 %v15865_v19  ;;  %v4977_v40 = vld [vmem:[%s19081_s9 + $0x8] sm:$0xff]  ;;  %v5006_v19 = vld [vmem:[%s19081_s9 + $0xf0] sm:$0xff] }
 0xcd2   : > { %15867 = vmatprep.subr.bf16.mxu0 %v16434_v3 }
 0xcd7   : > { %v4298_v42 = vpop.f32.mrb[42].mxu1 }
 0xcd8   : > { %v14802_v12 = vpop.f32.mrb[43].mxu1  ;;  %14821 = vmatmul.mubr.msk.f32.vlgmr.msra.gmra.mrb[46].mxu1 %vm1651_vm2, %v4298_v42  ;;  %v15883_v42 = vpack.c.bf16 %v4977_v40, %v4976_v39  ;;  %v4995_v39 = vld [vmem:[%s19081_s9 + $0x98] sm:$0xff] }
 0xcd9   : > { %14829 = vmatpush3.msra.mxu1 %v13480_v41  ;;  %14830 = vmatprep.mubr.msk.f32.mxu1 %vm16435_vm0, %v16436_v11 }
 0xcda   : > { %15870 = vmatprep.subr.bf16.mxu1 %v16434_v3 }
 0xcdf   : > { %v4444_v44 = vpop.f32.mrb[44].mxu1 }
 0xce0   : > { %v14812_v47 = vpop.f32.mrb[45].mxu1  ;;  %14831 = vmatmul.mubr.msk.f32.vlgmr.msra.gmra.mrb[48].mxu1 %vm1651_vm2, %v4444_v44  ;;  %v4978_v44 = vld [vmem:[%s19081_s9 + $0x10] sm:$0xff] }
 0xce1   : > { %14860 = vmatprep.mubr.msk.f32.mxu1 %vm16435_vm0, %v16436_v11  ;;  %15872 = vmatpush3.bf16.msra.mxu1 %v15871_v25  ;;  %v4979_v47 = vld [vmem:[%s19081_s9 + $0x18] sm:$0xff] }
 0xce2   : > { %15873 = vmatprep.subr.bf16.mxu1 %v16434_v3 }
 0xce5   : > { %15875 = vmatpush3.bf16.msra.mxu1 %v15874_v22  ;;  %v15895_v22 = vpack.c.bf16 %v4985_v24, %v4984_v23 }
 0xce6   : > { %15876 = vmatprep.subr.bf16.mxu1 %v16434_v3 }
 0xce9   : > { %15878 = vmatpush3.bf16.msra.mxu1 %v15877_v30  ;;  %v4987_v30 = vld [vmem:[%s19081_s9 + $0x58] sm:$0xff] }
 0xcea   : > { %15879 = vmatprep.subr.bf16.mxu1 %v16434_v3 }
 0xd9b   : > { %v4517_v48 = vpop.f32.mrb[46].mxu0 }
 0xd9c   : > { %v14817_v49 = vpop.f32.mrb[47].mxu0  ;;  %v4740_v53 = vsel %vm759_vm1, %v4517_v48, 0.0  ;;  %v15886_v48 = vpack.c.bf16 %v4979_v47, %v4978_v44  ;;  %v5002_v47 = vld [vmem:[%s19081_s9 + $0xd0] sm:$0xff] }
 0xd9d   : > { %v4980_v49 = vld [vmem:[%s19081_s9 + $0x20] sm:$0xff] }
 0xda3   : > { %v4663_v50 = vpop.f32.mrb[48].mxu0 }
 0xda4   : > { %v14827_v51 = vpop.f32.mrb[49].mxu0  ;;  %v4743_v57 = vsel %vm759_vm1, %v4663_v50, 0.0  ;;  %v4981_v50 = vld [vmem:[%s19081_s9 + $0x28] sm:$0xff] }
 0xda5   : > { %v17454_v51 = vld [vmem:[%s668_s28] sm:$0xff]  ;;  %s13370_s28 = sshll.u32 %s658_s22, 3 }
 0xda6   : > { %s660_s26 = scalar_lea.vmem [#allocation2], %s13370_s28  ;;  %s16374_s28 = sshll.u32 %s16437_s3, 4  ;;  %s16375_s28 = int_to_ptr.vmem [resolvable:$false] %s16374_s28 }
 0xda7   : > { %s13295_s29 = sshll.u32 %s660_s26, 4  ;;  %s16376_s27 = scalar_lea.vmem %s16375_s28, 256  ;;  %s19032_s29 = int_to_ptr.vmem [resolvable:$true] %s13295_s29 }
 0xda8   : > { %s16370_s0 = scalar_lea.vmem %s19032_s29, 128  ;;  %p16377_p0 = scmp.lt.s32.totalorder %s19032_s29, %s16375_s28 }
 0xda9   : > { %p16371_p11 = scmp.ne.s32.totalorder %s19032_s29, %s16370_s0  ;;  %p16378_p1 = scmp.lt.s32.totalorder %s16376_s27, %s16370_s0 }
 0xdab   : > { %v4590_v52 = vpop.f32.mrb[46].mxu1  ;;  %p16372_p12 = pnand %p16371_p11, %p16586_p5  ;;  %p16379_p2 = por %p16378_p1, %p16377_p0 }
 0xdac   : > { %v4741_v54 = vsel %vm759_vm1, %v4590_v52, 0.0  ;;  %v14822_v55 = vpop.f32.mrb[47].mxu1  ;;  %v15889_v52 = vpack.c.bf16 %v4981_v50, %v4980_v49  ;;  %v5008_v50 = vld [vmem:[%s19081_s9 + $0x100] sm:$0xff] }
 0xdad   : > { %v4742_v56 = vadd.f32 %v4741_v54, %v4740_v53  ;;  %v13532_v53 = vld [vmem:[%s19132_s6 + $0x70] sm:$0xff]  ;;  %v13533_v54 = vld [vmem:[%s19132_s6 + $0x78] sm:$0xff]  ;;  %p16373_p13 = pneg %p16372_p12 }
 0xdae   : > { %v4982_v55 = vld [vmem:[%s19081_s9 + $0x30] sm:$0xff] }
 0xdaf   : > { %v4744_v58 = vadd.f32 %v4743_v57, %v4742_v56  ;;  %v15880_v56 = vpack.c.bf16 %v13533_v54, %v13532_v53  ;;  %v4983_v57 = vld [vmem:[%s19081_s9 + $0x38] sm:$0xff]  ;;  %v5010_v54 = vld [vmem:[%s19081_s9 + $0x110] sm:$0xff]  ;;  %p16380_p3 = pnand %p16379_p2, %p16373_p13 }
 0xdb1   : > { %15881 = vmatpush3.bf16.msra.mxu1 %v15880_v56 }
 0xdb2   : > { %15894 = vmatprep.subr.bf16.mxu1 %v16434_v3 }
 0xdb3   : > { %v4736_v60 = vpop.f32.mrb[48].mxu1 }
 0xdb4   : > { %v4745_v0 = vsel %vm759_vm1, %v4736_v60, 0.0  ;;  %v14832_v2 = vpop.f32.mrb[49].mxu1  ;;  %v4988_v60 = vld [vmem:[%s19081_s9 + $0x60] sm:$0xff] }
 0xdb5   : > { %v4746_v4 = vadd.f32 %v4745_v0, %v4744_v58  ;;  %v15892_v58 = vpack.c.bf16 %v4983_v57, %v4982_v55  ;;  %v4990_v2 = vld [vmem:[%s19081_s9 + $0x70] sm:$0xff]  ;;  %v5011_v55 = vld [vmem:[%s19081_s9 + $0x118] sm:$0xff] }
 0xdb6   : > { %v15934_v56 = vpack.c.bf16 %v5011_v55, %v5010_v54 }
 0xdb7   : > { %v4751_v5 = vadd.f32 %v4750_v63, %v4746_v4  ;;  %v4989_v63 = vld [vmem:[%s19081_s9 + $0x68] sm:$0xff]  ;;  %v4991_v4 = vld [vmem:[%s19081_s9 + $0x78] sm:$0xff] }
 0xdb8   : > { %v15901_v0 = vpack.c.bf16 %v4989_v63, %v4988_v60  ;;  %v5013_v60 = vld [vmem:[%s19081_s9 + $0x128] sm:$0xff] }
 0xdb9   : > { %v4752_v6 = vadd.f32 %v4751_v5, %v17082_v43  ;;  %v13523_v43 = vld [vmem:[%s19131_s30 + $0x30] sm:$0xff]  ;;  %v15904_v5 = vpack.c.bf16 %v4991_v4, %v4990_v2  ;;  %v5016_v2 = vld [vmem:[%s19081_s9 + $0x140] sm:$0xff]  ;;  %v5017_v4 = vld [vmem:[%s19081_s9 + $0x148] sm:$0xff] }
 0xdba   : > { %v15868_v21 = vpack.c.bf16 %v13524_v20, %v13523_v43  ;;  %v5007_v43 = vld [vmem:[%s19081_s9 + $0xf8] sm:$0xff] }
 0xdbb   : > { %v4753_v7 = vsel %vm759_vm1, %v4752_v6, 0.0  ;;  %v15928_v20 = vpack.c.bf16 %v5007_v43, %v5006_v19 }
 0xdbc   : > { %4754 = vadd.xlane.f32.xlu0 %v4753_v7  ;;  %15869 = vmatpush3.bf16.msra.mxu0 %v15868_v21  ;;  %v4997_v7 = vld [vmem:[%s19081_s9 + $0xa8] sm:$0xff]  ;;  %v13534_v21 = vld [vmem:[%s19133_s8 + $0x1] ss:$0 sm:$0xff]  ;;  %s13282_s8 = scalar_lea.sflag [#allocation3], %s658_s22 }
 0xdbd   : > { %15882 = vmatprep.subr.bf16.mxu0 %v16434_v3 }
 0xe49   : > { %v4755_v9 = vpop.xlane.xlu0 %4754 }
 0xe4a   : > { %v4756_v10 = vmul.f32 0.03125, %v4755_v9 }
 0xe4c   : > { %v4757_v13 = vsub.f32 %v4752_v6, %v4756_v10  ;;  %v4996_v6 = vld [vmem:[%s19081_s9 + $0xa0] sm:$0xff]  ;;  %v4998_v10 = vld [vmem:[%s19081_s9 + $0xb0] sm:$0xff] }
 0xe4d   : > { %v15913_v9 = vpack.c.bf16 %v4997_v7, %v4996_v6  ;;  %v5014_v6 = vld [vmem:[%s19081_s9 + $0x130] sm:$0xff]  ;;  %v5015_v7 = vld [vmem:[%s19081_s9 + $0x138] sm:$0xff] }
 0xe4e   : > { %v4758_v14 = vmul.f32 %v4757_v13, %v4757_v13 }
 0xe50   : > { %v4759_v15 = vsel %vm759_vm1, %v4758_v14, 0.0 }
 0xe51   : > { %4760 = vadd.xlane.f32.xlu1 %v4759_v15  ;;  %v5004_v15 = vld [vmem:[%s19081_s9 + $0xe0] sm:$0xff] }
 0xe52   : > { %v15925_v17 = vpack.c.bf16 %v5005_v16, %v5004_v15  ;;  %v5020_v16 = vld [vmem:[%s19081_s9 + $0x160] sm:$0xff] }
 0xede   : > { %v4761_v32 = vpop.xlane.xlu1 %4760 }
 0xedf   : > { %v4762_v34 = vmul.f32 0.03125, %v4761_v32  ;;  %v15898_v32 = vpack.c.bf16 %v4987_v30, %v4986_v29 }
 0xee1   : > { %v4763_v35 = vadd.f32 1e-05, %v4762_v34  ;;  %v4992_v34 = vld [vmem:[%s19081_s9 + $0x80] sm:$0xff] }
 0xee3   : > { %16290 = vrsqrt.f32 %v4763_v35  ;;  %v4993_v35 = vld [vmem:[%s19081_s9 + $0x88] sm:$0xff] }
 0xeed   : > { %v16291_v36 = vpop.eup %16290 }
 0xeee   : > { %v4765_v37 = vmul.f32 %v16291_v36, %v4757_v13  ;;  %v4999_v13 = vld [vmem:[%s19081_s9 + $0xb8] sm:$0xff] }
 0xeef   : > { %v15916_v14 = vpack.c.bf16 %v4999_v13, %v4998_v10  ;;  %v15940_v10 = vpack.c.bf16 %v5015_v7, %v5014_v6  ;;  %v5019_v13 = vld [vmem:[%s19081_s9 + $0x158] sm:$0xff] }
 0xef0   : > { %v4770_v41 = vmul.f32 %v4769_v33, %v4765_v37  ;;  %v15907_v37 = vpack.c.bf16 %v4993_v35, %v4992_v34  ;;  %v13546_v35 = vld [vmem:[%s19082_s10 + $0x5] ss:$0 sm:$0xff] }
 0xef2   : > { %v17430_v12 = vadd.f32 %v4774_v38, %v4770_v41  ;;  %v4994_v38 = vld [vmem:[%s19081_s9 + $0x90] sm:$0xff]  ;;  %v5000_v41 = vld [vmem:[%s19081_s9 + $0xc0] sm:$0xff] }
 0xef3   : > { %v15910_v40 = vpack.c.bf16 %v4995_v39, %v4994_v38 }
 0xef4   : > { %14842 = vmatmul.mubr.msk.f32.vlgmr.msra.gmra.mrb[50].mxu0 %vm759_vm1, %v17430_v12 }
 0xef5   : > { %15884 = vmatpush3.bf16.msra.mxu0 %v15883_v42  ;;  %14871 = vmatprep.mubr.msk.f32.mxu0 %vm16435_vm0, %v16436_v11  ;;  %v5001_v42 = vld [vmem:[%s19081_s9 + $0xc8] sm:$0xff] }
 0xef6   : > { %15885 = vmatprep.subr.bf16.mxu0 %v16434_v3  ;;  %v15919_v44 = vpack.c.bf16 %v5001_v42, %v5000_v41  ;;  %v13548_v41 = vld [vmem:[%s19082_s10 + $0x7] ss:$0 sm:$0xff]  ;;  %v13538_v42 = vld [vmem:[%s19082_s10 + $0x1] ss:$0 sm:$0xff] }
 0xef9   : > { %15887 = vmatpush3.bf16.msra.mxu0 %v15886_v48  ;;  %v5003_v48 = vld [vmem:[%s19081_s9 + $0xd8] sm:$0xff] }
 0xefa   : > { %15888 = vmatprep.subr.bf16.mxu0 %v16434_v3  ;;  %v15922_v49 = vpack.c.bf16 %v5003_v48, %v5002_v47 }
 0xefc   : > { %14872 = vmatmul.mubr.msk.f32.vlgmr.msra.gmra.mrb[52].mxu0 %vm759_vm1, %v17454_v51 }
 0xefd   : > { %15890 = vmatpush3.bf16.msra.mxu0 %v15889_v52  ;;  %14882 = vmatprep.mubr.msk.f32.mxu0 %vm16435_vm0, %v16436_v11  ;;  %v5009_v52 = vld [vmem:[%s19081_s9 + $0x108] sm:$0xff] }
 0xefe   : > { %15891 = vmatprep.subr.bf16.mxu0 %v16434_v3  ;;  %v15931_v53 = vpack.c.bf16 %v5009_v52, %v5008_v50  ;;  %v13540_v50 = vld [vmem:[%s19082_s10 + $0x3] ss:$0 sm:$0xff] }
 0xf01   : > { %15893 = vmatpush3.bf16.msra.mxu0 %v15892_v58  ;;  %v5012_v58 = vld [vmem:[%s19081_s9 + $0x120] sm:$0xff] }
 0xf02   : > { %15900 = vmatprep.subr.bf16.mxu0 %v16434_v3 }
 0xf04   : > { %14883 = vmatmul.mubr.msk.f32.vlgmr.msra.gmra.mrb[54].mxu0 %vm759_vm1, %v17454_v51 }
 0xf05   : > { %15902 = vmatpush3.bf16.msra.mxu0 %v15901_v0  ;;  %14904 = vmatprep.mubr.msk.f32.mxu0 %vm16435_vm0, %v16436_v11  ;;  %v15937_v0 = vpack.c.bf16 %v5013_v60, %v5012_v58 }
 0xf06   : > { %15903 = vmatprep.subr.bf16.mxu0 %v16434_v3 }
 0xf09   : > { %15905 = vmatpush3.bf16.msra.mxu0 %v15904_v5  ;;  %v15943_v5 = vpack.c.bf16 %v5017_v4, %v5016_v2 }
 0xf0a   : > { %15912 = vmatprep.subr.bf16.mxu0 %v16434_v3 }
 0xf0c   : > { %14905 = vmatmul.mubr.msk.f32.vlgmr.msra.gmra.mrb[56].mxu0 %vm759_vm1, %v17454_v51 }
 0xf0d   : > { %15914 = vmatpush3.bf16.msra.mxu0 %v15913_v9  ;;  %14926 = vmatprep.mubr.msk.f32.mxu0 %vm16435_vm0, %v16436_v11  ;;  %v5018_v9 = vld [vmem:[%s19081_s9 + $0x150] sm:$0xff] }
 0xf0e   : > { %15915 = vmatprep.subr.bf16.mxu0 %v16434_v3  ;;  %v15946_v15 = vpack.c.bf16 %v5019_v13, %v5018_v9 }
 0xf11   : > { %15917 = vmatpush3.bf16.msra.mxu0 %v15916_v14 }
 0xf12   : > { %15924 = vmatprep.subr.bf16.mxu0 %v16434_v3 }
 0xf14   : > { %14927 = vmatmul.mubr.msk.f32.vlgmr.msra.gmra.mrb[58].mxu0 %vm759_vm1, %v17454_v51 }
 0xf15   : > { %15926 = vmatpush3.bf16.msra.mxu0 %v15925_v17  ;;  %14948 = vmatprep.mubr.msk.f32.mxu0 %vm16435_vm0, %v16436_v11  ;;  %v5021_v17 = vld [vmem:[%s19081_s9 + $0x168] sm:$0xff] }
 0xf16   : > { %15927 = vmatprep.subr.bf16.mxu0 %v16434_v3  ;;  %v15949_v43 = vpack.c.bf16 %v5021_v17, %v5020_v16 }
 0xf19   : > { %15929 = vmatpush3.bf16.msra.mxu0 %v15928_v20  ;;  %v5022_v20 = vld [vmem:[%s19081_s9 + $0x170] sm:$0xff] }
 0xf1a   : > { %15936 = vmatprep.subr.bf16.mxu0 %v16434_v3 }
 0xf1c   : > { %14949 = vmatmul.mubr.msk.f32.vlgmr.msra.gmra.mrb[60].mxu0 %vm759_vm1, %v17454_v51 }
 0xf1d   : > { %14970 = vmatprep.mubr.msk.f32.mxu0 %vm16435_vm0, %v16436_v11  ;;  %15938 = vmatpush3.bf16.msra.mxu0 %v15937_v0 }
 0xf1e   : > { %15939 = vmatprep.subr.bf16.mxu0 %v16434_v3 }
 0xf21   : > { %15941 = vmatpush3.bf16.msra.mxu0 %v15940_v10  ;;  %v6266_v10 = vand.u32 127, %v2595_v62 }
 0xf22   : > { %15948 = vmatprep.subr.bf16.mxu0 %v16434_v3 }
 0xf23   : > { %vm17732_vm4 = vcmp.ge.s32.totalorder %v16942_v1, %v6266_v10  ;;  %v13555_v10 = vld [vmem:[%s19082_s10 + $0xa] ss:$0 sm:$0xff] }
 0xf24   : > { %14971 = vmatmul.mubr.msk.f32.vlgmr.msra.gmra.mrb[62].mxu0 %vm759_vm1, %v17454_v51 }
 0xf25   : > { %15950 = vmatpush3.bf16.msra.mxu0 %v15949_v43  ;;  %14992 = vmatprep.mubr.msk.f32.mxu0 %vm16435_vm0, %v16436_v11 }
 0xf26   : > { %15951 = vmatprep.subr.bf16.mxu0 %v16434_v3 }
 0xfc7   : > { %v4867_v25 = vpop.f32.mrb[50].mxu0 }
 0xfc8   : > { %v4868_v26 = vadd.f32 %v13534_v21, %v4867_v25  ;;  %v14843_v27 = vpop.f32.mrb[51].mxu0  ;;  %v5023_v21 = vld [vmem:[%s19081_s9 + $0x178] sm:$0xff] }
 0xfc9   : > { %v15952_v23 = vpack.c.bf16 %v5023_v21, %v5022_v20 }
 0xfca   : > { %v4871_v28 = vmax.f32 %v4868_v26, 0.0 }
 0xfcb   : > { %15953 = vmatpush3.bf16.msra.mxu0 %v15952_v23 }
 0xfcc   : > { %14861 = vmatmul.mubr.msk.f32.vlgmr.msra.gmra.mrb[50].mxu1 %vm2722_vm3, %v4871_v28  ;;  %15005 = vmatprep.subr.mxu0 %v16436_v11 }
 0xfcd   : > { %15896 = vmatpush3.bf16.msra.mxu1 %v15895_v22  ;;  %14893 = vmatprep.mubr.msk.f32.mxu1 %vm16435_vm0, %v16436_v11 }
 0xfce   : > { %15897 = vmatprep.subr.bf16.mxu1 %v16434_v3  ;;  %14993 = vmatmul.mubr.msk.f32.vlgmr.msra.gmra.mrb[64].mxu0 %vm759_vm1, %v17454_v51 }
 0xfcf   : > { %v17559_v33 = vpop.f32.mrb[52].mxu0  ;;  %15007 = vmatprep.mubr.msk.f32.mxu0 %vm16435_vm0, %v16436_v11 }
 0xfd0   : > { %v14873_v36 = vpop.f32.mrb[53].mxu0 }
 0xfd1   : > { %15899 = vmatpush3.bf16.msra.mxu1 %v15898_v32  ;;  %v13545_v32 = vld [vmem:[%s19082_s10 + $0x4] ss:$0 sm:$0xff]  ;;  %v13537_v36 = vld [vmem:[%s19082_s10] ss:$0 sm:$0xff] }
 0xfd2   : > { %15906 = vmatprep.subr.bf16.mxu1 %v16434_v3 }
 0xfd4   : > { %14894 = vmatmul.mubr.msk.f32.vlgmr.msra.gmra.mrb[52].mxu1 %vm759_vm1, %v17454_v51 }
 0xfd5   : > { %15908 = vmatpush3.bf16.msra.mxu1 %v15907_v37  ;;  %14915 = vmatprep.mubr.msk.f32.mxu1 %vm16435_vm0, %v16436_v11 }
 0xfd6   : > { %15909 = vmatprep.subr.bf16.mxu1 %v16434_v3 }
 0xfd7   : > { %v17609_v57 = vpop.f32.mrb[54].mxu0 }
 0xfd8   : > { %v14884_v63 = vpop.f32.mrb[55].mxu0 }
 0xfd9   : > { %15911 = vmatpush3.bf16.msra.mxu1 %v15910_v40  ;;  %v5134_v40 = vadd.f32 %v13537_v36, %v17559_v33  ;;  %v5204_v33 = vadd.f32 %v13538_v42, %v17609_v57  ;;  %v13554_v63 = vld [vmem:[%s19082_s10 + $0x9] ss:$0 sm:$0xff] }
 0xfda   : > { %15918 = vmatprep.subr.bf16.mxu1 %v16434_v3 }
 0xfdc   : > { %14916 = vmatmul.mubr.msk.f32.vlgmr.msra.gmra.mrb[54].mxu1 %vm759_vm1, %v17454_v51 }
 0xfdd   : > { %15920 = vmatpush3.bf16.msra.mxu1 %v15919_v44  ;;  %14937 = vmatprep.mubr.msk.f32.mxu1 %vm16435_vm0, %v16436_v11  ;;  %v13547_v44 = vld [vmem:[%s19082_s10 + $0x6] ss:$0 sm:$0xff] }
 0xfde   : > { %15921 = vmatprep.subr.bf16.mxu1 %v16434_v3 }
 0xfdf   : > { %v5343_v14 = vpop.f32.mrb[56].mxu0 }
 0xfe0   : > { %v14906_v19 = vpop.f32.mrb[57].mxu0  ;;  %v5344_v55 = vadd.f32 %v13540_v50, %v5343_v14 }
 0xfe1   : > { %15923 = vmatpush3.bf16.msra.mxu1 %v15922_v49  ;;  %v13539_v49 = vld [vmem:[%s19082_s10 + $0x2] ss:$0 sm:$0xff] }
 0xfe2   : > { %15930 = vmatprep.subr.bf16.mxu1 %v16434_v3 }
 0xfe4   : > { %14938 = vmatmul.mubr.msk.f32.vlgmr.msra.gmra.mrb[56].mxu1 %vm759_vm1, %v17454_v51 }
 0xfe5   : > { %15932 = vmatpush3.bf16.msra.mxu1 %v15931_v53  ;;  %14959 = vmatprep.mubr.msk.f32.mxu1 %vm16435_vm0, %v16436_v11 }
 0xfe6   : > { %15933 = vmatprep.subr.bf16.mxu1 %v16434_v3 }
 0xfe7   : > { %v5507_v24 = vpop.f32.mrb[58].mxu0 }
 0xfe8   : > { %v14928_v25 = vpop.f32.mrb[59].mxu0  ;;  %v5508_v39 = vadd.f32 %v13546_v35, %v5507_v24 }
 0xfe9   : > { %15935 = vmatpush3.bf16.msra.mxu1 %v15934_v56  ;;  %v13553_v56 = vld [vmem:[%s19082_s10 + $0x8] ss:$0 sm:$0xff] }
 0xfea   : > { %15942 = vmatprep.subr.bf16.mxu1 %v16434_v3 }
 0xfec   : > { %14960 = vmatmul.mubr.msk.f32.vlgmr.msra.gmra.mrb[58].mxu1 %vm759_vm1, %v17454_v51 }
 0xfed   : > { %15944 = vmatpush3.bf16.msra.mxu1 %v15943_v5  ;;  %14981 = vmatprep.mubr.msk.f32.mxu1 %vm16435_vm0, %v16436_v11 }
 0xfee   : > { %15945 = vmatprep.subr.bf16.mxu1 %v16434_v3 }
 0xfef   : > { %v5647_v26 = vpop.f32.mrb[60].mxu0 }
 0xff0   : > { %v14950_v27 = vpop.f32.mrb[61].mxu0  ;;  %v5648_v47 = vadd.f32 %v13548_v41, %v5647_v26 }
 0xff1   : > { %15947 = vmatpush3.bf16.msra.mxu1 %v15946_v15 }
 0xff2   : > { %14995 = vmatprep.subr.mxu1 %v16436_v11 }
 0xff4   : > { %14982 = vmatmul.mubr.msk.f32.vlgmr.msra.gmra.mrb[60].mxu1 %vm759_vm1, %v17454_v51 }
 0xff5   : > { %14997 = vmatprep.mubr.msk.f32.mxu1 %vm16435_vm0, %v16436_v11 }
 0xff7   : > { %v5811_v0 = vpop.f32.mrb[62].mxu0 }
 0xff8   : > { %v5812_v2 = vadd.f32 %v13554_v63, %v5811_v0  ;;  %v14972_v4 = vpop.f32.mrb[63].mxu0 }
0x109f   : > { %v17670_v22 = vpop.f32.mrb[50].mxu1 }
0x10a0   : > { %v14862_v28 = vpop.f32.mrb[51].mxu1 }
0x10a1   : > { %v17728_v7 = vpop.f32.mrb[64].mxu0 }
0x10a2   : > { %v14994_v9 = vpop.f32.mrb[65].mxu0 }
0x10a7   : > { %v5273_v29 = vpop.f32.mrb[52].mxu1 }
0x10a8   : > { %v14895_v30 = vpop.f32.mrb[53].mxu1  ;;  %v5274_v54 = vadd.f32 %v13539_v49, %v5273_v29 }
0x10af   : > { %v5437_v34 = vpop.f32.mrb[54].mxu1 }
0x10b0   : > { %v5438_v37 = vadd.f32 %v13545_v32, %v5437_v34  ;;  %v14917_v38 = vpop.f32.mrb[55].mxu1 }
0x10b2   : > { %14996 = vmatpush3.xpose.msk.msra.mxu1 %vm1651_vm2, %v5438_v37 }
0x10b3   : > { %15000 = vmatprep.subr.mxu1 %v16436_v11 }
0x10b5   : > { %14998 = vmatmul.mubr.msk.f32.vlgmr.msra.gmra.mrb[62].mxu1 %vm1651_vm2, %v5134_v40 }
0x10b6   : > { %15001 = vmatpush3.xpose.msk.msra.mxu1 %vm1651_vm2, %v5508_v39  ;;  %15002 = vmatprep.mubr.msk.f32.mxu1 %vm16435_vm0, %v16436_v11 }
0x10b7   : > { %v5577_v48 = vpop.f32.mrb[56].mxu1  ;;  %15010 = vmatprep.subr.mxu1 %v16436_v11 }
0x10b8   : > { %v5578_v52 = vadd.f32 %v13547_v44, %v5577_v48  ;;  %v14939_v53 = vpop.f32.mrb[57].mxu1 }
0x10b9   : > { %15003 = vmatmul.mubr.msk.f32.vlgmr.msra.gmra.mrb[64].mxu1 %vm1651_vm2, %v5204_v33 }
0x10ba   : > { %15006 = vmatpush3.xpose.msk.msra.mxu0 %vm1651_vm2, %v5578_v52  ;;  %15011 = vmatpush3.xpose.msk.msra.mxu1 %vm1651_vm2, %v5648_v47  ;;  %v4875_v52 = vrot.slane %v17377_v59, %v17023_v61 }
0x10bb   : > { %15012 = vmatprep.mubr.msk.f32.mxu1 %vm16435_vm0, %v16436_v11  ;;  %15015 = vmatprep.subr.mxu0 %v16436_v11 }
0x10bc   : > { %15020 = vmatprep.subr.mxu1 %v16436_v11 }
0x10bd   : > { %15008 = vmatmul.mubr.msk.f32.vlgmr.msra.gmra.mrb[66].mxu0 %vm1651_vm2, %v5274_v54  ;;  %15013 = vmatmul.mubr.msk.f32.vlgmr.msra.gmra.mrb[66].mxu1 %vm1651_vm2, %v5344_v55  ;;  %v4946_v55 = vadd.f32 %v17670_v22, %v4875_v52 }
0x10be   : > { %15017 = vmatprep.mubr.msk.f32.mxu0 %vm16435_vm0, %v16436_v11  ;;  %15022 = vmatprep.mubr.msk.f32.mxu1 %vm16435_vm0, %v16436_v11 }
0x10bf   : > { %v5741_v57 = vpop.f32.mrb[58].mxu1  ;;  %15021 = vmatpush3.msra.mxu1 %v5812_v2  ;;  %v4949_v63 = vadd.f32 %v4946_v55, %v17430_v12 }
0x10c0   : > { %v5742_v58 = vadd.f32 %v13553_v56, %v5741_v57  ;;  %v14961_v60 = vpop.f32.mrb[59].mxu1  ;;  %15030 = vmatprep.subr.mxu1 %v16436_v11 }
0x10c1   : > { %v4950_v2 = vsel %vm759_vm1, %v4949_v63, 0.0 }
0x10c2   : > { %15016 = vmatpush3.msra.mxu0 %v5742_v58 }
0x10c3   : > { %15025 = vmatprep.subr.mxu0 %v16436_v11 }
0x10c7   : > { %v17725_v5 = vpop.f32.mrb[60].mxu1 }
0x10c8   : > { %v14983_v6 = vpop.f32.mrb[61].mxu1 }
0x1188   : > { %v6027_v13 = vpop.f32.mrb[62].mxu1 }
0x1189   : > { %v6259_v15 = vmul.f32 0.35355338, %v6027_v13  ;;  %v14999_v16 = vpop.f32.mrb[63].mxu1 }
0x118a   : > { %v5882_v16 = vadd.f32 %v13555_v10, %v17725_v5 }
0x118b   : > { %v6268_v17 = vsel %vm17732_vm4, -1e+09, %v6259_v15 }
0x118c   : > { %v6103_v19 = vpop.f32.mrb[64].mxu1  ;;  %v6272_v43 = vsel %vm1651_vm2, %v6268_v17, -inf }
0x118d   : > { %v6260_v20 = vmul.f32 0.35355338, %v6103_v19  ;;  %6273 = vmax.xlane.f32.xlu0 %v6272_v43  ;;  %v15004_v21 = vpop.f32.mrb[65].mxu1  ;;  %v13556_v19 = vld [vmem:[%s19082_s10 + $0xb] ss:$0 sm:$0xff] }
0x118f   : > { %v6269_v62 = vsel %vm17732_vm4, -1e+09, %v6260_v20 }
0x1190   : > { %v6179_v23 = vpop.f32.mrb[66].mxu0  ;;  %v6255_v24 = vpop.f32.mrb[66].mxu1  ;;  %v6275_v25 = vsel %vm1651_vm2, %v6269_v62, -inf }
0x1191   : > { %v6261_v26 = vmul.f32 0.35355338, %v6179_v23  ;;  %v6262_v27 = vmul.f32 0.35355338, %v6255_v24  ;;  %6276 = vmax.xlane.f32.xlu1 %v6275_v25  ;;  %v15009_v28 = vpop.f32.mrb[67].mxu0  ;;  %v15014_v29 = vpop.f32.mrb[67].mxu1 }
0x1192   : > { %v5037_v28 = vld [vmem:[%s19083_s11 + $0x8] sm:$0xff]  ;;  %v5038_v29 = vld [vmem:[%s19083_s11 + $0x10] sm:$0xff] }
0x1193   : > { %v6271_v30 = vsel %vm17732_vm4, -1e+09, %v6262_v27  ;;  %v6270_v32 = vsel %vm17732_vm4, -1e+09, %v6261_v26 }
0x1194   : > { %v6281_v34 = vsel %vm1651_vm2, %v6271_v30, -inf  ;;  %v6278_v35 = vsel %vm1651_vm2, %v6270_v32, -inf }
0x1195   : > { %6282 = vmax.xlane.f32.xlu1 %v6281_v34  ;;  %6279 = vmax.xlane.f32.xlu0 %v6278_v35  ;;  %v5039_v34 = vld [vmem:[%s19083_s11 + $0x18] sm:$0xff] }
0x121a   : > { %v6274_v36 = vpop.xlane.xlu0 %6273 }
0x121b   : > { %v6284_v37 = vsub.f32 %v6268_v17, %v6274_v36 }
0x121d   : > { %v6288_v38 = vmul.f32 1.442695, %v6284_v37 }
0x121e   : > { %v6277_v39 = vpop.xlane.xlu1 %6276 }
0x121f   : > { %16292 = vpow2.f32 %v6288_v38  ;;  %v6285_v40 = vsub.f32 %v6269_v62, %v6277_v39  ;;  %v5952_v62 = vadd.f32 %v13556_v19, %v17728_v7  ;;  %v5036_v7 = vld [vmem:[%s19083_s11] sm:$0xff] }
0x1221   : > { %v6290_v41 = vmul.f32 1.442695, %v6285_v40 }
0x1222   : > { %v6283_v42 = vpop.xlane.xlu1 %6282  ;;  %v6280_v44 = vpop.xlane.xlu0 %6279 }
0x1223   : > { %16294 = vpow2.f32 %v6290_v41  ;;  %v6287_v47 = vsub.f32 %v6271_v30, %v6283_v42  ;;  %v6286_v33 = vsub.f32 %v6270_v32, %v6280_v44 }
0x1225   : > { %v6294_v48 = vmul.f32 1.442695, %v6287_v47  ;;  %v6292_v49 = vmul.f32 1.442695, %v6286_v33 }
0x1227   : > { %16296 = vpow2.f32 %v6294_v48 }
0x1228   : > { %16298 = vpow2.f32 %v6292_v49 }
0x1229   : > { %v16293_v50 = vpop.eup %16292 }
0x122a   : > { %v6296_v53 = vsel %vm1651_vm2, %v16293_v50, 0.0 }
0x122b   : > { %6297 = vadd.xlane.f32.xlu0 %v6296_v53 }
0x122d   : > { %v16295_v54 = vpop.eup %16294 }
0x122e   : > { %v6299_v56 = vsel %vm1651_vm2, %v16295_v54, 0.0 }
0x122f   : > { %6300 = vadd.xlane.f32.xlu1 %v6299_v56 }
0x1231   : > { %v16297_v57 = vpop.eup %16296 }
0x1232   : > { %v16299_v58 = vpop.eup %16298  ;;  %v6305_v60 = vsel %vm1651_vm2, %v16297_v57, 0.0 }
0x1233   : > { %6306 = vadd.xlane.f32.xlu1 %v6305_v60  ;;  %v6302_v0 = vsel %vm1651_vm2, %v16299_v58, 0.0 }
0x1234   : > { %6303 = vadd.xlane.f32.xlu0 %v6302_v0 }
0x1237   : > { %4951 = vadd.xlane.f32.xlu1 %v4950_v2 }
0x12b8   : > { %v6298_v4 = vpop.xlane.xlu0 %6297 }
0x12b9   : > { %16300 = vrcp.f32 %v6298_v4 }
0x12bc   : > { %v6301_v6 = vpop.xlane.xlu1 %6300 }
0x12bd   : > { %16302 = vrcp.f32 %v6301_v6 }
0x12c0   : > { %v6307_v22 = vpop.xlane.xlu1 %6306 }
0x12c1   : > { %16304 = vrcp.f32 %v6307_v22  ;;  %v6304_v9 = vpop.xlane.xlu0 %6303 }
0x12c2   : > { %16306 = vrcp.f32 %v6304_v9 }
0x12c3   : > { %v16301_v12 = vpop.eup %16300 }
0x12c4   : > { %v6309_v13 = vmul.f32 %v16301_v12, %v16293_v50  ;;  %v4952_v15 = vpop.xlane.xlu1 %4951  ;;  %v17817_v50 = vld [vmem:[%s19089_s17] sm:$0xff] }
0x12c5   : > { %v4953_v17 = vmul.f32 0.03125, %v4952_v15  ;;  %v6937_v15 = vld [vmem:[%s19084_s12 + $0x8] sm:$0xff] }
0x12c6   : > { %15018 = vmatmul.mubr.msk.f32.vlgmr.msra.gmra.mrb[68].mxu0 %vm1651_vm2, %v6309_v13  ;;  %v6936_v13 = vld [vmem:[%s19084_s12] sm:$0xff] }
0x12c7   : > { %v16303_v43 = vpop.eup %16302  ;;  %v17765_v20 = vsub.f32 %v4949_v63, %v4953_v17  ;;  %15026 = vmatpush3.msra.mxu0 %v5882_v16  ;;  %15027 = vmatprep.mubr.msk.f32.mxu0 %vm16435_vm0, %v16436_v11  ;;  %v15955_v16 = vpack.c.bf16 %v6937_v15, %v6936_v13  ;;  %v6941_v17 = vld [vmem:[%s19084_s12 + $0x28] sm:$0xff]  ;;  %v4971_v13 = vrot.slane %v17377_v59, %v17061_v31 }
0x12c8   : > { %v6311_v21 = vmul.f32 %v16303_v43, %v16295_v54  ;;  %15035 = vmatprep.subr.mxu0 %v16436_v11  ;;  %v6938_v43 = vld [vmem:[%s19084_s12 + $0x10] sm:$0xff] }
0x12c9   : > { %v4955_v5 = vmul.f32 %v17765_v20, %v17765_v20 }
0x12ca   : > { %15023 = vmatmul.mubr.msk.f32.vlgmr.msra.gmra.mrb[68].mxu1 %vm1651_vm2, %v6311_v21  ;;  %v6939_v21 = vld [vmem:[%s19084_s12 + $0x18] sm:$0xff] }
0x12cb   : > { %v16305_v23 = vpop.eup %16304  ;;  %15031 = vmatpush3.msra.mxu1 %v5952_v62  ;;  %v4956_v24 = vsel %vm759_vm1, %v4955_v5, 0.0  ;;  %15032 = vmatprep.mubr.msk.f32.mxu1 %vm16435_vm0, %v16436_v11  ;;  %v6942_v62 = vld [vmem:[%s19084_s12 + $0x30] sm:$0xff]  ;;  %v15958_v5 = vpack.c.bf16 %v6939_v21, %v6938_v43 }
0x12cc   : > { %v16307_v25 = vpop.eup %16306  ;;  %v6315_v26 = vmul.f32 %v16305_v23, %v16297_v57  ;;  %4957 = vadd.xlane.f32.xlu1 %v4956_v24  ;;  %15040 = vmatprep.subr.mxu1 %v16436_v11  ;;  %v6943_v23 = vld [vmem:[%s19084_s12 + $0x38] sm:$0xff]  ;;  %v6962_v43 = vld [vmem:[%s19084_s12 + $0xd0] sm:$0xff] }
0x12cd   : > { %v6313_v27 = vmul.f32 %v16307_v25, %v16299_v58  ;;  %v6910_v58 = vrot.slane %v17817_v50, %v16947_v8  ;;  %v15964_v24 = vpack.c.bf16 %v6943_v23, %v6942_v62  ;;  %v6963_v62 = vld [vmem:[%s19084_s12 + $0xd8] sm:$0xff] }
0x12ce   : > { %15033 = vmatmul.mubr.msk.f32.vlgmr.msra.gmra.mrb[70].mxu1 %vm1651_vm2, %v6315_v26  ;;  %v6967_v23 = vld [vmem:[%s19084_s12 + $0xf8] sm:$0xff] }
0x12cf   : > { %15028 = vmatmul.mubr.msk.f32.vlgmr.msra.gmra.mrb[70].mxu0 %vm1651_vm2, %v6313_v27  ;;  %15042 = vmatprep.mubr.msk.f32.mxu1 %vm16435_vm0, %v16436_v11 }
0x12d0   : > { %15037 = vmatprep.mubr.msk.f32.mxu0 %vm16435_vm0, %v16436_v11  ;;  %15036 = vmatpush3.msra.mxu0 %v5036_v7 }
0x12d1   : > { %15045 = vmatprep.subr.mxu0 %v16436_v11  ;;  %15041 = vmatpush3.msra.mxu1 %v5037_v28 }
0x12d2   : > { %15050 = vmatprep.subr.mxu1 %v16436_v11 }
0x1359   : > { %v4958_v7 = vpop.xlane.xlu1 %4957 }
0x135a   : > { %v4959_v28 = vmul.f32 0.03125, %v4958_v7  ;;  %v6972_v7 = vld [vmem:[%s19084_s12 + $0x120] sm:$0xff] }
0x1399   : > { %v6385_v30 = vpop.f32.mrb[68].mxu0 }
0x139a   : > { %v15019_v32 = vpop.f32.mrb[69].mxu0  ;;  %15038 = vmatmul.mubr.msk.f32.vlgmr.msra.gmra.mrb[72].mxu0 %vm1651_vm2, %v6385_v30  ;;  %v6929_v30 = vrot.slane %v17817_v50, %v16997_v45 }
0x139b   : > { %15046 = vmatpush3.msra.mxu0 %v5038_v29  ;;  %15047 = vmatprep.mubr.msk.f32.mxu0 %vm16435_vm0, %v16436_v11  ;;  %v4960_v29 = vadd.f32 1e-05, %v4959_v28  ;;  %v6973_v28 = vld [vmem:[%s19084_s12 + $0x128] sm:$0xff] }
0x139c   : > { %15954 = vmatprep.subr.bf16.mxu0 %v16434_v3 }
0x139d   : > { %v6458_v35 = vpop.f32.mrb[68].mxu1 }
0x139e   : > { %v15024_v36 = vpop.f32.mrb[69].mxu1  ;;  %15043 = vmatmul.mubr.msk.f32.vlgmr.msra.gmra.mrb[72].mxu1 %vm1651_vm2, %v6458_v35 }
0x139f   : > { %15051 = vmatpush3.msra.mxu1 %v5039_v34  ;;  %15052 = vmatprep.mubr.msk.f32.mxu1 %vm16435_vm0, %v16436_v11  ;;  %v6944_v34 = vld [vmem:[%s19084_s12 + $0x40] sm:$0xff]  ;;  %v6934_v36 = vrot.slane %v17817_v50, %v17000_v46 }
0x13a0   : > { %15960 = vmatprep.subr.bf16.mxu1 %v16434_v3 }
0x13a1   : > { %v6604_v37 = vpop.f32.mrb[70].mxu1 }
0x13a2   : > { %v6531_v38 = vpop.f32.mrb[70].mxu0  ;;  %v15034_v39 = vpop.f32.mrb[71].mxu1  ;;  %15053 = vmatmul.mubr.msk.f32.vlgmr.msra.gmra.mrb[74].mxu1 %vm1651_vm2, %v6604_v37  ;;  %v6945_v37 = vld [vmem:[%s19084_s12 + $0x48] sm:$0xff] }
0x13a3   : > { %v15029_v40 = vpop.f32.mrb[71].mxu0  ;;  %15048 = vmatmul.mubr.msk.f32.vlgmr.msra.gmra.mrb[74].mxu0 %vm1651_vm2, %v6531_v38  ;;  %15074 = vmatprep.mubr.msk.f32.mxu1 %vm16435_vm0, %v16436_v11  ;;  %v6948_v38 = vld [vmem:[%s19084_s12 + $0x60] sm:$0xff]  ;;  %v6949_v39 = vld [vmem:[%s19084_s12 + $0x68] sm:$0xff] }
0x13a4   : > { %15063 = vmatprep.mubr.msk.f32.mxu0 %vm16435_vm0, %v16436_v11  ;;  %15956 = vmatpush3.bf16.msra.mxu0 %v15955_v16  ;;  %v6964_v16 = vld [vmem:[%s19084_s12 + $0xe0] sm:$0xff] }
0x13a5   : > { %15957 = vmatprep.subr.bf16.mxu0 %v16434_v3 }
0x13a8   : > { %15959 = vmatpush3.bf16.msra.mxu0 %v15958_v5  ;;  %v6966_v5 = vld [vmem:[%s19084_s12 + $0xf0] sm:$0xff] }
0x13a9   : > { %15966 = vmatprep.subr.bf16.mxu0 %v16434_v3 }
0x146d   : > { %v6677_v41 = vpop.f32.mrb[72].mxu0 }
0x146e   : > { %v15039_v42 = vpop.f32.mrb[73].mxu0  ;;  %v6900_v47 = vsel %vm759_vm1, %v6677_v41, 0.0  ;;  %v15967_v41 = vpack.c.bf16 %v6945_v37, %v6944_v34  ;;  %v6971_v34 = vld [vmem:[%s19084_s12 + $0x118] sm:$0xff] }
0x146f   : > { %v15973_v42 = vpack.c.bf16 %v6949_v39, %v6948_v38  ;;  %v6976_v39 = vld [vmem:[%s19084_s12 + $0x140] sm:$0xff] }
0x1471   : > { %v6750_v44 = vpop.f32.mrb[72].mxu1 }
0x1472   : > { %v6901_v33 = vsel %vm759_vm1, %v6750_v44, 0.0  ;;  %v15044_v48 = vpop.f32.mrb[73].mxu1  ;;  %v6946_v44 = vld [vmem:[%s19084_s12 + $0x50] sm:$0xff] }
0x1473   : > { %v6902_v49 = vadd.f32 %v6901_v33, %v6900_v47  ;;  %v6947_v33 = vld [vmem:[%s19084_s12 + $0x58] sm:$0xff]  ;;  %v6950_v48 = vld [vmem:[%s19084_s12 + $0x70] sm:$0xff] }
0x1475   : > { %v6896_v52 = vpop.f32.mrb[74].mxu1 }
0x1476   : > { %v6823_v53 = vpop.f32.mrb[74].mxu0  ;;  %v15054_v54 = vpop.f32.mrb[75].mxu1  ;;  %v6905_v60 = vsel %vm759_vm1, %v6896_v52, 0.0  ;;  %v15970_v52 = vpack.c.bf16 %v6947_v33, %v6946_v44 }
0x1477   : > { %v6903_v55 = vsel %vm759_vm1, %v6823_v53, 0.0  ;;  %v15049_v56 = vpop.f32.mrb[75].mxu0  ;;  %v6952_v54 = vld [vmem:[%s19084_s12 + $0x80] sm:$0xff] }
0x1478   : > { %v6904_v57 = vadd.f32 %v6903_v55, %v6902_v49  ;;  %v6951_v49 = vld [vmem:[%s19084_s12 + $0x78] sm:$0xff]  ;;  %v6953_v55 = vld [vmem:[%s19084_s12 + $0x88] sm:$0xff]  ;;  %v6956_v56 = vld [vmem:[%s19084_s12 + $0xa0] sm:$0xff] }
0x1479   : > { %v15976_v53 = vpack.c.bf16 %v6951_v49, %v6950_v48  ;;  %v6978_v48 = vld [vmem:[%s19084_s12 + $0x150] sm:$0xff]  ;;  %v6979_v49 = vld [vmem:[%s19084_s12 + $0x158] sm:$0xff] }
0x147a   : > { %v6906_v63 = vadd.f32 %v6905_v60, %v6904_v57  ;;  %v6957_v57 = vld [vmem:[%s19084_s12 + $0xa8] sm:$0xff]  ;;  %v15979_v60 = vpack.c.bf16 %v6953_v55, %v6952_v54  ;;  %v16018_v54 = vpack.c.bf16 %v6979_v49, %v6978_v48 }
0x147c   : > { %v6911_v0 = vadd.f32 %v6910_v58, %v6906_v63  ;;  %v15985_v63 = vpack.c.bf16 %v6957_v57, %v6956_v56 }
0x147e   : > { %v6912_v2 = vadd.f32 %v6911_v0, %v17454_v51  ;;  %v6940_v51 = vld [vmem:[%s19084_s12 + $0x20] sm:$0xff]  ;;  %v6954_v0 = vld [vmem:[%s19084_s12 + $0x90] sm:$0xff] }
0x147f   : > { %v15961_v19 = vpack.c.bf16 %v6941_v17, %v6940_v51  ;;  %v6961_v51 = vld [vmem:[%s19084_s12 + $0xc8] sm:$0xff] }
0x1480   : > { %v6913_v4 = vsel %vm759_vm1, %v6912_v2, 0.0  ;;  %v6965_v17 = vld [vmem:[%s19084_s12 + $0xe8] sm:$0xff] }
0x1481   : > { %6914 = vadd.xlane.f32.xlu0 %v6913_v4  ;;  %15962 = vmatpush3.bf16.msra.mxu1 %v15961_v19  ;;  %v15997_v19 = vpack.c.bf16 %v6965_v17, %v6964_v16 }
0x1482   : > { %15963 = vmatprep.subr.bf16.mxu1 %v16434_v3 }
0x1485   : > { %15965 = vmatpush3.bf16.msra.mxu1 %v15964_v24  ;;  %v15994_v24 = vpack.c.bf16 %v6963_v62, %v6962_v43  ;;  %v13588_v43 = vld [vmem:[%s19085_s13 + $0x7] ss:$0 sm:$0xff] }
0x1486   : > { %15972 = vmatprep.subr.bf16.mxu1 %v16434_v3 }
0x150e   : > { %v6915_v6 = vpop.xlane.xlu0 %6914 }
0x150f   : > { %v6916_v22 = vmul.f32 0.03125, %v6915_v6  ;;  %v6955_v6 = vld [vmem:[%s19084_s12 + $0x98] sm:$0xff] }
0x1511   : > { %v6917_v9 = vsub.f32 %v6912_v2, %v6916_v22  ;;  %v4966_v2 = vrot.slane %v17377_v59, %v17058_v18  ;;  %v6958_v22 = vld [vmem:[%s19084_s12 + $0xb0] sm:$0xff] }
0x1513   : > { %v6918_v10 = vmul.f32 %v6917_v9, %v6917_v9 }
0x1515   : > { %v6919_v12 = vsel %vm759_vm1, %v6918_v10, 0.0 }
0x1516   : > { %6920 = vadd.xlane.f32.xlu0 %v6919_v12  ;;  %v6960_v12 = vld [vmem:[%s19084_s12 + $0xc0] sm:$0xff] }
0x1517   : > { %v15991_v59 = vpack.c.bf16 %v6961_v51, %v6960_v12  ;;  %v13578_v12 = vld [vmem:[%s19085_s13 + $0x1] ss:$0 sm:$0xff] }
0x15a3   : > { %v6921_v25 = vpop.xlane.xlu0 %6920 }
0x15a4   : > { %v6922_v26 = vmul.f32 0.03125, %v6921_v25  ;;  %v16000_v25 = vpack.c.bf16 %v6967_v23, %v6966_v5  ;;  %v13579_v23 = vld [vmem:[%s19085_s13 + $0x2] ss:$0 sm:$0xff] }
0x15a6   : > { %v6923_v27 = vadd.f32 1e-05, %v6922_v26  ;;  %v6968_v26 = vld [vmem:[%s19084_s12 + $0x100] sm:$0xff] }
0x15a8   : > { %16308 = vrsqrt.f32 %v6923_v27  ;;  %v6969_v27 = vld [vmem:[%s19084_s12 + $0x108] sm:$0xff] }
0x15a9   : > { %16310 = vrsqrt.f32 %v4960_v29  ;;  %v16003_v29 = vpack.c.bf16 %v6969_v27, %v6968_v26 }
0x15b2   : > { %v16309_v32 = vpop.eup %16308 }
0x15b3   : > { %v6925_v35 = vmul.f32 %v16309_v32, %v6917_v9  ;;  %v16311_v58 = vpop.eup %16310  ;;  %v6959_v9 = vld [vmem:[%s19084_s12 + $0xb8] sm:$0xff]  ;;  %v6970_v32 = vld [vmem:[%s19084_s12 + $0x110] sm:$0xff] }
0x15b4   : > { %v4962_v4 = vmul.f32 %v16311_v58, %v17765_v20  ;;  %v15982_v20 = vpack.c.bf16 %v6955_v6, %v6954_v0  ;;  %v15988_v10 = vpack.c.bf16 %v6959_v9, %v6958_v22  ;;  %v16006_v37 = vpack.c.bf16 %v6971_v34, %v6970_v32  ;;  %v13585_v6 = vld [vmem:[%s19085_s13 + $0x4] ss:$0 sm:$0xff]  ;;  %v13586_v22 = vld [vmem:[%s19085_s13 + $0x5] ss:$0 sm:$0xff]  ;;  %v13594_v32 = vld [vmem:[%s19085_s13 + $0x9] ss:$0 sm:$0xff] }
0x15b5   : > { %v6930_v40 = vmul.f32 %v6929_v30, %v6925_v35  ;;  %v16009_v30 = vpack.c.bf16 %v6973_v28, %v6972_v7  ;;  %v6974_v35 = vld [vmem:[%s19084_s12 + $0x130] sm:$0xff] }
0x15b6   : > { %v4967_v15 = vmul.f32 %v4966_v2, %v4962_v4 }
0x15b7   : > { %v17873_v47 = vadd.f32 %v6934_v36, %v6930_v40  ;;  %v6975_v36 = vld [vmem:[%s19084_s12 + $0x138] sm:$0xff]  ;;  %v6977_v40 = vld [vmem:[%s19084_s12 + $0x148] sm:$0xff] }
0x15b8   : > { %v17950_v21 = vadd.f32 %v4971_v13, %v4967_v15  ;;  %v16012_v38 = vpack.c.bf16 %v6975_v36, %v6974_v35  ;;  %v16015_v44 = vpack.c.bf16 %v6977_v40, %v6976_v39 }
0x15b9   : > { %15064 = vmatmul.mubr.msk.f32.vlgmr.msra.gmra.mrb[76].mxu0 %vm759_vm1, %v17873_v47  ;;  %15075 = vmatmul.mubr.msk.f32.vlgmr.msra.gmra.mrb[76].mxu1 %vm759_vm1, %v17873_v47 }
0x15ba   : > { %15968 = vmatpush3.bf16.msra.mxu0 %v15967_v41  ;;  %15974 = vmatpush3.bf16.msra.mxu1 %v15973_v42  ;;  %v6980_v41 = vld [vmem:[%s19084_s12 + $0x160] sm:$0xff]  ;;  %v6981_v42 = vld [vmem:[%s19084_s12 + $0x168] sm:$0xff] }
0x15bb   : > { %15969 = vmatprep.subr.bf16.mxu0 %v16434_v3  ;;  %15975 = vmatprep.subr.bf16.mxu1 %v16434_v3  ;;  %v16021_v33 = vpack.c.bf16 %v6981_v42, %v6980_v41 }
0x15bc   : > { %15085 = vmatprep.mubr.msk.f32.mxu0 %vm16435_vm0, %v16436_v11  ;;  %15096 = vmatprep.mubr.msk.f32.mxu1 %vm16435_vm0, %v16436_v11 }
0x15be   : > { %15971 = vmatpush3.bf16.msra.mxu0 %v15970_v52  ;;  %15977 = vmatpush3.bf16.msra.mxu1 %v15976_v53  ;;  %v6982_v52 = vld [vmem:[%s19084_s12 + $0x170] sm:$0xff]  ;;  %v6983_v53 = vld [vmem:[%s19084_s12 + $0x178] sm:$0xff] }
0x15bf   : > { %15978 = vmatprep.subr.bf16.mxu0 %v16434_v3  ;;  %15984 = vmatprep.subr.bf16.mxu1 %v16434_v3  ;;  %v16024_v55 = vpack.c.bf16 %v6983_v53, %v6982_v52 }
0x15c1   : > { %15086 = vmatmul.mubr.msk.f32.vlgmr.msra.gmra.mrb[78].mxu0 %vm759_vm1, %v17873_v47  ;;  %15097 = vmatmul.mubr.msk.f32.vlgmr.msra.gmra.mrb[78].mxu1 %vm759_vm1, %v17873_v47 }
0x15c2   : > { %15980 = vmatpush3.bf16.msra.mxu0 %v15979_v60  ;;  %15986 = vmatpush3.bf16.msra.mxu1 %v15985_v63 }
0x15c3   : > { %15981 = vmatprep.subr.bf16.mxu0 %v16434_v3  ;;  %15987 = vmatprep.subr.bf16.mxu1 %v16434_v3 }
0x15c4   : > { %15107 = vmatprep.mubr.msk.f32.mxu0 %vm16435_vm0, %v16436_v11  ;;  %15118 = vmatprep.mubr.msk.f32.mxu1 %vm16435_vm0, %v16436_v11 }
0x15c6   : > { %15983 = vmatpush3.bf16.msra.mxu0 %v15982_v20  ;;  %15989 = vmatpush3.bf16.msra.mxu1 %v15988_v10  ;;  %v13577_v10 = vld [vmem:[%s19085_s13] ss:$0 sm:$0xff] }
0x15c7   : > { %15990 = vmatprep.subr.bf16.mxu0 %v16434_v3  ;;  %15996 = vmatprep.subr.bf16.mxu1 %v16434_v3 }
0x15c9   : > { %15108 = vmatmul.mubr.msk.f32.vlgmr.msra.gmra.mrb[80].mxu0 %vm759_vm1, %v17950_v21  ;;  %15119 = vmatmul.mubr.msk.f32.vlgmr.msra.gmra.mrb[80].mxu1 %vm759_vm1, %v17950_v21 }
0x15ca   : > { %15992 = vmatpush3.bf16.msra.mxu0 %v15991_v59  ;;  %15998 = vmatpush3.bf16.msra.mxu1 %v15997_v19  ;;  %v13587_v19 = vld [vmem:[%s19085_s13 + $0x6] ss:$0 sm:$0xff] }
0x15cb   : > { %15993 = vmatprep.subr.bf16.mxu0 %v16434_v3  ;;  %15999 = vmatprep.subr.bf16.mxu1 %v16434_v3 }
0x15cc   : > { %15129 = vmatprep.mubr.msk.f32.mxu0 %vm16435_vm0, %v16436_v11  ;;  %15140 = vmatprep.mubr.msk.f32.mxu1 %vm16435_vm0, %v16436_v11 }
0x15ce   : > { %15995 = vmatpush3.bf16.msra.mxu0 %v15994_v24  ;;  %16001 = vmatpush3.bf16.msra.mxu1 %v16000_v25  ;;  %v13580_v24 = vld [vmem:[%s19085_s13 + $0x3] ss:$0 sm:$0xff] }
0x15cf   : > { %16002 = vmatprep.subr.bf16.mxu0 %v16434_v3  ;;  %16008 = vmatprep.subr.bf16.mxu1 %v16434_v3 }
0x15d1   : > { %15130 = vmatmul.mubr.msk.f32.vlgmr.msra.gmra.mrb[82].mxu0 %vm759_vm1, %v17950_v21  ;;  %15141 = vmatmul.mubr.msk.f32.vlgmr.msra.gmra.mrb[82].mxu1 %vm759_vm1, %v17950_v21 }
0x15d2   : > { %16004 = vmatpush3.bf16.msra.mxu0 %v16003_v29  ;;  %16010 = vmatpush3.bf16.msra.mxu1 %v16009_v30  ;;  %v13593_v30 = vld [vmem:[%s19085_s13 + $0x8] ss:$0 sm:$0xff] }
0x15d3   : > { %16005 = vmatprep.subr.bf16.mxu0 %v16434_v3  ;;  %16011 = vmatprep.subr.bf16.mxu1 %v16434_v3 }
0x15d4   : > { %15151 = vmatprep.mubr.msk.f32.mxu0 %vm16435_vm0, %v16436_v11  ;;  %15162 = vmatprep.mubr.msk.f32.mxu1 %vm16435_vm0, %v16436_v11 }
0x15d6   : > { %16007 = vmatpush3.bf16.msra.mxu0 %v16006_v37  ;;  %16013 = vmatpush3.bf16.msra.mxu1 %v16012_v38 }
0x15d7   : > { %16014 = vmatprep.subr.bf16.mxu0 %v16434_v3  ;;  %16020 = vmatprep.subr.bf16.mxu1 %v16434_v3 }
0x15d9   : > { %15152 = vmatmul.mubr.msk.f32.vlgmr.msra.gmra.mrb[84].mxu0 %vm759_vm1, %v17950_v21  ;;  %15163 = vmatmul.mubr.msk.f32.vlgmr.msra.gmra.mrb[84].mxu1 %vm759_vm1, %v17950_v21 }
0x15da   : > { %16016 = vmatpush3.bf16.msra.mxu0 %v16015_v44  ;;  %16022 = vmatpush3.bf16.msra.mxu1 %v16021_v33 }
0x15db   : > { %16017 = vmatprep.subr.bf16.mxu0 %v16434_v3  ;;  %16023 = vmatprep.subr.bf16.mxu1 %v16434_v3 }
0x15dc   : > { %15173 = vmatprep.mubr.msk.f32.mxu0 %vm16435_vm0, %v16436_v11  ;;  %15184 = vmatprep.mubr.msk.f32.mxu1 %vm16435_vm0, %v16436_v11 }
0x15de   : > { %16019 = vmatpush3.bf16.msra.mxu0 %v16018_v54  ;;  %16025 = vmatpush3.bf16.msra.mxu1 %v16024_v55 }
0x15df   : > { %15187 = vmatprep.subr.mxu0 %v16436_v11  ;;  %15192 = vmatprep.subr.mxu1 %v16436_v11 }
0x15e1   : > { %15174 = vmatmul.mubr.msk.f32.vlgmr.msra.gmra.mrb[86].mxu0 %vm759_vm1, %v17950_v21  ;;  %15185 = vmatmul.mubr.msk.f32.vlgmr.msra.gmra.mrb[86].mxu1 %vm759_vm1, %v17950_v21 }
0x15e2   : > { %15189 = vmatprep.mubr.msk.f32.mxu0 %vm16435_vm0, %v16436_v11  ;;  %15194 = vmatprep.mubr.msk.f32.mxu1 %vm16435_vm0, %v16436_v11 }
0x168c   : > { %v7093_v56 = vpop.f32.mrb[76].mxu0  ;;  %v7163_v57 = vpop.f32.mrb[76].mxu1 }
0x168d   : > { %v15065_v58 = vpop.f32.mrb[77].mxu0  ;;  %v15076_v60 = vpop.f32.mrb[77].mxu1  ;;  %v7094_v17 = vadd.f32 %v13577_v10, %v7093_v56  ;;  %v7164_v59 = vadd.f32 %v13578_v12, %v7163_v57 }
0x1694   : > { %v7233_v63 = vpop.f32.mrb[78].mxu0  ;;  %v7303_v0 = vpop.f32.mrb[78].mxu1 }
0x1695   : > { %v15087_v2 = vpop.f32.mrb[79].mxu0  ;;  %v15098_v4 = vpop.f32.mrb[79].mxu1  ;;  %v7234_v28 = vadd.f32 %v13579_v23, %v7233_v63  ;;  %v7304_v29 = vadd.f32 %v13580_v24, %v7303_v0 }
0x169c   : > { %v7400_v9 = vpop.f32.mrb[80].mxu0  ;;  %v7470_v20 = vpop.f32.mrb[80].mxu1 }
0x169d   : > { %v7401_v13 = vadd.f32 %v13585_v6, %v7400_v9  ;;  %v7471_v15 = vadd.f32 %v13586_v22, %v7470_v20  ;;  %v15109_v51 = vpop.f32.mrb[81].mxu0  ;;  %v15120_v16 = vpop.f32.mrb[81].mxu1 }
0x169f   : > { %15188 = vmatpush3.xpose.msk.msra.mxu0 %vm1651_vm2, %v7401_v13  ;;  %15193 = vmatpush3.xpose.msk.msra.mxu1 %vm1651_vm2, %v7471_v15 }
0x16a0   : > { %15197 = vmatprep.subr.mxu0 %v16436_v11  ;;  %15202 = vmatprep.subr.mxu1 %v16436_v11 }
0x16a2   : > { %15190 = vmatmul.mubr.msk.f32.vlgmr.msra.gmra.mrb[88].mxu0 %vm1651_vm2, %v7094_v17  ;;  %15195 = vmatmul.mubr.msk.f32.vlgmr.msra.gmra.mrb[88].mxu1 %vm1651_vm2, %v7164_v59 }
0x16a3   : > { %15199 = vmatprep.mubr.msk.f32.mxu0 %vm16435_vm0, %v16436_v11  ;;  %15204 = vmatprep.mubr.msk.f32.mxu1 %vm16435_vm0, %v16436_v11 }
0x16a4   : > { %v7540_v62 = vpop.f32.mrb[82].mxu0  ;;  %v7610_v5 = vpop.f32.mrb[82].mxu1 }
0x16a5   : > { %v7541_v25 = vadd.f32 %v13587_v19, %v7540_v62  ;;  %v7611_v26 = vadd.f32 %v13588_v43, %v7610_v5  ;;  %v15131_v27 = vpop.f32.mrb[83].mxu0  ;;  %v15142_v7 = vpop.f32.mrb[83].mxu1 }
0x16a7   : > { %15198 = vmatpush3.xpose.msk.msra.mxu0 %vm1651_vm2, %v7541_v25  ;;  %15203 = vmatpush3.xpose.msk.msra.mxu1 %vm1651_vm2, %v7611_v26 }
0x16a8   : > { %15207 = vmatprep.subr.mxu0 %v16436_v11  ;;  %15212 = vmatprep.subr.mxu1 %v16436_v11 }
0x16aa   : > { %15200 = vmatmul.mubr.msk.f32.vlgmr.msra.gmra.mrb[90].mxu0 %vm1651_vm2, %v7234_v28  ;;  %15205 = vmatmul.mubr.msk.f32.vlgmr.msra.gmra.mrb[90].mxu1 %vm1651_vm2, %v7304_v29 }
0x16ab   : > { %15209 = vmatprep.mubr.msk.f32.mxu0 %vm16435_vm0, %v16436_v11  ;;  %15214 = vmatprep.mubr.msk.f32.mxu1 %vm16435_vm0, %v16436_v11 }
0x16ac   : > { %v7704_v34 = vpop.f32.mrb[84].mxu0  ;;  %v7774_v35 = vpop.f32.mrb[84].mxu1 }
0x16ad   : > { %v7705_v36 = vadd.f32 %v13593_v30, %v7704_v34  ;;  %v7775_v37 = vadd.f32 %v13594_v32, %v7774_v35  ;;  %v15153_v38 = vpop.f32.mrb[85].mxu0  ;;  %v15164_v39 = vpop.f32.mrb[85].mxu1  ;;  %v13596_v32 = vld [vmem:[%s19085_s13 + $0xb] ss:$0 sm:$0xff]  ;;  %v13595_v35 = vld [vmem:[%s19085_s13 + $0xa] ss:$0 sm:$0xff] }
0x16af   : > { %15208 = vmatpush3.msra.mxu0 %v7705_v36  ;;  %15213 = vmatpush3.msra.mxu1 %v7775_v37 }
0x16b0   : > { %15217 = vmatprep.subr.mxu0 %v16436_v11  ;;  %15222 = vmatprep.subr.mxu1 %v16436_v11 }
0x16b4   : > { %v18107_v40 = vpop.f32.mrb[86].mxu0  ;;  %v18109_v41 = vpop.f32.mrb[86].mxu1 }
0x16b5   : > { %v15175_v42 = vpop.f32.mrb[87].mxu0  ;;  %v15186_v44 = vpop.f32.mrb[87].mxu1  ;;  %v7915_v38 = vadd.f32 %v13596_v32, %v18109_v41  ;;  %v8893_v32 = vld [vmem:[%s19087_s15 + $0x18] sm:$0xff] }
0x16b6   : > { %v7845_v42 = vadd.f32 %v13595_v35, %v18107_v40  ;;  %v8895_v35 = vld [vmem:[%s19088_s16] sm:$0xff] }
0x1775   : > { %v7990_v33 = vpop.f32.mrb[88].mxu0  ;;  %v8066_v48 = vpop.f32.mrb[88].mxu1 }
0x1776   : > { %v8222_v49 = vmul.f32 0.35355338, %v7990_v33  ;;  %v8223_v52 = vmul.f32 0.35355338, %v8066_v48  ;;  %v15191_v53 = vpop.f32.mrb[89].mxu0  ;;  %v15196_v54 = vpop.f32.mrb[89].mxu1 }
0x1777   : > { %v6996_v48 = vld [vmem:[%s19086_s14] sm:$0xff]  ;;  %v6998_v54 = vld [vmem:[%s19086_s14 + $0x10] sm:$0xff] }
0x1778   : > { %v8229_v55 = vsel %vm1651_vm2, %v8223_v52, -inf  ;;  %v8226_v56 = vsel %vm1651_vm2, %v8222_v49, -inf }
0x1779   : > { %8230 = vmax.xlane.f32.xlu1 %v8229_v55  ;;  %8227 = vmax.xlane.f32.xlu0 %v8226_v56 }
0x177d   : > { %v8142_v57 = vpop.f32.mrb[90].mxu0  ;;  %v8218_v58 = vpop.f32.mrb[90].mxu1 }
0x177e   : > { %v8224_v60 = vmul.f32 0.35355338, %v8142_v57  ;;  %v8225_v63 = vmul.f32 0.35355338, %v8218_v58  ;;  %v15201_v0 = vpop.f32.mrb[91].mxu0  ;;  %v15206_v2 = vpop.f32.mrb[91].mxu1 }
0x1780   : > { %v8235_v4 = vsel %vm1651_vm2, %v8225_v63, -inf  ;;  %v8232_v6 = vsel %vm1651_vm2, %v8224_v60, -inf }
0x1781   : > { %8236 = vmax.xlane.f32.xlu1 %v8235_v4  ;;  %8233 = vmax.xlane.f32.xlu0 %v8232_v6 }
0x1806   : > { %v8231_v22 = vpop.xlane.xlu1 %8230  ;;  %v8228_v9 = vpop.xlane.xlu0 %8227 }
0x1807   : > { %v8239_v20 = vsub.f32 %v8223_v52, %v8231_v22  ;;  %v8238_v10 = vsub.f32 %v8222_v49, %v8228_v9  ;;  %v6997_v49 = vld [vmem:[%s19086_s14 + $0x8] sm:$0xff]  ;;  %v6999_v52 = vld [vmem:[%s19086_s14 + $0x18] sm:$0xff] }
0x1809   : > { %v8244_v12 = vmul.f32 1.442695, %v8239_v20  ;;  %v8242_v13 = vmul.f32 1.442695, %v8238_v10 }
0x180b   : > { %16312 = vpow2.f32 %v8244_v12 }
0x180c   : > { %16314 = vpow2.f32 %v8242_v13 }
0x180e   : > { %v8237_v15 = vpop.xlane.xlu1 %8236  ;;  %v8234_v51 = vpop.xlane.xlu0 %8233 }
0x180f   : > { %v8241_v16 = vsub.f32 %v8225_v63, %v8237_v15  ;;  %v8240_v17 = vsub.f32 %v8224_v60, %v8234_v51 }
0x1811   : > { %v8248_v59 = vmul.f32 1.442695, %v8241_v16  ;;  %v8246_v19 = vmul.f32 1.442695, %v8240_v17 }
0x1813   : > { %16316 = vpow2.f32 %v8248_v59  ;;  %v8864_v59 = vrot.slane %v17817_v50, %v17023_v61 }
0x1814   : > { %16318 = vpow2.f32 %v8246_v19 }
0x1815   : > { %v16313_v43 = vpop.eup %16312 }
0x1816   : > { %v16315_v62 = vpop.eup %16314  ;;  %v8253_v5 = vsel %vm1651_vm2, %v16313_v43, 0.0 }
0x1817   : > { %8254 = vadd.xlane.f32.xlu1 %v8253_v5  ;;  %v8250_v23 = vsel %vm1651_vm2, %v16315_v62, 0.0 }
0x1818   : > { %8251 = vadd.xlane.f32.xlu0 %v8250_v23 }
0x181d   : > { %v16317_v24 = vpop.eup %16316 }
0x181e   : > { %v16319_v25 = vpop.eup %16318  ;;  %v8259_v26 = vsel %vm1651_vm2, %v16317_v24, 0.0 }
0x181f   : > { %8260 = vadd.xlane.f32.xlu1 %v8259_v26  ;;  %v8256_v27 = vsel %vm1651_vm2, %v16319_v25, 0.0 }
0x1820   : > { %8257 = vadd.xlane.f32.xlu0 %v8256_v27 }
0x18a4   : > { %v8255_v7 = vpop.xlane.xlu1 %8254 }
0x18a5   : > { %16320 = vrcp.f32 %v8255_v7  ;;  %v8252_v28 = vpop.xlane.xlu0 %8251 }
0x18a6   : > { %16322 = vrcp.f32 %v8252_v28  ;;  %v8890_v28 = vld [vmem:[%s19087_s15] sm:$0xff] }
0x18ac   : > { %v8261_v29 = vpop.xlane.xlu1 %8260 }
0x18ad   : > { %16324 = vrcp.f32 %v8261_v29  ;;  %v8258_v30 = vpop.xlane.xlu0 %8257  ;;  %v8891_v29 = vld [vmem:[%s19087_s15 + $0x8] sm:$0xff] }
0x18ae   : > { %16326 = vrcp.f32 %v8258_v30  ;;  %v16027_v30 = vpack.c.bf16 %v8891_v29, %v8890_v28  ;;  %v13633_v28 = vld [vmem:[%s19081_s9 + $0x1d0] sm:$0xff] }
0x18af   : > { %v16321_v34 = vpop.eup %16320 }
0x18b0   : > { %v16323_v36 = vpop.eup %16322  ;;  %v8265_v37 = vmul.f32 %v16321_v34, %v16313_v43 }
0x18b1   : > { %v8263_v39 = vmul.f32 %v16323_v36, %v16315_v62  ;;  %v8896_v36 = vld [vmem:[%s19088_s16 + $0x8] sm:$0xff] }
0x18b2   : > { %15215 = vmatmul.mubr.msk.f32.vlgmr.msra.gmra.mrb[92].mxu1 %vm1651_vm2, %v8265_v37  ;;  %v8897_v37 = vld [vmem:[%s19088_s16 + $0x10] sm:$0xff] }
0x18b3   : > { %15210 = vmatmul.mubr.msk.f32.vlgmr.msra.gmra.mrb[92].mxu0 %vm1651_vm2, %v8263_v39  ;;  %15223 = vmatpush3.msra.mxu1 %v7915_v38  ;;  %v16033_v38 = vpack.c.bf16 %v8896_v36, %v8895_v35  ;;  %v8898_v39 = vld [vmem:[%s19088_s16 + $0x18] sm:$0xff]  ;;  %v9076_v36 = vsub.s32 7, %v16942_v1 }
0x18b4   : > { %15218 = vmatpush3.msra.mxu0 %v7845_v42  ;;  %15219 = vmatprep.mubr.msk.f32.mxu0 %vm16435_vm0, %v16436_v11  ;;  %v16036_v42 = vpack.c.bf16 %v8898_v39, %v8897_v37  ;;  %v13627_v39 = vld [vmem:[%s19081_s9 + $0x1a0] sm:$0xff] }
0x18b5   : > { %15224 = vmatprep.mubr.msk.f32.mxu1 %vm16435_vm0, %v16436_v11  ;;  %15227 = vmatprep.subr.mxu0 %v16436_v11  ;;  %v9077_v37 = vrot.slane %v17817_v50, %v9076_v36 }
0x18b6   : > { %15232 = vmatprep.subr.mxu1 %v16436_v11 }
0x18b7   : > { %v16325_v41 = vpop.eup %16324 }
0x18b8   : > { %v16327_v44 = vpop.eup %16326  ;;  %v8269_v33 = vmul.f32 %v16325_v41, %v16317_v24  ;;  %v8899_v41 = vld [vmem:[%s19088_s16 + $0x20] sm:$0xff] }
0x18b9   : > { %v8267_v40 = vmul.f32 %v16327_v44, %v16319_v25  ;;  %v8900_v44 = vld [vmem:[%s19088_s16 + $0x28] sm:$0xff] }
0x18ba   : > { %15225 = vmatmul.mubr.msk.f32.vlgmr.msra.gmra.mrb[94].mxu1 %vm1651_vm2, %v8269_v33  ;;  %v16039_v33 = vpack.c.bf16 %v8900_v44, %v8899_v41  ;;  %v13628_v41 = vld [vmem:[%s19081_s9 + $0x1a8] sm:$0xff]  ;;  %v13639_v44 = vld [vmem:[%s19081_s9 + $0x200] sm:$0xff] }
0x18bb   : > { %15220 = vmatmul.mubr.msk.f32.vlgmr.msra.gmra.mrb[94].mxu0 %vm1651_vm2, %v8267_v40  ;;  %15234 = vmatprep.mubr.msk.f32.mxu1 %vm16435_vm0, %v16436_v11 }
0x18bc   : > { %15229 = vmatprep.mubr.msk.f32.mxu0 %vm16435_vm0, %v16436_v11  ;;  %15228 = vmatpush3.msra.mxu0 %v6996_v48 }
0x18bd   : > { %15233 = vmatpush3.msra.mxu1 %v6997_v49  ;;  %15237 = vmatprep.subr.mxu0 %v16436_v11 }
0x18be   : > { %15242 = vmatprep.subr.mxu1 %v16436_v11 }
0x1985   : > { %v8412_v53 = vpop.f32.mrb[92].mxu1 }
0x1986   : > { %v8339_v55 = vpop.f32.mrb[92].mxu0  ;;  %v15216_v56 = vpop.f32.mrb[93].mxu1  ;;  %15235 = vmatmul.mubr.msk.f32.vlgmr.msra.gmra.mrb[96].mxu1 %vm1651_vm2, %v8412_v53 }
0x1987   : > { %v15211_v57 = vpop.f32.mrb[93].mxu0  ;;  %15230 = vmatmul.mubr.msk.f32.vlgmr.msra.gmra.mrb[96].mxu0 %vm1651_vm2, %v8339_v55  ;;  %15243 = vmatpush3.msra.mxu1 %v6999_v52  ;;  %v8883_v52 = vrot.slane %v17817_v50, %v17058_v18  ;;  %v8888_v55 = vrot.slane %v17817_v50, %v17061_v31 }
0x1988   : > { %15238 = vmatpush3.msra.mxu0 %v6998_v54  ;;  %15239 = vmatprep.mubr.msk.f32.mxu0 %vm16435_vm0, %v16436_v11 }
0x1989   : > { %15244 = vmatprep.mubr.msk.f32.mxu1 %vm16435_vm0, %v16436_v11  ;;  %16026 = vmatprep.subr.bf16.mxu0 %v16434_v3 }
0x198a   : > { %16032 = vmatprep.subr.bf16.mxu1 %v16434_v3 }
0x198d   : > { %v8558_v58 = vpop.f32.mrb[94].mxu1 }
0x198e   : > { %v8485_v60 = vpop.f32.mrb[94].mxu0  ;;  %v15226_v63 = vpop.f32.mrb[95].mxu1  ;;  %15245 = vmatmul.mubr.msk.f32.vlgmr.msra.gmra.mrb[98].mxu1 %vm1651_vm2, %v8558_v58  ;;  %v8901_v58 = vld [vmem:[%s19088_s16 + $0x30] sm:$0xff] }
0x198f   : > { %v15221_v0 = vpop.f32.mrb[95].mxu0  ;;  %15240 = vmatmul.mubr.msk.f32.vlgmr.msra.gmra.mrb[98].mxu0 %vm1651_vm2, %v8485_v60  ;;  %15274 = vmatprep.mubr.msk.f32.mxu1 %vm16435_vm0, %v16436_v11  ;;  %v8902_v60 = vld [vmem:[%s19088_s16 + $0x38] sm:$0xff] }
0x1990   : > { %15255 = vmatprep.mubr.msk.f32.mxu0 %vm16435_vm0, %v16436_v11  ;;  %16028 = vmatpush3.bf16.msra.mxu0 %v16027_v30  ;;  %v16042_v63 = vpack.c.bf16 %v8902_v60, %v8901_v58  ;;  %v13617_v0 = vld [vmem:[%s19090_s18] ss:$0 sm:$0xff]  ;;  %v13634_v30 = vld [vmem:[%s19081_s9 + $0x1d8] sm:$0xff] }
0x1991   : > { %16029 = vmatprep.subr.bf16.mxu0 %v16434_v3  ;;  %16034 = vmatpush3.bf16.msra.mxu1 %v16033_v38  ;;  %v13635_v60 = vld [vmem:[%s19081_s9 + $0x1e0] sm:$0xff] }
0x1992   : > { %16035 = vmatprep.subr.bf16.mxu1 %v16434_v3 }
0x1995   : > { %16037 = vmatpush3.bf16.msra.mxu1 %v16036_v42 }
0x1996   : > { %16038 = vmatprep.subr.bf16.mxu1 %v16434_v3 }
0x1999   : > { %16040 = vmatpush3.bf16.msra.mxu1 %v16039_v33  ;;  %v13640_v33 = vld [vmem:[%s19081_s9 + $0x208] sm:$0xff] }
0x199a   : > { %16041 = vmatprep.subr.bf16.mxu1 %v16434_v3 }
0x199d   : > { %16043 = vmatpush3.bf16.msra.mxu1 %v16042_v63  ;;  %v13636_v63 = vld [vmem:[%s19081_s9 + $0x1e8] sm:$0xff] }
0x199e   : > { %16056 = vmatprep.subr.bf16.mxu1 %v16434_v3 }
0x1a59   : > { %v8704_v2 = vpop.f32.mrb[96].mxu1 }
0x1a5a   : > { %v8631_v4 = vpop.f32.mrb[96].mxu0  ;;  %v8855_v6 = vsel %vm759_vm1, %v8704_v2, 0.0  ;;  %v15236_v22 = vpop.f32.mrb[97].mxu1 }
0x1a5b   : > { %v8854_v9 = vsel %vm759_vm1, %v8631_v4, 0.0  ;;  %v15231_v20 = vpop.f32.mrb[97].mxu0 }
0x1a5c   : > { %v8856_v10 = vadd.f32 %v8855_v6, %v8854_v9  ;;  %v8985_v9 = vsub.s32 6, %v16942_v1 }
0x1a5e   : > { %v8986_v20 = vrot.slane %v17817_v50, %v8985_v9  ;;  %v13620_v50 = vld [vmem:[%s19089_s17 + $0x8] ss:$0 sm:$0xff] }
0x1a61   : > { %v8850_v12 = vpop.f32.mrb[98].mxu1 }
0x1a62   : > { %v8777_v13 = vpop.f32.mrb[98].mxu0  ;;  %v15246_v15 = vpop.f32.mrb[99].mxu1  ;;  %v8859_v19 = vsel %vm759_vm1, %v8850_v12, 0.0 }
0x1a63   : > { %v8857_v51 = vsel %vm759_vm1, %v8777_v13, 0.0  ;;  %v15241_v16 = vpop.f32.mrb[99].mxu0 }
0x1a64   : > { %v8858_v17 = vadd.f32 %v8857_v51, %v8856_v10 }
0x1a66   : > { %v8860_v43 = vadd.f32 %v8859_v19, %v8858_v17 }
0x1a68   : > { %v8865_v62 = vadd.f32 %v8864_v59, %v8860_v43 }
0x1a6a   : > { %v8866_v5 = vadd.f32 %v8865_v62, %v17873_v47  ;;  %v8892_v47 = vld [vmem:[%s19087_s15 + $0x10] sm:$0xff]  ;;  %v13623_v62 = vld [vmem:[%s19081_s9 + $0x180] sm:$0xff] }
0x1a6b   : > { %v16030_v34 = vpack.c.bf16 %v8893_v32, %v8892_v47  ;;  %v16060_v47 = vpack.c.bf16 %v13634_v30, %v13633_v28  ;;  %v13663_v28 = vld [vmem:[%s19081_s9 + $0x2c0] sm:$0xff] }
0x1a6c   : > { %v8867_v23 = vsel %vm759_vm1, %v8866_v5, 0.0 }
0x1a6d   : > { %8868 = vadd.xlane.f32.xlu0 %v8867_v23  ;;  %16031 = vmatpush3.bf16.msra.mxu0 %v16030_v34  ;;  %v13631_v23 = vld [vmem:[%s19081_s9 + $0x1c0] sm:$0xff] }
0x1a6e   : > { %16044 = vmatprep.subr.bf16.mxu0 %v16434_v3 }
0x1afa   : > { %v8869_v24 = vpop.xlane.xlu0 %8868 }
0x1afb   : > { %v8870_v25 = vmul.f32 0.03125, %v8869_v24 }
0x1afd   : > { %v8871_v26 = vsub.f32 %v8866_v5, %v8870_v25  ;;  %v13624_v5 = vld [vmem:[%s19081_s9 + $0x188] sm:$0xff] }
0x1afe   : > { %v16045_v24 = vpack.c.bf16 %v13624_v5, %v13623_v62  ;;  %v13632_v25 = vld [vmem:[%s19081_s9 + $0x1c8] sm:$0xff]  ;;  %v13645_v62 = vld [vmem:[%s19081_s9 + $0x230] sm:$0xff]  ;;  %v13646_v5 = vld [vmem:[%s19081_s9 + $0x238] sm:$0xff] }
0x1aff   : > { %v8872_v27 = vmul.f32 %v8871_v26, %v8871_v26 }
0x1b01   : > { %v8873_v7 = vsel %vm759_vm1, %v8872_v27, 0.0  ;;  %v13625_v27 = vld [vmem:[%s19081_s9 + $0x190] sm:$0xff] }
0x1b02   : > { %8874 = vadd.xlane.f32.xlu1 %v8873_v7  ;;  %v13626_v7 = vld [vmem:[%s19081_s9 + $0x198] sm:$0xff] }
0x1b03   : > { %v16048_v29 = vpack.c.bf16 %v13626_v7, %v13625_v27  ;;  %v13651_v27 = vld [vmem:[%s19081_s9 + $0x260] sm:$0xff]  ;;  %v13652_v7 = vld [vmem:[%s19081_s9 + $0x268] sm:$0xff] }
0x1b04   : > { %v16087_v30 = vpack.c.bf16 %v13652_v7, %v13651_v27 }
0x1b8f   : > { %v8875_v40 = vpop.xlane.xlu1 %8874 }
0x1b90   : > { %v8876_v48 = vmul.f32 0.03125, %v8875_v40 }
0x1b92   : > { %v8877_v49 = vadd.f32 1e-05, %v8876_v48  ;;  %v16051_v48 = vpack.c.bf16 %v13628_v41, %v13627_v39  ;;  %v13660_v41 = vld [vmem:[%s19081_s9 + $0x2a8] sm:$0xff] }
0x1b94   : > { %16328 = vrsqrt.f32 %v8877_v49  ;;  %v16069_v49 = vpack.c.bf16 %v13640_v33, %v13639_v44  ;;  %v13661_v33 = vld [vmem:[%s19081_s9 + $0x2b0] sm:$0xff] }
0x1b9e   : > { %v16329_v53 = vpop.eup %16328 }
0x1b9f   : > { %v8879_v54 = vmul.f32 %v16329_v53, %v8871_v26  ;;  %v16057_v26 = vpack.c.bf16 %v13632_v25, %v13631_v23  ;;  %v13657_v23 = vld [vmem:[%s19081_s9 + $0x290] sm:$0xff]  ;;  %v16078_v25 = vpack.c.bf16 %v13646_v5, %v13645_v62 }
0x1ba0   : > { %v13696_v62 = vld [vmem:[%s19082_s10 + $0x11] ss:$0 sm:$0xff]  ;;  %v13703_v5 = vld [vmem:[%s19082_s10 + $0x14] ss:$0 sm:$0xff] }
0x1ba1   : > { %v8884_v56 = vmul.f32 %v8883_v52, %v8879_v54  ;;  %v13629_v52 = vld [vmem:[%s19081_s9 + $0x1b0] sm:$0xff]  ;;  %v13630_v54 = vld [vmem:[%s19081_s9 + $0x1b8] sm:$0xff] }
0x1ba3   : > { %v8889_v57 = vadd.f32 %v8888_v55, %v8884_v56  ;;  %v13641_v55 = vld [vmem:[%s19081_s9 + $0x210] sm:$0xff]  ;;  %v13642_v56 = vld [vmem:[%s19081_s9 + $0x218] sm:$0xff] }
0x1ba4   : > { %v16072_v58 = vpack.c.bf16 %v13642_v56, %v13641_v55  ;;  %v13670_v55 = vld [vmem:[%s19081_s9 + $0x2f8] sm:$0xff] }
0x1ba5   : > { %15256 = vmatmul.mubr.msk.f32.vlgmr.msra.gmra.mrb[100].mxu0 %vm759_vm1, %v8889_v57 }
0x1ba6   : > { %15285 = vmatprep.mubr.msk.f32.mxu0 %vm16435_vm0, %v16436_v11  ;;  %16046 = vmatpush3.bf16.msra.mxu0 %v16045_v24  ;;  %v13658_v24 = vld [vmem:[%s19081_s9 + $0x298] sm:$0xff] }
0x1ba7   : > { %16047 = vmatprep.subr.bf16.mxu0 %v16434_v3 }
0x1baa   : > { %16049 = vmatpush3.bf16.msra.mxu0 %v16048_v29  ;;  %v13664_v29 = vld [vmem:[%s19081_s9 + $0x2c8] sm:$0xff] }
0x1bab   : > { %16050 = vmatprep.subr.bf16.mxu0 %v16434_v3 }
0x1c78   : > { %v8978_v2 = vpop.f32.mrb[100].mxu0 }
0x1c79   : > { %v8979_v4 = vadd.f32 %v13617_v0, %v8978_v2  ;;  %v15257_v6 = vpop.f32.mrb[101].mxu0  ;;  %v13647_v0 = vld [vmem:[%s19081_s9 + $0x240] sm:$0xff]  ;;  %v13648_v2 = vld [vmem:[%s19081_s9 + $0x248] sm:$0xff] }
0x1c7a   : > { %v16081_v6 = vpack.c.bf16 %v13648_v2, %v13647_v0  ;;  %v13695_v0 = vld [vmem:[%s19082_s10 + $0x10] ss:$0 sm:$0xff] }
0x1c7b   : > { %v8982_v22 = vmax.f32 %v8979_v4, 0.0  ;;  %v16063_v4 = vpack.c.bf16 %v13636_v63, %v13635_v60 }
0x1c7d   : > { %15275 = vmatmul.mubr.msk.f32.vlgmr.msra.gmra.mrb[100].mxu1 %vm2722_vm3, %v8982_v22  ;;  %v13637_v22 = vld [vmem:[%s19081_s9 + $0x1f0] sm:$0xff] }
0x1c7e   : > { %15307 = vmatprep.mubr.msk.f32.mxu1 %vm16435_vm0, %v16436_v11  ;;  %16058 = vmatpush3.bf16.msra.mxu1 %v16057_v26  ;;  %v16096_v26 = vpack.c.bf16 %v13658_v24, %v13657_v23 }
0x1c7f   : > { %16059 = vmatprep.subr.bf16.mxu1 %v16434_v3 }
0x1c82   : > { %16061 = vmatpush3.bf16.msra.mxu1 %v16060_v47  ;;  %v16105_v47 = vpack.c.bf16 %v13664_v29, %v13663_v28 }
0x1c83   : > { %16068 = vmatprep.subr.bf16.mxu1 %v16434_v3 }
0x1d50   : > { %v9056_v10 = vpop.f32.mrb[100].mxu1 }
0x1d51   : > { %v9057_v12 = vadd.f32 %v9056_v10, %v8986_v20  ;;  %v15276_v13 = vpop.f32.mrb[101].mxu1  ;;  %v13638_v20 = vld [vmem:[%s19081_s9 + $0x1f8] sm:$0xff]  ;;  %v13649_v10 = vld [vmem:[%s19081_s9 + $0x250] sm:$0xff] }
0x1d52   : > { %v16066_v13 = vpack.c.bf16 %v13638_v20, %v13637_v22 }
0x1d53   : > { %v9060_v15 = vadd.f32 %v9057_v12, %v8889_v57  ;;  %v16054_v57 = vpack.c.bf16 %v13630_v54, %v13629_v52  ;;  %v13650_v12 = vld [vmem:[%s19081_s9 + $0x258] sm:$0xff]  ;;  %v13669_v54 = vld [vmem:[%s19081_s9 + $0x2f0] sm:$0xff] }
0x1d54   : > { %v16114_v56 = vpack.c.bf16 %v13670_v55, %v13669_v54 }
0x1d55   : > { %v9061_v51 = vsel %vm759_vm1, %v9060_v15, 0.0 }
0x1d56   : > { %9062 = vadd.xlane.f32.xlu0 %v9061_v51  ;;  %v13643_v51 = vld [vmem:[%s19081_s9 + $0x220] sm:$0xff] }
0x1de3   : > { %v9063_v16 = vpop.xlane.xlu0 %9062 }
0x1de4   : > { %v9064_v17 = vmul.f32 0.03125, %v9063_v16  ;;  %v13644_v16 = vld [vmem:[%s19081_s9 + $0x228] sm:$0xff] }
0x1de6   : > { %v9065_v59 = vsub.f32 %v9060_v15, %v9064_v17  ;;  %v16084_v15 = vpack.c.bf16 %v13650_v12, %v13649_v10  ;;  %v13655_v17 = vld [vmem:[%s19081_s9 + $0x280] sm:$0xff] }
0x1de8   : > { %v9066_v19 = vmul.f32 %v9065_v59, %v9065_v59 }
0x1dea   : > { %v9067_v43 = vsel %vm759_vm1, %v9066_v19, 0.0  ;;  %v16075_v19 = vpack.c.bf16 %v13644_v16, %v13643_v51  ;;  %v13689_v16 = vld [vmem:[%s19082_s10 + $0xe] ss:$0 sm:$0xff] }
0x1deb   : > { %9068 = vadd.xlane.f32.xlu1 %v9067_v43 }
0x1e78   : > { %v9069_v32 = vpop.xlane.xlu1 %9068 }
0x1e79   : > { %v9070_v34 = vmul.f32 0.03125, %v9069_v32  ;;  %v13653_v32 = vld [vmem:[%s19081_s9 + $0x270] sm:$0xff] }
0x1e7b   : > { %v9071_v35 = vadd.f32 1e-05, %v9070_v34  ;;  %v13654_v34 = vld [vmem:[%s19081_s9 + $0x278] sm:$0xff] }
0x1e7d   : > { %16330 = vrsqrt.f32 %v9071_v35  ;;  %v13665_v35 = vld [vmem:[%s19081_s9 + $0x2d0] sm:$0xff] }
0x1e87   : > { %v16331_v38 = vpop.eup %16330 }
0x1e88   : > { %v9073_v42 = vmul.f32 %v16331_v38, %v9065_v59  ;;  %v13656_v59 = vld [vmem:[%s19081_s9 + $0x288] sm:$0xff]  ;;  %v16090_v38 = vpack.c.bf16 %v13654_v34, %v13653_v32 }
0x1e89   : > { %v16093_v43 = vpack.c.bf16 %v13656_v59, %v13655_v17  ;;  %v13690_v34 = vld [vmem:[%s19082_s10 + $0xf] ss:$0 sm:$0xff] }
0x1e8a   : > { %v9078_v40 = vmul.f32 %v9077_v37, %v9073_v42  ;;  %v13666_v37 = vld [vmem:[%s19081_s9 + $0x2d8] sm:$0xff]  ;;  %v13659_v42 = vld [vmem:[%s19081_s9 + $0x2a0] sm:$0xff] }
0x1e8b   : > { %v16108_v39 = vpack.c.bf16 %v13666_v37, %v13665_v35  ;;  %v16099_v44 = vpack.c.bf16 %v13660_v41, %v13659_v42  ;;  %v13704_v42 = vld [vmem:[%s19082_s10 + $0x15] ss:$0 sm:$0xff] }
0x1e8c   : > { %v18289_v53 = vadd.f32 %v13620_v50, %v9078_v40  ;;  %v13662_v50 = vld [vmem:[%s19081_s9 + $0x2b8] sm:$0xff] }
0x1e8d   : > { %v16102_v40 = vpack.c.bf16 %v13662_v50, %v13661_v33 }
0x1e8e   : > { %15286 = vmatmul.mubr.msk.f32.vlgmr.msra.gmra.mrb[102].mxu0 %vm759_vm1, %v18289_v53  ;;  %15308 = vmatmul.mubr.msk.f32.vlgmr.msra.gmra.mrb[102].mxu1 %vm759_vm1, %v18289_v53 }
0x1e8f   : > { %16052 = vmatpush3.bf16.msra.mxu0 %v16051_v48  ;;  %16070 = vmatpush3.bf16.msra.mxu1 %v16069_v49  ;;  %v13667_v48 = vld [vmem:[%s19081_s9 + $0x2e0] sm:$0xff]  ;;  %v13668_v49 = vld [vmem:[%s19081_s9 + $0x2e8] sm:$0xff] }
0x1e90   : > { %16053 = vmatprep.subr.bf16.mxu0 %v16434_v3  ;;  %16071 = vmatprep.subr.bf16.mxu1 %v16434_v3  ;;  %v16111_v52 = vpack.c.bf16 %v13668_v49, %v13667_v48 }
0x1e91   : > { %15296 = vmatprep.mubr.msk.f32.mxu0 %vm16435_vm0, %v16436_v11  ;;  %15329 = vmatprep.mubr.msk.f32.mxu1 %vm16435_vm0, %v16436_v11 }
0x1e93   : > { %16055 = vmatpush3.bf16.msra.mxu0 %v16054_v57  ;;  %16073 = vmatpush3.bf16.msra.mxu1 %v16072_v58 }
0x1e94   : > { %16062 = vmatprep.subr.bf16.mxu0 %v16434_v3  ;;  %16080 = vmatprep.subr.bf16.mxu1 %v16434_v3 }
0x1e96   : > { %15297 = vmatmul.mubr.msk.f32.vlgmr.msra.gmra.mrb[104].mxu0 %vm759_vm1, %v18289_v53  ;;  %15330 = vmatmul.mubr.msk.f32.vlgmr.msra.gmra.mrb[104].mxu1 %vm759_vm1, %v18289_v53 }
0x1e97   : > { %16064 = vmatpush3.bf16.msra.mxu0 %v16063_v4  ;;  %16082 = vmatpush3.bf16.msra.mxu1 %v16081_v6  ;;  %v13687_v6 = vld [vmem:[%s19082_s10 + $0xc] ss:$0 sm:$0xff] }
0x1e98   : > { %16065 = vmatprep.subr.bf16.mxu0 %v16434_v3  ;;  %16083 = vmatprep.subr.bf16.mxu1 %v16434_v3 }
0x1e99   : > { %15318 = vmatprep.mubr.msk.f32.mxu0 %vm16435_vm0, %v16436_v11  ;;  %15351 = vmatprep.mubr.msk.f32.mxu1 %vm16435_vm0, %v16436_v11 }
0x1e9b   : > { %16067 = vmatpush3.bf16.msra.mxu0 %v16066_v13  ;;  %16085 = vmatpush3.bf16.msra.mxu1 %v16084_v15  ;;  %v13697_v13 = vld [vmem:[%s19082_s10 + $0x12] ss:$0 sm:$0xff] }
0x1e9c   : > { %16074 = vmatprep.subr.bf16.mxu0 %v16434_v3  ;;  %16092 = vmatprep.subr.bf16.mxu1 %v16434_v3 }
0x1e9e   : > { %15319 = vmatmul.mubr.msk.f32.vlgmr.msra.gmra.mrb[106].mxu0 %vm759_vm1, %v18289_v53  ;;  %15352 = vmatmul.mubr.msk.f32.vlgmr.msra.gmra.mrb[106].mxu1 %vm759_vm1, %v18289_v53 }
0x1e9f   : > { %16076 = vmatpush3.bf16.msra.mxu0 %v16075_v19  ;;  %16094 = vmatpush3.bf16.msra.mxu1 %v16093_v43 }
0x1ea0   : > { %16077 = vmatprep.subr.bf16.mxu0 %v16434_v3  ;;  %16095 = vmatprep.subr.bf16.mxu1 %v16434_v3 }
0x1ea1   : > { %15340 = vmatprep.mubr.msk.f32.mxu0 %vm16435_vm0, %v16436_v11  ;;  %15373 = vmatprep.mubr.msk.f32.mxu1 %vm16435_vm0, %v16436_v11 }
0x1ea3   : > { %16079 = vmatpush3.bf16.msra.mxu0 %v16078_v25  ;;  %16097 = vmatpush3.bf16.msra.mxu1 %v16096_v26  ;;  %v13688_v25 = vld [vmem:[%s19082_s10 + $0xd] ss:$0 sm:$0xff] }
0x1ea4   : > { %16086 = vmatprep.subr.bf16.mxu0 %v16434_v3  ;;  %16104 = vmatprep.subr.bf16.mxu1 %v16434_v3 }
0x1ea6   : > { %15341 = vmatmul.mubr.msk.f32.vlgmr.msra.gmra.mrb[108].mxu0 %vm759_vm1, %v18289_v53  ;;  %15374 = vmatmul.mubr.msk.f32.vlgmr.msra.gmra.mrb[108].mxu1 %vm759_vm1, %v18289_v53 }
0x1ea7   : > { %16088 = vmatpush3.bf16.msra.mxu0 %v16087_v30  ;;  %16106 = vmatpush3.bf16.msra.mxu1 %v16105_v47  ;;  %v13698_v30 = vld [vmem:[%s19082_s10 + $0x13] ss:$0 sm:$0xff] }
0x1ea8   : > { %16089 = vmatprep.subr.bf16.mxu0 %v16434_v3  ;;  %16107 = vmatprep.subr.bf16.mxu1 %v16434_v3 }
0x1ea9   : > { %15362 = vmatprep.mubr.msk.f32.mxu0 %vm16435_vm0, %v16436_v11  ;;  %15395 = vmatprep.mubr.msk.f32.mxu1 %vm16435_vm0, %v16436_v11 }
0x1eab   : > { %16091 = vmatpush3.bf16.msra.mxu0 %v16090_v38  ;;  %16109 = vmatpush3.bf16.msra.mxu1 %v16108_v39 }
0x1eac   : > { %16098 = vmatprep.subr.bf16.mxu0 %v16434_v3  ;;  %15409 = vmatprep.subr.mxu1 %v16436_v11 }
0x1eae   : > { %15363 = vmatmul.mubr.msk.f32.vlgmr.msra.gmra.mrb[110].mxu0 %vm759_vm1, %v18289_v53  ;;  %15396 = vmatmul.mubr.msk.f32.vlgmr.msra.gmra.mrb[110].mxu1 %vm759_vm1, %v18289_v53 }
0x1eaf   : > { %16100 = vmatpush3.bf16.msra.mxu0 %v16099_v44  ;;  %15384 = vmatprep.mubr.msk.f32.mxu0 %vm16435_vm0, %v16436_v11 }
0x1eb0   : > { %16101 = vmatprep.subr.bf16.mxu0 %v16434_v3  ;;  %15411 = vmatprep.mubr.msk.f32.mxu1 %vm16435_vm0, %v16436_v11 }
0x1eb3   : > { %16103 = vmatpush3.bf16.msra.mxu0 %v16102_v40 }
0x1eb4   : > { %16110 = vmatprep.subr.bf16.mxu0 %v16434_v3 }
0x1eb6   : > { %15385 = vmatmul.mubr.msk.f32.vlgmr.msra.gmra.mrb[112].mxu0 %vm759_vm1, %v18289_v53 }
0x1eb7   : > { %16112 = vmatpush3.bf16.msra.mxu0 %v16111_v52  ;;  %15406 = vmatprep.mubr.msk.f32.mxu0 %vm16435_vm0, %v16436_v11 }
0x1eb8   : > { %16113 = vmatprep.subr.bf16.mxu0 %v16434_v3 }
0x1ebb   : > { %16115 = vmatpush3.bf16.msra.mxu0 %v16114_v56 }
0x1ebc   : > { %15419 = vmatprep.subr.mxu0 %v16436_v11 }
0x1ebe   : > { %15407 = vmatmul.mubr.msk.f32.vlgmr.msra.gmra.mrb[114].mxu0 %vm759_vm1, %v18289_v53 }
0x1ebf   : > { %15421 = vmatprep.mubr.msk.f32.mxu0 %vm16435_vm0, %v16436_v11 }
0x1f61   : > { %v9247_v57 = vpop.f32.mrb[102].mxu0  ;;  %v9387_v58 = vpop.f32.mrb[102].mxu1 }
0x1f62   : > { %v15287_v60 = vpop.f32.mrb[103].mxu0  ;;  %v15309_v63 = vpop.f32.mrb[103].mxu1  ;;  %v9248_v12 = vadd.f32 %v13687_v6, %v9247_v57  ;;  %v9388_v43 = vadd.f32 %v13689_v16, %v9387_v58 }
0x1f69   : > { %v9317_v2 = vpop.f32.mrb[104].mxu0  ;;  %v9551_v4 = vpop.f32.mrb[104].mxu1 }
0x1f6a   : > { %v9552_v22 = vadd.f32 %v13695_v0, %v9551_v4  ;;  %v15298_v20 = vpop.f32.mrb[105].mxu0  ;;  %v15331_v10 = vpop.f32.mrb[105].mxu1  ;;  %v9318_v29 = vadd.f32 %v13688_v25, %v9317_v2 }
0x1f6c   : > { %15410 = vmatpush3.xpose.msk.msra.mxu1 %vm1651_vm2, %v9552_v22 }
0x1f6d   : > { %15414 = vmatprep.subr.mxu1 %v16436_v11 }
0x1f6f   : > { %15412 = vmatmul.mubr.msk.f32.vlgmr.msra.gmra.mrb[112].mxu1 %vm1651_vm2, %v9248_v12 }
0x1f70   : > { %15416 = vmatprep.mubr.msk.f32.mxu1 %vm16435_vm0, %v16436_v11 }
0x1f71   : > { %v9457_v15 = vpop.f32.mrb[106].mxu0  ;;  %v9691_v51 = vpop.f32.mrb[106].mxu1 }
0x1f72   : > { %v9692_v17 = vadd.f32 %v13697_v13, %v9691_v51  ;;  %v15320_v59 = vpop.f32.mrb[107].mxu0  ;;  %v15353_v19 = vpop.f32.mrb[107].mxu1  ;;  %v9458_v39 = vadd.f32 %v13690_v34, %v9457_v15 }
0x1f74   : > { %15420 = vmatpush3.xpose.msk.msra.mxu0 %vm1651_vm2, %v9692_v17 }
0x1f75   : > { %15429 = vmatprep.subr.mxu0 %v16436_v11 }
0x1f77   : > { %15422 = vmatmul.mubr.msk.f32.vlgmr.msra.gmra.mrb[116].mxu0 %vm1651_vm2, %v9388_v43 }
0x1f78   : > { %15431 = vmatprep.mubr.msk.f32.mxu0 %vm16435_vm0, %v16436_v11 }
0x1f79   : > { %v9621_v23 = vpop.f32.mrb[108].mxu0  ;;  %v9855_v24 = vpop.f32.mrb[108].mxu1 }
0x1f7a   : > { %v9622_v26 = vadd.f32 %v13696_v62, %v9621_v23  ;;  %v9856_v27 = vadd.f32 %v13703_v5, %v9855_v24  ;;  %v15342_v7 = vpop.f32.mrb[109].mxu0  ;;  %v15375_v28 = vpop.f32.mrb[109].mxu1 }
0x1f7c   : > { %15415 = vmatpush3.xpose.msk.msra.mxu1 %vm1651_vm2, %v9622_v26  ;;  %15430 = vmatpush3.msra.mxu0 %v9856_v27 }
0x1f7d   : > { %15424 = vmatprep.subr.mxu1 %v16436_v11  ;;  %15439 = vmatprep.subr.mxu0 %v16436_v11 }
0x1f7f   : > { %15417 = vmatmul.mubr.msk.f32.vlgmr.msra.gmra.mrb[114].mxu1 %vm1651_vm2, %v9318_v29 }
0x1f80   : > { %15426 = vmatprep.mubr.msk.f32.mxu1 %vm16435_vm0, %v16436_v11 }
0x1f81   : > { %v9761_v47 = vpop.f32.mrb[110].mxu0  ;;  %v18504_v32 = vpop.f32.mrb[110].mxu1 }
0x1f82   : > { %v9762_v35 = vadd.f32 %v13698_v30, %v9761_v47  ;;  %v15364_v37 = vpop.f32.mrb[111].mxu0  ;;  %v15397_v38 = vpop.f32.mrb[111].mxu1 }
0x1f83   : > { %v13705_v38 = vld [vmem:[%s19082_s10 + $0x16] ss:$0 sm:$0xff] }
0x1f84   : > { %15425 = vmatpush3.xpose.msk.msra.mxu1 %vm1651_vm2, %v9762_v35 }
0x1f85   : > { %15434 = vmatprep.subr.mxu1 %v16436_v11 }
0x1f87   : > { %15427 = vmatmul.mubr.msk.f32.vlgmr.msra.gmra.mrb[116].mxu1 %vm1651_vm2, %v9458_v39 }
0x1f88   : > { %15436 = vmatprep.mubr.msk.f32.mxu1 %vm16435_vm0, %v16436_v11 }
0x1f89   : > { %v9925_v41 = vpop.f32.mrb[112].mxu0 }
0x1f8a   : > { %v9926_v44 = vadd.f32 %v13704_v42, %v9925_v41  ;;  %v15386_v33 = vpop.f32.mrb[113].mxu0  ;;  %v9996_v41 = vadd.f32 %v13705_v38, %v18504_v32  ;;  %v13706_v32 = vld [vmem:[%s19082_s10 + $0x17] ss:$0 sm:$0xff]  ;;  %v13728_v38 = vld [vmem:[%s19084_s12 + $0x188] sm:$0xff] }
0x1f8c   : > { %15435 = vmatpush3.msra.mxu1 %v9926_v44 }
0x1f8d   : > { %15444 = vmatprep.subr.mxu1 %v16436_v11 }
0x1f91   : > { %v18518_v50 = vpop.f32.mrb[114].mxu0 }
0x1f92   : > { %v15408_v40 = vpop.f32.mrb[115].mxu0 }
0x2042   : > { %v10141_v48 = vpop.f32.mrb[112].mxu1 }
0x2043   : > { %v10373_v49 = vmul.f32 0.35355338, %v10141_v48  ;;  %v15413_v52 = vpop.f32.mrb[113].mxu1 }
0x2045   : > { %v10377_v54 = vsel %vm17732_vm4, -1e+09, %v10373_v49 }
0x2046   : > { %v10381_v55 = vsel %vm1651_vm2, %v10377_v54, -inf }
0x2047   : > { %10382 = vmax.xlane.f32.xlu0 %v10381_v55 }
0x204a   : > { %v10293_v56 = vpop.f32.mrb[116].mxu0 }
0x204b   : > { %v10375_v57 = vmul.f32 0.35355338, %v10293_v56  ;;  %v15423_v58 = vpop.f32.mrb[117].mxu0 }
0x204c   : > { %v13685_v58 = vld [vmem:[%s19083_s11 + $0x30] sm:$0xff] }
0x204d   : > { %v10379_v60 = vsel %vm17732_vm4, -1e+09, %v10375_v57  ;;  %v13683_v57 = vld [vmem:[%s19083_s11 + $0x20] sm:$0xff] }
0x204e   : > { %v10387_v63 = vsel %vm1651_vm2, %v10379_v60, -inf }
0x204f   : > { %10388 = vmax.xlane.f32.xlu0 %v10387_v63 }
0x2052   : > { %v10217_v0 = vpop.f32.mrb[114].mxu1 }
0x2053   : > { %v10374_v2 = vmul.f32 0.35355338, %v10217_v0  ;;  %v15418_v4 = vpop.f32.mrb[115].mxu1 }
0x2054   : > { %v13686_v4 = vld [vmem:[%s19083_s11 + $0x38] sm:$0xff] }
0x2055   : > { %v10378_v6 = vsel %vm17732_vm4, -1e+09, %v10374_v2 }
0x2056   : > { %v10384_v22 = vsel %vm1651_vm2, %v10378_v6, -inf }
0x2057   : > { %10385 = vmax.xlane.f32.xlu1 %v10384_v22 }
0x205a   : > { %v10369_v20 = vpop.f32.mrb[116].mxu1 }
0x205b   : > { %v10376_v10 = vmul.f32 0.35355338, %v10369_v20  ;;  %v15428_v12 = vpop.f32.mrb[117].mxu1 }
0x205d   : > { %v10380_v13 = vsel %vm17732_vm4, -1e+09, %v10376_v10 }
0x205e   : > { %v10390_v15 = vsel %vm1651_vm2, %v10380_v13, -inf }
0x205f   : > { %10391 = vmax.xlane.f32.xlu1 %v10390_v15 }
0x20d4   : > { %v10383_v51 = vpop.xlane.xlu0 %10382 }
0x20d5   : > { %v10393_v16 = vsub.f32 %v10377_v54, %v10383_v51  ;;  %v10066_v54 = vadd.f32 %v13706_v32, %v18518_v50  ;;  %v13684_v50 = vld [vmem:[%s19083_s11 + $0x28] sm:$0xff]  ;;  %v13734_v32 = vld [vmem:[%s19084_s12 + $0x1b8] sm:$0xff] }
0x20d7   : > { %v10397_v17 = vmul.f32 1.442695, %v10393_v16 }
0x20d9   : > { %16332 = vpow2.f32 %v10397_v17 }
0x20dc   : > { %v10389_v59 = vpop.xlane.xlu0 %10388 }
0x20dd   : > { %v10395_v19 = vsub.f32 %v10379_v60, %v10389_v59 }
0x20df   : > { %v10401_v43 = vmul.f32 1.442695, %v10395_v19 }
0x20e1   : > { %16334 = vpow2.f32 %v10401_v43 }
0x20e3   : > { %v16333_v62 = vpop.eup %16332 }
0x20e4   : > { %v10386_v5 = vpop.xlane.xlu1 %10385  ;;  %v10405_v23 = vsel %vm1651_vm2, %v16333_v62, 0.0 }
0x20e5   : > { %v10394_v24 = vsub.f32 %v10378_v6, %v10386_v5  ;;  %10406 = vadd.xlane.f32.xlu0 %v10405_v23  ;;  %v18592_v23 = vld [vmem:[%s19089_s17 + $0x10] sm:$0xff] }
0x20e7   : > { %v10399_v25 = vmul.f32 1.442695, %v10394_v24 }
0x20e9   : > { %16336 = vpow2.f32 %v10399_v25  ;;  %v11019_v25 = vrot.slane %v18592_v23, %v16947_v8  ;;  %v13727_v8 = vld [vmem:[%s19084_s12 + $0x180] sm:$0xff] }
0x20eb   : > { %v16335_v14 = vpop.eup %16334 }
0x20ec   : > { %v10392_v26 = vpop.xlane.xlu1 %10391  ;;  %v10411_v27 = vsel %vm1651_vm2, %v16335_v14, 0.0 }
0x20ed   : > { %v10396_v7 = vsub.f32 %v10380_v13, %v10392_v26  ;;  %10412 = vadd.xlane.f32.xlu0 %v10411_v27 }
0x20ef   : > { %v10403_v28 = vmul.f32 1.442695, %v10396_v7 }
0x20f1   : > { %16338 = vpow2.f32 %v10403_v28 }
0x20f3   : > { %v16337_v29 = vpop.eup %16336 }
0x20f4   : > { %v10408_v30 = vsel %vm1651_vm2, %v16337_v29, 0.0 }
0x20f5   : > { %10409 = vadd.xlane.f32.xlu1 %v10408_v30 }
0x20fb   : > { %v16339_v47 = vpop.eup %16338 }
0x20fc   : > { %v10414_v34 = vsel %vm1651_vm2, %v16339_v47, 0.0 }
0x20fd   : > { %10415 = vadd.xlane.f32.xlu1 %v10414_v34 }
0x2172   : > { %v10407_v35 = vpop.xlane.xlu0 %10406 }
0x2173   : > { %16340 = vrcp.f32 %v10407_v35 }
0x217a   : > { %v10413_v37 = vpop.xlane.xlu0 %10412 }
0x217b   : > { %16342 = vrcp.f32 %v10413_v37 }
0x217d   : > { %v16341_v39 = vpop.eup %16340 }
0x217e   : > { %v10418_v42 = vmul.f32 %v16341_v39, %v16333_v62  ;;  %v16117_v39 = vpack.c.bf16 %v13728_v38, %v13727_v8  ;;  %v13758_v8 = vld [vmem:[%s19084_s12 + $0x278] sm:$0xff] }
0x2180   : > { %15432 = vmatmul.mubr.msk.f32.vlgmr.msra.gmra.mrb[118].mxu0 %vm1651_vm2, %v10418_v42  ;;  %v13732_v42 = vld [vmem:[%s19084_s12 + $0x1a8] sm:$0xff] }
0x2181   : > { %15440 = vmatpush3.msra.mxu0 %v9996_v41  ;;  %15441 = vmatprep.mubr.msk.f32.mxu0 %vm16435_vm0, %v16436_v11 }
0x2182   : > { %v10410_v44 = vpop.xlane.xlu1 %10409  ;;  %15449 = vmatprep.subr.mxu0 %v16436_v11 }
0x2183   : > { %16344 = vrcp.f32 %v10410_v44  ;;  %v13729_v44 = vld [vmem:[%s19084_s12 + $0x190] sm:$0xff] }
0x2185   : > { %v16343_v33 = vpop.eup %16342 }
0x2186   : > { %v10422_v40 = vmul.f32 %v16343_v33, %v16335_v14  ;;  %v13730_v33 = vld [vmem:[%s19084_s12 + $0x198] sm:$0xff] }
0x2188   : > { %15442 = vmatmul.mubr.msk.f32.vlgmr.msra.gmra.mrb[120].mxu0 %vm1651_vm2, %v10422_v40  ;;  %v13733_v40 = vld [vmem:[%s19084_s12 + $0x1b0] sm:$0xff] }
0x2189   : > { %15451 = vmatprep.mubr.msk.f32.mxu0 %vm16435_vm0, %v16436_v11  ;;  %15450 = vmatpush3.msra.mxu0 %v13683_v57 }
0x218a   : > { %v10416_v48 = vpop.xlane.xlu1 %10415  ;;  %15459 = vmatprep.subr.mxu0 %v16436_v11 }
0x218b   : > { %16346 = vrcp.f32 %v10416_v48  ;;  %v16120_v48 = vpack.c.bf16 %v13730_v33, %v13729_v44  ;;  %v13764_v44 = vld [vmem:[%s19084_s12 + $0x2a8] sm:$0xff] }
0x218d   : > { %v16345_v49 = vpop.eup %16344 }
0x218e   : > { %v10420_v52 = vmul.f32 %v16345_v49, %v16337_v29  ;;  %v16126_v49 = vpack.c.bf16 %v13734_v32, %v13733_v40  ;;  %v13762_v32 = vld [vmem:[%s19084_s12 + $0x298] sm:$0xff] }
0x2190   : > { %15437 = vmatmul.mubr.msk.f32.vlgmr.msra.gmra.mrb[118].mxu1 %vm1651_vm2, %v10420_v52 }
0x2191   : > { %15445 = vmatpush3.msra.mxu1 %v10066_v54  ;;  %15446 = vmatprep.mubr.msk.f32.mxu1 %vm16435_vm0, %v16436_v11 }
0x2192   : > { %15454 = vmatprep.subr.mxu1 %v16436_v11 }
0x2195   : > { %v16347_v55 = vpop.eup %16346 }
0x2196   : > { %v10424_v56 = vmul.f32 %v16347_v55, %v16339_v47 }
0x2198   : > { %15447 = vmatmul.mubr.msk.f32.vlgmr.msra.gmra.mrb[120].mxu1 %vm1651_vm2, %v10424_v56  ;;  %v11038_v56 = vrot.slane %v18592_v23, %v16997_v45  ;;  %v13740_v45 = vld [vmem:[%s19084_s12 + $0x1e8] sm:$0xff] }
0x2199   : > { %15456 = vmatprep.mubr.msk.f32.mxu1 %vm16435_vm0, %v16436_v11  ;;  %15455 = vmatpush3.msra.mxu1 %v13684_v50  ;;  %v13735_v50 = vld [vmem:[%s19084_s12 + $0x1c0] sm:$0xff] }
0x219a   : > { %15464 = vmatprep.subr.mxu1 %v16436_v11 }
0x2253   : > { %v10494_v60 = vpop.f32.mrb[118].mxu0 }
0x2254   : > { %v15433_v63 = vpop.f32.mrb[119].mxu0  ;;  %15452 = vmatmul.mubr.msk.f32.vlgmr.msra.gmra.mrb[122].mxu0 %vm1651_vm2, %v10494_v60  ;;  %v11043_v60 = vrot.slane %v18592_v23, %v17000_v46 }
0x2255   : > { %15460 = vmatpush3.msra.mxu0 %v13685_v58  ;;  %15461 = vmatprep.mubr.msk.f32.mxu0 %vm16435_vm0, %v16436_v11  ;;  %v13736_v63 = vld [vmem:[%s19084_s12 + $0x1c8] sm:$0xff] }
0x2256   : > { %16116 = vmatprep.subr.bf16.mxu0 %v16434_v3 }
0x225b   : > { %v10640_v0 = vpop.f32.mrb[120].mxu0 }
0x225c   : > { %v15443_v2 = vpop.f32.mrb[121].mxu0  ;;  %15462 = vmatmul.mubr.msk.f32.vlgmr.msra.gmra.mrb[124].mxu0 %vm1651_vm2, %v10640_v0  ;;  %v13739_v0 = vld [vmem:[%s19084_s12 + $0x1e0] sm:$0xff] }
0x225d   : > { %15477 = vmatprep.mubr.msk.f32.mxu0 %vm16435_vm0, %v16436_v11  ;;  %16118 = vmatpush3.bf16.msra.mxu0 %v16117_v39  ;;  %v13759_v39 = vld [vmem:[%s19084_s12 + $0x280] sm:$0xff] }
0x225e   : > { %16119 = vmatprep.subr.bf16.mxu0 %v16434_v3 }
0x2261   : > { %16121 = vmatpush3.bf16.msra.mxu0 %v16120_v48  ;;  %v13761_v48 = vld [vmem:[%s19084_s12 + $0x290] sm:$0xff] }
0x2262   : > { %16128 = vmatprep.subr.bf16.mxu0 %v16434_v3 }
0x2263   : > { %v10567_v6 = vpop.f32.mrb[118].mxu1 }
0x2264   : > { %v15438_v22 = vpop.f32.mrb[119].mxu1  ;;  %15457 = vmatmul.mubr.msk.f32.vlgmr.msra.gmra.mrb[122].mxu1 %vm1651_vm2, %v10567_v6  ;;  %v16135_v6 = vpack.c.bf16 %v13740_v45, %v13739_v0  ;;  %v13769_v0 = vld [vmem:[%s19084_s12 + $0x2d0] sm:$0xff]  ;;  %v13770_v45 = vld [vmem:[%s19084_s12 + $0x2d8] sm:$0xff] }
0x2265   : > { %15465 = vmatpush3.msra.mxu1 %v13686_v4  ;;  %15466 = vmatprep.mubr.msk.f32.mxu1 %vm16435_vm0, %v16436_v11  ;;  %v16129_v4 = vpack.c.bf16 %v13736_v63, %v13735_v50  ;;  %v13737_v22 = vld [vmem:[%s19084_s12 + $0x1d0] sm:$0xff]  ;;  %v13771_v50 = vld [vmem:[%s19084_s12 + $0x2e0] sm:$0xff] }
0x2266   : > { %16122 = vmatprep.subr.bf16.mxu1 %v16434_v3 }
0x226b   : > { %v10713_v20 = vpop.f32.mrb[120].mxu1 }
0x226c   : > { %v15448_v10 = vpop.f32.mrb[121].mxu1  ;;  %15467 = vmatmul.mubr.msk.f32.vlgmr.msra.gmra.mrb[124].mxu1 %vm1651_vm2, %v10713_v20  ;;  %v13738_v20 = vld [vmem:[%s19084_s12 + $0x1d8] sm:$0xff] }
0x226d   : > { %15488 = vmatprep.mubr.msk.f32.mxu1 %vm16435_vm0, %v16436_v11  ;;  %v13741_v10 = vld [vmem:[%s19084_s12 + $0x1f0] sm:$0xff] }
0x2327   : > { %v10786_v12 = vpop.f32.mrb[122].mxu0 }
0x2328   : > { %v15453_v13 = vpop.f32.mrb[123].mxu0  ;;  %v11009_v17 = vsel %vm759_vm1, %v10786_v12, 0.0  ;;  %v13742_v12 = vld [vmem:[%s19084_s12 + $0x1f8] sm:$0xff] }
0x2329   : > { %v16132_v13 = vpack.c.bf16 %v13738_v20, %v13737_v22 }
0x232f   : > { %v10932_v15 = vpop.f32.mrb[124].mxu0 }
0x2330   : > { %v15463_v51 = vpop.f32.mrb[125].mxu0  ;;  %v11012_v62 = vsel %vm759_vm1, %v10932_v15, 0.0  ;;  %v16138_v15 = vpack.c.bf16 %v13742_v12, %v13741_v10 }
0x2331   : > { %v13743_v51 = vld [vmem:[%s19084_s12 + $0x200] sm:$0xff] }
0x2337   : > { %v10859_v16 = vpop.f32.mrb[122].mxu1 }
0x2338   : > { %v11010_v59 = vsel %vm759_vm1, %v10859_v16, 0.0  ;;  %v15458_v19 = vpop.f32.mrb[123].mxu1  ;;  %v13744_v16 = vld [vmem:[%s19084_s12 + $0x208] sm:$0xff] }
0x2339   : > { %v11011_v43 = vadd.f32 %v11010_v59, %v11009_v17  ;;  %v13747_v17 = vld [vmem:[%s19084_s12 + $0x220] sm:$0xff]  ;;  %v13748_v59 = vld [vmem:[%s19084_s12 + $0x228] sm:$0xff]  ;;  %v16141_v19 = vpack.c.bf16 %v13744_v16, %v13743_v51 }
0x233b   : > { %v11013_v5 = vadd.f32 %v11012_v62, %v11011_v43  ;;  %v16147_v43 = vpack.c.bf16 %v13748_v59, %v13747_v17  ;;  %v13745_v62 = vld [vmem:[%s19084_s12 + $0x210] sm:$0xff] }
0x233c   : > { %v13799_v59 = vld [vmem:[%s19085_s13 + $0x10] ss:$0 sm:$0xff] }
0x233f   : > { %v11005_v24 = vpop.f32.mrb[124].mxu1 }
0x2340   : > { %v11014_v14 = vsel %vm759_vm1, %v11005_v24, 0.0  ;;  %v15468_v26 = vpop.f32.mrb[125].mxu1  ;;  %v13749_v24 = vld [vmem:[%s19084_s12 + $0x230] sm:$0xff] }
0x2341   : > { %v11015_v27 = vadd.f32 %v11014_v14, %v11013_v5  ;;  %v13746_v5 = vld [vmem:[%s19084_s12 + $0x218] sm:$0xff] }
0x2342   : > { %v16144_v14 = vpack.c.bf16 %v13746_v5, %v13745_v62  ;;  %v13791_v62 = vld [vmem:[%s19085_s13 + $0xc] ss:$0 sm:$0xff]  ;;  %v13792_v5 = vld [vmem:[%s19085_s13 + $0xd] ss:$0 sm:$0xff] }
0x2343   : > { %v11020_v7 = vadd.f32 %v11019_v25, %v11015_v27  ;;  %v13750_v25 = vld [vmem:[%s19084_s12 + $0x238] sm:$0xff]  ;;  %v13751_v27 = vld [vmem:[%s19084_s12 + $0x240] sm:$0xff] }
0x2344   : > { %v16150_v26 = vpack.c.bf16 %v13750_v25, %v13749_v24 }
0x2345   : > { %v11021_v28 = vadd.f32 %v11020_v7, %v18289_v53  ;;  %v13731_v53 = vld [vmem:[%s19084_s12 + $0x1a0] sm:$0xff]  ;;  %v13752_v7 = vld [vmem:[%s19084_s12 + $0x248] sm:$0xff] }
0x2346   : > { %v16123_v41 = vpack.c.bf16 %v13732_v42, %v13731_v53  ;;  %v13760_v42 = vld [vmem:[%s19084_s12 + $0x288] sm:$0xff] }
0x2347   : > { %v11022_v29 = vsel %vm759_vm1, %v11021_v28, 0.0  ;;  %v16165_v33 = vpack.c.bf16 %v13760_v42, %v13759_v39 }
0x2348   : > { %11023 = vadd.xlane.f32.xlu0 %v11022_v29  ;;  %16124 = vmatpush3.bf16.msra.mxu1 %v16123_v41  ;;  %v13756_v29 = vld [vmem:[%s19084_s12 + $0x268] sm:$0xff]  ;;  %v13763_v41 = vld [vmem:[%s19084_s12 + $0x2a0] sm:$0xff] }
0x2349   : > { %16125 = vmatprep.subr.bf16.mxu1 %v16434_v3  ;;  %v16171_v40 = vpack.c.bf16 %v13764_v44, %v13763_v41  ;;  %v13807_v41 = vld [vmem:[%s19085_s13 + $0x14] ss:$0 sm:$0xff]  ;;  %v13808_v44 = vld [vmem:[%s19085_s13 + $0x15] ss:$0 sm:$0xff] }
0x234c   : > { %16127 = vmatpush3.bf16.msra.mxu1 %v16126_v49  ;;  %v13765_v49 = vld [vmem:[%s19084_s12 + $0x2b0] sm:$0xff] }
0x234d   : > { %16134 = vmatprep.subr.bf16.mxu1 %v16434_v3 }
0x23d5   : > { %v11024_v30 = vpop.xlane.xlu0 %11023 }
0x23d6   : > { %v11025_v47 = vmul.f32 0.03125, %v11024_v30  ;;  %v16153_v30 = vpack.c.bf16 %v13752_v7, %v13751_v27 }
0x23d8   : > { %v11026_v34 = vsub.f32 %v11021_v28, %v11025_v47  ;;  %v13755_v28 = vld [vmem:[%s19084_s12 + $0x260] sm:$0xff] }
0x23d9   : > { %v16159_v47 = vpack.c.bf16 %v13756_v29, %v13755_v28  ;;  %v13801_v28 = vld [vmem:[%s19085_s13 + $0x12] ss:$0 sm:$0xff]  ;;  %v13802_v29 = vld [vmem:[%s19085_s13 + $0x13] ss:$0 sm:$0xff] }
0x23da   : > { %v11027_v35 = vmul.f32 %v11026_v34, %v11026_v34 }
0x23dc   : > { %v11028_v37 = vsel %vm759_vm1, %v11027_v35, 0.0  ;;  %v13754_v35 = vld [vmem:[%s19084_s12 + $0x258] sm:$0xff] }
0x23dd   : > { %11029 = vadd.xlane.f32.xlu1 %v11028_v37  ;;  %v13757_v37 = vld [vmem:[%s19084_s12 + $0x270] sm:$0xff] }
0x23de   : > { %v16162_v53 = vpack.c.bf16 %v13758_v8, %v13757_v37 }
0x246a   : > { %v11030_v52 = vpop.xlane.xlu1 %11029 }
0x246b   : > { %v11031_v54 = vmul.f32 0.03125, %v11030_v52  ;;  %v13766_v52 = vld [vmem:[%s19084_s12 + $0x2b8] sm:$0xff] }
0x246d   : > { %v11032_v55 = vadd.f32 1e-05, %v11031_v54  ;;  %v16168_v54 = vpack.c.bf16 %v13762_v32, %v13761_v48 }
0x246f   : > { %16348 = vrsqrt.f32 %v11032_v55  ;;  %v16174_v55 = vpack.c.bf16 %v13766_v52, %v13765_v49 }
0x2479   : > { %v16349_v57 = vpop.eup %16348 }
0x247a   : > { %v11034_v58 = vmul.f32 %v16349_v57, %v11026_v34  ;;  %v13753_v34 = vld [vmem:[%s19084_s12 + $0x250] sm:$0xff]  ;;  %v13768_v57 = vld [vmem:[%s19084_s12 + $0x2c8] sm:$0xff] }
0x247b   : > { %v16156_v38 = vpack.c.bf16 %v13754_v35, %v13753_v34  ;;  %v13793_v34 = vld [vmem:[%s19085_s13 + $0xe] ss:$0 sm:$0xff]  ;;  %v13794_v35 = vld [vmem:[%s19085_s13 + $0xf] ss:$0 sm:$0xff] }
0x247c   : > { %v11039_v2 = vmul.f32 %v11038_v56, %v11034_v58  ;;  %v13767_v56 = vld [vmem:[%s19084_s12 + $0x2c0] sm:$0xff]  ;;  %v13772_v58 = vld [vmem:[%s19084_s12 + $0x2e8] sm:$0xff] }
0x247d   : > { %v16183_v63 = vpack.c.bf16 %v13772_v58, %v13771_v50 }
0x247e   : > { %v18647_v46 = vadd.f32 %v11043_v60, %v11039_v2  ;;  %v16177_v60 = vpack.c.bf16 %v13768_v57, %v13767_v56  ;;  %v13773_v2 = vld [vmem:[%s19084_s12 + $0x2f0] sm:$0xff] }
0x2480   : > { %15478 = vmatmul.mubr.msk.f32.vlgmr.msra.gmra.mrb[126].mxu0 %vm759_vm1, %v18647_v46  ;;  %15489 = vmatmul.mubr.msk.f32.vlgmr.msra.gmra.mrb[126].mxu1 %vm759_vm1, %v18647_v46 }
0x2481   : > { %16130 = vmatpush3.bf16.msra.mxu0 %v16129_v4  ;;  %16136 = vmatpush3.bf16.msra.mxu1 %v16135_v6  ;;  %v13774_v4 = vld [vmem:[%s19084_s12 + $0x2f8] sm:$0xff]  ;;  %v16180_v6 = vpack.c.bf16 %v13770_v45, %v13769_v0 }
0x2482   : > { %16131 = vmatprep.subr.bf16.mxu0 %v16434_v3  ;;  %16137 = vmatprep.subr.bf16.mxu1 %v16434_v3  ;;  %v16186_v22 = vpack.c.bf16 %v13774_v4, %v13773_v2 }
0x2483   : > { %15499 = vmatprep.mubr.msk.f32.mxu0 %vm16435_vm0, %v16436_v11  ;;  %15510 = vmatprep.mubr.msk.f32.mxu1 %vm16435_vm0, %v16436_v11 }
0x2485   : > { %16133 = vmatpush3.bf16.msra.mxu0 %v16132_v13  ;;  %16139 = vmatpush3.bf16.msra.mxu1 %v16138_v15 }
0x2486   : > { %16140 = vmatprep.subr.bf16.mxu0 %v16434_v3  ;;  %16146 = vmatprep.subr.bf16.mxu1 %v16434_v3 }
0x2488   : > { %15500 = vmatmul.mubr.msk.f32.vlgmr.msra.gmra.mrb[128].mxu0 %vm759_vm1, %v18647_v46  ;;  %15511 = vmatmul.mubr.msk.f32.vlgmr.msra.gmra.mrb[128].mxu1 %vm759_vm1, %v18647_v46 }
0x2489   : > { %16142 = vmatpush3.bf16.msra.mxu0 %v16141_v19  ;;  %16148 = vmatpush3.bf16.msra.mxu1 %v16147_v43 }
0x248a   : > { %16143 = vmatprep.subr.bf16.mxu0 %v16434_v3  ;;  %16149 = vmatprep.subr.bf16.mxu1 %v16434_v3 }
0x248b   : > { %15521 = vmatprep.mubr.msk.f32.mxu0 %vm16435_vm0, %v16436_v11  ;;  %15532 = vmatprep.mubr.msk.f32.mxu1 %vm16435_vm0, %v16436_v11 }
0x248d   : > { %16145 = vmatpush3.bf16.msra.mxu0 %v16144_v14  ;;  %16151 = vmatpush3.bf16.msra.mxu1 %v16150_v26 }
0x248e   : > { %16152 = vmatprep.subr.bf16.mxu0 %v16434_v3  ;;  %16158 = vmatprep.subr.bf16.mxu1 %v16434_v3 }
0x2490   : > { %15522 = vmatmul.mubr.msk.f32.vlgmr.msra.gmra.mrb[130].mxu0 %vm759_vm1, %v17950_v21  ;;  %15533 = vmatmul.mubr.msk.f32.vlgmr.msra.gmra.mrb[130].mxu1 %vm759_vm1, %v17950_v21 }
0x2491   : > { %16154 = vmatpush3.bf16.msra.mxu0 %v16153_v30  ;;  %16160 = vmatpush3.bf16.msra.mxu1 %v16159_v47 }
0x2492   : > { %16155 = vmatprep.subr.bf16.mxu0 %v16434_v3  ;;  %16161 = vmatprep.subr.bf16.mxu1 %v16434_v3 }
0x2493   : > { %15543 = vmatprep.mubr.msk.f32.mxu0 %vm16435_vm0, %v16436_v11  ;;  %15554 = vmatprep.mubr.msk.f32.mxu1 %vm16435_vm0, %v16436_v11 }
0x2495   : > { %16157 = vmatpush3.bf16.msra.mxu0 %v16156_v38  ;;  %16163 = vmatpush3.bf16.msra.mxu1 %v16162_v53 }
0x2496   : > { %16164 = vmatprep.subr.bf16.mxu0 %v16434_v3  ;;  %16170 = vmatprep.subr.bf16.mxu1 %v16434_v3 }
0x2498   : > { %15544 = vmatmul.mubr.msk.f32.vlgmr.msra.gmra.mrb[132].mxu0 %vm759_vm1, %v17950_v21  ;;  %15555 = vmatmul.mubr.msk.f32.vlgmr.msra.gmra.mrb[132].mxu1 %vm759_vm1, %v17950_v21 }
0x2499   : > { %16166 = vmatpush3.bf16.msra.mxu0 %v16165_v33  ;;  %16172 = vmatpush3.bf16.msra.mxu1 %v16171_v40 }
0x249a   : > { %16167 = vmatprep.subr.bf16.mxu0 %v16434_v3  ;;  %16173 = vmatprep.subr.bf16.mxu1 %v16434_v3 }
0x249b   : > { %15565 = vmatprep.mubr.msk.f32.mxu0 %vm16435_vm0, %v16436_v11  ;;  %15576 = vmatprep.mubr.msk.f32.mxu1 %vm16435_vm0, %v16436_v11 }
0x249d   : > { %16169 = vmatpush3.bf16.msra.mxu0 %v16168_v54  ;;  %16175 = vmatpush3.bf16.msra.mxu1 %v16174_v55 }
0x249e   : > { %16176 = vmatprep.subr.bf16.mxu0 %v16434_v3  ;;  %16182 = vmatprep.subr.bf16.mxu1 %v16434_v3 }
0x24a0   : > { %15566 = vmatmul.mubr.msk.f32.vlgmr.msra.gmra.mrb[134].mxu0 %vm759_vm1, %v17950_v21  ;;  %15577 = vmatmul.mubr.msk.f32.vlgmr.msra.gmra.mrb[134].mxu1 %vm759_vm1, %v17950_v21 }
0x24a1   : > { %16178 = vmatpush3.bf16.msra.mxu0 %v16177_v60  ;;  %16184 = vmatpush3.bf16.msra.mxu1 %v16183_v63 }
0x24a2   : > { %16179 = vmatprep.subr.bf16.mxu0 %v16434_v3  ;;  %16185 = vmatprep.subr.bf16.mxu1 %v16434_v3 }
0x24a3   : > { %15587 = vmatprep.mubr.msk.f32.mxu0 %vm16435_vm0, %v16436_v11  ;;  %15598 = vmatprep.mubr.msk.f32.mxu1 %vm16435_vm0, %v16436_v11 }
0x24a5   : > { %16181 = vmatpush3.bf16.msra.mxu0 %v16180_v6  ;;  %16187 = vmatpush3.bf16.msra.mxu1 %v16186_v22 }
0x24a6   : > { %15601 = vmatprep.subr.mxu0 %v16436_v11  ;;  %15606 = vmatprep.subr.mxu1 %v16436_v11 }
0x24a8   : > { %15588 = vmatmul.mubr.msk.f32.vlgmr.msra.gmra.mrb[136].mxu0 %vm759_vm1, %v17950_v21  ;;  %15599 = vmatmul.mubr.msk.f32.vlgmr.msra.gmra.mrb[136].mxu1 %vm759_vm1, %v17950_v21  ;;  %v13800_v21 = vld [vmem:[%s19085_s13 + $0x11] ss:$0 sm:$0xff] }
0x24a9   : > { %15603 = vmatprep.mubr.msk.f32.mxu0 %vm16435_vm0, %v16436_v11  ;;  %15608 = vmatprep.mubr.msk.f32.mxu1 %vm16435_vm0, %v16436_v11 }
0x2553   : > { %v11205_v20 = vpop.f32.mrb[126].mxu0  ;;  %v11275_v10 = vpop.f32.mrb[126].mxu1 }
0x2554   : > { %v15479_v12 = vpop.f32.mrb[127].mxu0  ;;  %v15490_v13 = vpop.f32.mrb[127].mxu1  ;;  %v11206_v27 = vadd.f32 %v13791_v62, %v11205_v20  ;;  %v11276_v7 = vadd.f32 %v13792_v5, %v11275_v10 }
0x255b   : > { %v11345_v15 = vpop.f32.mrb[128].mxu0  ;;  %v11415_v51 = vpop.f32.mrb[128].mxu1 }
0x255c   : > { %v15501_v16 = vpop.f32.mrb[129].mxu0  ;;  %v15512_v17 = vpop.f32.mrb[129].mxu1  ;;  %v11346_v39 = vadd.f32 %v13793_v34, %v11345_v15  ;;  %v11416_v42 = vadd.f32 %v13794_v35, %v11415_v51 }
0x2563   : > { %v11509_v19 = vpop.f32.mrb[130].mxu0  ;;  %v11579_v43 = vpop.f32.mrb[130].mxu1 }
0x2564   : > { %v11510_v24 = vadd.f32 %v13799_v59, %v11509_v19  ;;  %v11580_v25 = vadd.f32 %v13800_v21, %v11579_v43  ;;  %v15523_v14 = vpop.f32.mrb[131].mxu0  ;;  %v15534_v26 = vpop.f32.mrb[131].mxu1 }
0x2566   : > { %15602 = vmatpush3.xpose.msk.msra.mxu0 %vm1651_vm2, %v11510_v24  ;;  %15607 = vmatpush3.xpose.msk.msra.mxu1 %vm1651_vm2, %v11580_v25 }
0x2567   : > { %15611 = vmatprep.subr.mxu0 %v16436_v11  ;;  %15616 = vmatprep.subr.mxu1 %v16436_v11 }
0x2569   : > { %15604 = vmatmul.mubr.msk.f32.vlgmr.msra.gmra.mrb[138].mxu0 %vm1651_vm2, %v11206_v27  ;;  %15609 = vmatmul.mubr.msk.f32.vlgmr.msra.gmra.mrb[138].mxu1 %vm1651_vm2, %v11276_v7 }
0x256a   : > { %15613 = vmatprep.mubr.msk.f32.mxu0 %vm16435_vm0, %v16436_v11  ;;  %15618 = vmatprep.mubr.msk.f32.mxu1 %vm16435_vm0, %v16436_v11 }
0x256b   : > { %v11649_v30 = vpop.f32.mrb[132].mxu0  ;;  %v11719_v47 = vpop.f32.mrb[132].mxu1 }
0x256c   : > { %v11650_v37 = vadd.f32 %v13801_v28, %v11649_v30  ;;  %v11720_v8 = vadd.f32 %v13802_v29, %v11719_v47  ;;  %v15545_v38 = vpop.f32.mrb[133].mxu0  ;;  %v15556_v53 = vpop.f32.mrb[133].mxu1 }
0x256e   : > { %15612 = vmatpush3.xpose.msk.msra.mxu0 %vm1651_vm2, %v11650_v37  ;;  %15617 = vmatpush3.xpose.msk.msra.mxu1 %vm1651_vm2, %v11720_v8 }
0x256f   : > { %15621 = vmatprep.subr.mxu0 %v16436_v11  ;;  %15626 = vmatprep.subr.mxu1 %v16436_v11 }
0x2571   : > { %15614 = vmatmul.mubr.msk.f32.vlgmr.msra.gmra.mrb[140].mxu0 %vm1651_vm2, %v11346_v39  ;;  %15619 = vmatmul.mubr.msk.f32.vlgmr.msra.gmra.mrb[140].mxu1 %vm1651_vm2, %v11416_v42  ;;  %v13810_v39 = vld [vmem:[%s19085_s13 + $0x17] ss:$0 sm:$0xff] }
0x2572   : > { %15623 = vmatprep.mubr.msk.f32.mxu0 %vm16435_vm0, %v16436_v11  ;;  %15628 = vmatprep.mubr.msk.f32.mxu1 %vm16435_vm0, %v16436_v11 }
0x2573   : > { %v11813_v33 = vpop.f32.mrb[134].mxu0  ;;  %v11883_v40 = vpop.f32.mrb[134].mxu1 }
0x2574   : > { %v11814_v48 = vadd.f32 %v13807_v41, %v11813_v33  ;;  %v11884_v32 = vadd.f32 %v13808_v44, %v11883_v40  ;;  %v15567_v49 = vpop.f32.mrb[135].mxu0  ;;  %v15578_v52 = vpop.f32.mrb[135].mxu1  ;;  %v13809_v41 = vld [vmem:[%s19085_s13 + $0x16] ss:$0 sm:$0xff] }
0x2576   : > { %15622 = vmatpush3.msra.mxu0 %v11814_v48  ;;  %15627 = vmatpush3.msra.mxu1 %v11884_v32 }
0x2577   : > { %15631 = vmatprep.subr.mxu0 %v16436_v11  ;;  %15636 = vmatprep.subr.mxu1 %v16436_v11 }
0x257b   : > { %v18874_v54 = vpop.f32.mrb[136].mxu0  ;;  %v18876_v55 = vpop.f32.mrb[136].mxu1 }
0x257c   : > { %v15589_v56 = vpop.f32.mrb[137].mxu0  ;;  %v15600_v57 = vpop.f32.mrb[137].mxu1  ;;  %v12024_v40 = vadd.f32 %v13810_v39, %v18876_v55  ;;  %v11954_v32 = vadd.f32 %v13809_v41, %v18874_v54  ;;  %v13838_v39 = vld [vmem:[%s19088_s16 + $0x50] sm:$0xff]  ;;  %v13839_v41 = vld [vmem:[%s19088_s16 + $0x58] sm:$0xff] }
0x257d   : > { %v13787_v56 = vld [vmem:[%s19086_s14 + $0x20] sm:$0xff]  ;;  %v13788_v57 = vld [vmem:[%s19086_s14 + $0x28] sm:$0xff] }
0x263c   : > { %v12099_v50 = vpop.f32.mrb[138].mxu0  ;;  %v12175_v58 = vpop.f32.mrb[138].mxu1 }
0x263d   : > { %v12331_v60 = vmul.f32 0.35355338, %v12099_v50  ;;  %v12332_v63 = vmul.f32 0.35355338, %v12175_v58  ;;  %v15605_v0 = vpop.f32.mrb[139].mxu0  ;;  %v15610_v45 = vpop.f32.mrb[139].mxu1 }
0x263e   : > { %v13790_v50 = vld [vmem:[%s19086_s14 + $0x38] sm:$0xff] }
0x263f   : > { %v12338_v2 = vsel %vm1651_vm2, %v12332_v63, -inf  ;;  %v12335_v4 = vsel %vm1651_vm2, %v12331_v60, -inf }
0x2640   : > { %12339 = vmax.xlane.f32.xlu1 %v12338_v2  ;;  %12336 = vmax.xlane.f32.xlu0 %v12335_v4 }
0x2644   : > { %v12251_v6 = vpop.f32.mrb[140].mxu0  ;;  %v12327_v22 = vpop.f32.mrb[140].mxu1 }
0x2645   : > { %v12333_v20 = vmul.f32 0.35355338, %v12251_v6  ;;  %v12334_v10 = vmul.f32 0.35355338, %v12327_v22  ;;  %v15615_v12 = vpop.f32.mrb[141].mxu0  ;;  %v15620_v13 = vpop.f32.mrb[141].mxu1 }
0x2647   : > { %v12344_v15 = vsel %vm1651_vm2, %v12334_v10, -inf  ;;  %v12341_v51 = vsel %vm1651_vm2, %v12333_v20, -inf }
0x2648   : > { %12345 = vmax.xlane.f32.xlu1 %v12344_v15  ;;  %12342 = vmax.xlane.f32.xlu0 %v12341_v51 }
0x26cd   : > { %v12340_v16 = vpop.xlane.xlu1 %12339  ;;  %v12337_v17 = vpop.xlane.xlu0 %12336 }
0x26ce   : > { %v12348_v59 = vsub.f32 %v12332_v63, %v12340_v16  ;;  %v12347_v21 = vsub.f32 %v12331_v60, %v12337_v17  ;;  %v13789_v60 = vld [vmem:[%s19086_s14 + $0x30] sm:$0xff] }
0x26d0   : > { %v12353_v19 = vmul.f32 1.442695, %v12348_v59  ;;  %v12351_v43 = vmul.f32 1.442695, %v12347_v21 }
0x26d2   : > { %16350 = vpow2.f32 %v12353_v19 }
0x26d3   : > { %16352 = vpow2.f32 %v12351_v43 }
0x26d5   : > { %v12346_v62 = vpop.xlane.xlu1 %12345  ;;  %v12343_v5 = vpop.xlane.xlu0 %12342 }
0x26d6   : > { %v12350_v24 = vsub.f32 %v12334_v10, %v12346_v62  ;;  %v12349_v25 = vsub.f32 %v12333_v20, %v12343_v5  ;;  %v12973_v5 = vrot.slane %v18592_v23, %v17023_v61  ;;  %v13831_v61 = vld [vmem:[%s19087_s15 + $0x20] sm:$0xff] }
0x26d8   : > { %v12357_v14 = vmul.f32 1.442695, %v12350_v24  ;;  %v12355_v26 = vmul.f32 1.442695, %v12349_v25 }
0x26da   : > { %16354 = vpow2.f32 %v12357_v14 }
0x26db   : > { %16356 = vpow2.f32 %v12355_v26 }
0x26dc   : > { %v16351_v27 = vpop.eup %16350 }
0x26dd   : > { %v16353_v7 = vpop.eup %16352  ;;  %v12362_v28 = vsel %vm1651_vm2, %v16351_v27, 0.0 }
0x26de   : > { %12363 = vadd.xlane.f32.xlu1 %v12362_v28  ;;  %v12359_v29 = vsel %vm1651_vm2, %v16353_v7, 0.0 }
0x26df   : > { %12360 = vadd.xlane.f32.xlu0 %v12359_v29 }
0x26e4   : > { %v16355_v30 = vpop.eup %16354 }
0x26e5   : > { %v16357_v47 = vpop.eup %16356  ;;  %v12368_v34 = vsel %vm1651_vm2, %v16355_v30, 0.0 }
0x26e6   : > { %12369 = vadd.xlane.f32.xlu1 %v12368_v34  ;;  %v12365_v35 = vsel %vm1651_vm2, %v16357_v47, 0.0  ;;  %v13832_v34 = vld [vmem:[%s19087_s15 + $0x28] sm:$0xff] }
0x26e7   : > { %12366 = vadd.xlane.f32.xlu0 %v12365_v35  ;;  %v16189_v35 = vpack.c.bf16 %v13832_v34, %v13831_v61 }
0x276b   : > { %v12364_v37 = vpop.xlane.xlu1 %12363 }
0x276c   : > { %16358 = vrcp.f32 %v12364_v37  ;;  %v12361_v8 = vpop.xlane.xlu0 %12360  ;;  %v13834_v37 = vld [vmem:[%s19087_s15 + $0x38] sm:$0xff] }
0x276d   : > { %16360 = vrcp.f32 %v12361_v8 }
0x2773   : > { %v12370_v38 = vpop.xlane.xlu1 %12369 }
0x2774   : > { %16362 = vrcp.f32 %v12370_v38  ;;  %v12367_v53 = vpop.xlane.xlu0 %12366  ;;  %v13836_v38 = vld [vmem:[%s19088_s16 + $0x40] sm:$0xff] }
0x2775   : > { %16364 = vrcp.f32 %v12367_v53  ;;  %v13837_v53 = vld [vmem:[%s19088_s16 + $0x48] sm:$0xff] }
0x2776   : > { %v16359_v42 = vpop.eup %16358 }
0x2777   : > { %v16361_v44 = vpop.eup %16360  ;;  %v12374_v33 = vmul.f32 %v16359_v42, %v16351_v27  ;;  %v16195_v42 = vpack.c.bf16 %v13837_v53, %v13836_v38 }
0x2778   : > { %v12372_v48 = vmul.f32 %v16361_v44, %v16353_v7  ;;  %v16198_v44 = vpack.c.bf16 %v13839_v41, %v13838_v39 }
0x2779   : > { %15629 = vmatmul.mubr.msk.f32.vlgmr.msra.gmra.mrb[142].mxu1 %vm1651_vm2, %v12374_v33  ;;  %v13840_v33 = vld [vmem:[%s19088_s16 + $0x60] sm:$0xff] }
0x277a   : > { %15624 = vmatmul.mubr.msk.f32.vlgmr.msra.gmra.mrb[142].mxu0 %vm1651_vm2, %v12372_v48  ;;  %15637 = vmatpush3.msra.mxu1 %v12024_v40  ;;  %v13841_v40 = vld [vmem:[%s19088_s16 + $0x68] sm:$0xff] }
0x277b   : > { %15632 = vmatpush3.msra.mxu0 %v11954_v32  ;;  %15633 = vmatprep.mubr.msk.f32.mxu0 %vm16435_vm0, %v16436_v11  ;;  %v16201_v48 = vpack.c.bf16 %v13841_v40, %v13840_v33 }
0x277c   : > { %15638 = vmatprep.mubr.msk.f32.mxu1 %vm16435_vm0, %v16436_v11  ;;  %15641 = vmatprep.subr.mxu0 %v16436_v11 }
0x277d   : > { %15646 = vmatprep.subr.mxu1 %v16436_v11 }
0x277e   : > { %v16363_v49 = vpop.eup %16362 }
0x277f   : > { %v16365_v52 = vpop.eup %16364  ;;  %v12378_v55 = vmul.f32 %v16363_v49, %v16355_v30 }
0x2780   : > { %v12376_v54 = vmul.f32 %v16365_v52, %v16357_v47 }
0x2781   : > { %15639 = vmatmul.mubr.msk.f32.vlgmr.msra.gmra.mrb[144].mxu1 %vm1651_vm2, %v12378_v55  ;;  %v12992_v55 = vrot.slane %v18592_v23, %v17058_v18  ;;  %v13843_v18 = vld [vmem:[%s19088_s16 + $0x78] sm:$0xff] }
0x2782   : > { %15634 = vmatmul.mubr.msk.f32.vlgmr.msra.gmra.mrb[144].mxu0 %vm1651_vm2, %v12376_v54  ;;  %15648 = vmatprep.mubr.msk.f32.mxu1 %vm16435_vm0, %v16436_v11 }
0x2783   : > { %15643 = vmatprep.mubr.msk.f32.mxu0 %vm16435_vm0, %v16436_v11  ;;  %15642 = vmatpush3.msra.mxu0 %v13787_v56 }
0x2784   : > { %15647 = vmatpush3.msra.mxu1 %v13788_v57  ;;  %15651 = vmatprep.subr.mxu0 %v16436_v11  ;;  %v12997_v57 = vrot.slane %v18592_v23, %v17061_v31  ;;  %v13844_v31 = vld [vmem:[%s19090_s18 + $0x1] ss:$0 sm:$0xff] }
0x2785   : > { %15656 = vmatprep.subr.mxu1 %v16436_v11 }
0x284c   : > { %v12521_v58 = vpop.f32.mrb[142].mxu1 }
0x284d   : > { %v12448_v63 = vpop.f32.mrb[142].mxu0  ;;  %v15630_v0 = vpop.f32.mrb[143].mxu1  ;;  %15649 = vmatmul.mubr.msk.f32.vlgmr.msra.gmra.mrb[146].mxu1 %vm1651_vm2, %v12521_v58 }
0x284e   : > { %v15625_v45 = vpop.f32.mrb[143].mxu0  ;;  %15644 = vmatmul.mubr.msk.f32.vlgmr.msra.gmra.mrb[146].mxu0 %vm1651_vm2, %v12448_v63  ;;  %15657 = vmatpush3.msra.mxu1 %v13790_v50 }
0x284f   : > { %15652 = vmatpush3.msra.mxu0 %v13789_v60  ;;  %15653 = vmatprep.mubr.msk.f32.mxu0 %vm16435_vm0, %v16436_v11  ;;  %v13842_v60 = vld [vmem:[%s19088_s16 + $0x70] sm:$0xff] }
0x2850   : > { %15658 = vmatprep.mubr.msk.f32.mxu1 %vm16435_vm0, %v16436_v11  ;;  %16188 = vmatprep.subr.bf16.mxu0 %v16434_v3  ;;  %v16204_v63 = vpack.c.bf16 %v13843_v18, %v13842_v60 }
0x2851   : > { %16194 = vmatprep.subr.bf16.mxu1 %v16434_v3 }
0x2854   : > { %v12667_v2 = vpop.f32.mrb[144].mxu1 }
0x2855   : > { %v12594_v4 = vpop.f32.mrb[144].mxu0  ;;  %v15640_v6 = vpop.f32.mrb[145].mxu1  ;;  %15659 = vmatmul.mubr.msk.f32.vlgmr.msra.gmra.mrb[148].mxu1 %vm1651_vm2, %v12667_v2 }
0x2856   : > { %v15635_v22 = vpop.f32.mrb[145].mxu0  ;;  %15654 = vmatmul.mubr.msk.f32.vlgmr.msra.gmra.mrb[148].mxu0 %vm1651_vm2, %v12594_v4  ;;  %15688 = vmatprep.mubr.msk.f32.mxu1 %vm16435_vm0, %v16436_v11 }
0x2857   : > { %15669 = vmatprep.mubr.msk.f32.mxu0 %vm16435_vm0, %v16436_v11  ;;  %16190 = vmatpush3.bf16.msra.mxu0 %v16189_v35 }
0x2858   : > { %16191 = vmatprep.subr.bf16.mxu0 %v16434_v3  ;;  %16196 = vmatpush3.bf16.msra.mxu1 %v16195_v42 }
0x2859   : > { %16197 = vmatprep.subr.bf16.mxu1 %v16434_v3 }
0x285c   : > { %16199 = vmatpush3.bf16.msra.mxu1 %v16198_v44 }
0x285d   : > { %16200 = vmatprep.subr.bf16.mxu1 %v16434_v3 }
0x2860   : > { %16202 = vmatpush3.bf16.msra.mxu1 %v16201_v48 }
0x2861   : > { %16203 = vmatprep.subr.bf16.mxu1 %v16434_v3 }
0x2864   : > { %16205 = vmatpush3.bf16.msra.mxu1 %v16204_v63 }
0x2920   : > { %v12813_v20 = vpop.f32.mrb[146].mxu1 }
0x2921   : > { %v12740_v10 = vpop.f32.mrb[146].mxu0  ;;  %v12964_v12 = vsel %vm759_vm1, %v12813_v20, 0.0  ;;  %v15650_v13 = vpop.f32.mrb[147].mxu1 }
0x2922   : > { %v12963_v15 = vsel %vm759_vm1, %v12740_v10, 0.0  ;;  %v15645_v51 = vpop.f32.mrb[147].mxu0 }
0x2923   : > { %v12965_v16 = vadd.f32 %v12964_v12, %v12963_v15 }
0x2928   : > { %v12959_v17 = vpop.f32.mrb[148].mxu1 }
0x2929   : > { %v12886_v59 = vpop.f32.mrb[148].mxu0  ;;  %v15660_v21 = vpop.f32.mrb[149].mxu1  ;;  %v12968_v24 = vsel %vm759_vm1, %v12959_v17, 0.0 }
0x292a   : > { %v12966_v19 = vsel %vm759_vm1, %v12886_v59, 0.0  ;;  %v15655_v43 = vpop.f32.mrb[149].mxu0  ;;  %v13196_v59 = vld [vmem:[%s19091_s19] sm:$0xff] }
0x292b   : > { %v12967_v62 = vadd.f32 %v12966_v19, %v12965_v16  ;;  %v13198_v19 = vld [vmem:[%s19091_s19 + $0x10] sm:$0xff]  ;;  %v13199_v43 = vld [vmem:[%s19091_s19 + $0x18] sm:$0xff] }
0x292d   : > { %v12969_v25 = vadd.f32 %v12968_v24, %v12967_v62  ;;  %v16210_v62 = vpack.c.bf16 %v13199_v43, %v13198_v19 }
0x292f   : > { %v12974_v14 = vadd.f32 %v12973_v5, %v12969_v25 }
0x2931   : > { %v12975_v26 = vadd.f32 %v12974_v14, %v18647_v46  ;;  %v13833_v46 = vld [vmem:[%s19087_s15 + $0x30] sm:$0xff] }
0x2932   : > { %v16192_v8 = vpack.c.bf16 %v13834_v37, %v13833_v46 }
0x2933   : > { %v12976_v27 = vsel %vm759_vm1, %v12975_v26, 0.0 }
0x2934   : > { %12977 = vadd.xlane.f32.xlu0 %v12976_v27  ;;  %16193 = vmatpush3.bf16.msra.mxu0 %v16192_v8  ;;  %v13847_v27 = vld [vmem:[%s19089_s17 + $0x18] ss:$0 sm:$0xff] }
0x2935   : > { %16206 = vmatprep.subr.bf16.mxu0 %v16434_v3 }
0x29c1   : > { %v12978_v7 = vpop.xlane.xlu0 %12977 }
0x29c2   : > { %v12979_v28 = vmul.f32 0.03125, %v12978_v7 }
0x29c4   : > { %v12980_v29 = vsub.f32 %v12975_v26, %v12979_v28 }
0x29c6   : > { %v12981_v30 = vmul.f32 %v12980_v29, %v12980_v29 }
0x29c8   : > { %v12982_v47 = vsel %vm759_vm1, %v12981_v30, 0.0 }
0x29c9   : > { %12983 = vadd.xlane.f32.xlu1 %v12982_v47 }
0x2a56   : > { %v12984_v32 = vpop.xlane.xlu1 %12983 }
0x2a57   : > { %v12985_v49 = vmul.f32 0.03125, %v12984_v32 }
0x2a59   : > { %v12986_v52 = vadd.f32 1e-05, %v12985_v49 }
0x2a5b   : > { %16366 = vrsqrt.f32 %v12986_v52 }
0x2a65   : > { %v16367_v54 = vpop.eup %16366 }
0x2a66   : > { %v12988_v56 = vmul.f32 %v16367_v54, %v12980_v29  ;;  %v13848_v29 = vld [vmem:[%s19138_s4] ss:$0 sm:$0xff] }
0x2a68   : > { %v12993_v50 = vmul.f32 %v12992_v55, %v12988_v56 }
0x2a6a   : > { %v12998_v58 = vadd.f32 %v12997_v57, %v12993_v50 }
0x2a6c   : > { %15670 = vmatmul.mubr.msk.f32.vlgmr.msra.gmra.mrb[150].mxu0 %vm759_vm1, %v12998_v58 }
0x2a6d   : > { %15699 = vmatprep.mubr.msk.f32.mxu0 %vm16435_vm0, %v16436_v11  ;;  %v13098_v11 = vrot.slane %v18592_v23, %v8985_v9  ;;  %v13197_v9 = vld [vmem:[%s19091_s19 + $0x8] sm:$0xff] }
0x2a6e   : > { %v16207_v21 = vpack.c.bf16 %v13197_v9, %v13196_v59 }
0x2a70   : > { %16208 = vmatpush3.bf16.msra.mxu0 %v16207_v21 }
0x2a71   : > { %16209 = vmatprep.subr.bf16.mxu0 %v16434_v3  ;;  %v13189_v3 = vrot.slane %v18592_v23, %v9076_v36 }
0x2a74   : > { %16211 = vmatpush3.bf16.msra.mxu0 %v16210_v62 }
0x2b3f   : > { %v13090_v0 = vpop.f32.mrb[150].mxu0 }
0x2b40   : > { %v13091_v45 = vadd.f32 %v13844_v31, %v13090_v0  ;;  %v15671_v2 = vpop.f32.mrb[151].mxu0 }
0x2b42   : > { %v13094_v4 = vmax.f32 %v13091_v45, 0.0 }
0x2b44   : > { %15689 = vmatmul.mubr.msk.f32.vlgmr.msra.gmra.mrb[150].mxu1 %vm2722_vm3, %v13094_v4 }
0x2c17   : > { %v13168_v6 = vpop.f32.mrb[150].mxu1 }
0x2c18   : > { %v13169_v22 = vadd.f32 %v13168_v6, %v13098_v11  ;;  %v15690_v20 = vpop.f32.mrb[151].mxu1 }
0x2c1a   : > { %v13172_v10 = vadd.f32 %v13169_v22, %v12998_v58 }
0x2c1c   : > { %v13173_v12 = vsel %vm759_vm1, %v13172_v10, 0.0 }
0x2c1d   : > { %13174 = vadd.xlane.f32.xlu0 %v13173_v12 }
0x2caa   : > { %v13175_v13 = vpop.xlane.xlu0 %13174 }
0x2cab   : > { %v13176_v15 = vmul.f32 0.03125, %v13175_v13 }
0x2cad   : > { %v13177_v51 = vsub.f32 %v13172_v10, %v13176_v15 }
0x2caf   : > { %v13178_v16 = vmul.f32 %v13177_v51, %v13177_v51 }
0x2cb1   : > { %v13179_v17 = vsel %vm759_vm1, %v13178_v16, 0.0 }
0x2cb2   : > { %13180 = vadd.xlane.f32.xlu1 %v13179_v17 }
0x2d3f   : > { %v13181_v5 = vpop.xlane.xlu1 %13180 }
0x2d40   : > { %v13182_v24 = vmul.f32 0.03125, %v13181_v5 }
0x2d42   : > { %v13183_v25 = vadd.f32 1e-05, %v13182_v24 }
0x2d44   : > { %16368 = vrsqrt.f32 %v13183_v25 }
0x2d4e   : > { %v16369_v14 = vpop.eup %16368 }
0x2d4f   : > { %v13185_v26 = vmul.f32 %v16369_v14, %v13177_v51 }
0x2d51   : > { %v13190_v7 = vmul.f32 %v13189_v3, %v13185_v26 }
0x2d53   : > { %v13195_v28 = vadd.f32 %v13847_v27, %v13190_v7 }
0x2d55   : > { %15700 = vmatmul.mubr.msk.f32.vlgmr.msra.gmra.mrb[152].mxu0 %vm759_vm1, %v13195_v28 }
0x2e28   : > { %v13276_v1 = vpop.f32.mrb[152].mxu0 }
0x2e29   : > { %v13277_v36 = vadd.f32 %v13848_v29, %v13276_v1  ;;  %v15701_v23 = vpop.f32.mrb[153].mxu0 }
0x2e2b   : > { %13280 = vst [vmem:[%s660_s26] sm:$0xff] %v13277_v36 }
0x2e2c   : > { %16383 = shalt.err (!%p16380_p3)
}
0x2e2d   : > { %s16384_s6 = scalar_lea.hbm %s19030_s7, 128  ;;  %s16388_s2 = scalar_lea.hbm %s19139_s1, 256 }
0x2e2e   : > { %p16385_p4 = scmp.ne.s32.totalorder %s19030_s7, %s16384_s6  ;;  %p16389_p9 = scmp.lt.u32.totalorder %s19030_s7, %s19139_s1 }
0x2e2f   : > { %p16390_p10 = scmp.lt.u32.totalorder %s16388_s2, %s16384_s6  ;;  %p16392_p12 = scmp.lt.u32.totalorder %s16384_s6, %s19030_s7 }
0x2e30   : > { %p16386_p7 = pnand %p16385_p4, %p16586_p5 }
0x2e31   : > { %p16391_p11 = por %p16390_p10, %p16389_p9 }
0x2e32   : > { %p16387_p8 = pneg %p16386_p7 }
0x2e33   : > { %p16393_p13 = por %p16392_p12, %p16391_p11 }
0x2e35   : > { %p16394_p0 = pnand %p16393_p13, %p16387_p8 }
0x2e37   : > { %16397 = shalt.err (!%p16394_p0)
}
0x2e38   : > { %16212 = dma.vmem_to_hbm [thread:$0]  (%p16586_p5), %s19032_s29, 128, %s19030_s7, %s13282_s8  }
0x2e39 PF: > { %s19140_s0 = sld [smem:[#allocation7_spill]]  ;;  %s19141_s3 = sld [smem:[#allocation5_spill]] }
0x2e3f   : > { %p16218_p1 = scmp.ge.s32.totalorder %s19140_s0, 2  ;;  %s13307_s27 = sand.u32 1, %s19141_s3  }
0x2e40   : > { %s13308_s22 = scalar_lea.sflag [#allocation3], %s13307_s27 }
0x2e41   : > { %p16215_p2 = pnand %p16218_p1, %p16590_p6 }
0x2e43   : > { %16415 = dma.done.wait (!%p16215_p2), %s13308_s22, 128  }
0x2e44   : > { %16417 = vsyncadd (!%p16215_p2), %s13308_s22, 4294967168  ;;  %s19143_s27 = sld [smem:[#allocation8_spill]]  ;;  %s19144_s6 = sld [smem:[#allocation6_spill]] }
0x2e45   : > { %s19145_s26 = sld [smem:[#allocation9_spill]]  ;;  %s19146_s2 = smov %s16424_s25 }
0x2e4a   : > { %p31_p3 = scmp.ge.s32.totalorder %s19143_s27, 4   ;;  %s19147_s25 = smov %s19144_s6 }
0x2e4c   :  { %33 = sbr.rel (!%p31_p3) target bundleno = 15 (0xf), region = 159 }
0x2e53   :  { %13313 = vsyncpa [#allocation3], 1 }
0x2e54   :  { %13315 = vsyncpa [#allocation3 + $0x1], 1 }

</bundles_post_ra>
